<compile_context>
chip_gen: v6e
topology: v6e:2x2x1
jax: 0.10.0
libtpu: 0.0.40
codegen_flags: <defaults>
</compile_context>

<pallas_src>
import math

import numpy as np
import jax
import jax.numpy as jnp
from jax.experimental import pallas as pl
from jax.experimental.pallas import tpu as pltpu

# ----------------------------- small config ---------------------------------
D_L, D_A, D_V = 12, 6, 9       # config['input_dims']
HIDDEN = 32                    # hidden_size
NUM_HEADS = 4                  # num_heads
HEAD_DIM = HIDDEN // NUM_HEADS
FFN_DIM = 64                   # ffn_dim
NUM_LAYERS = 2                 # num_layers
OUTPUT_DIM = 2                 # output_dim
SEQ = 8                        # per-modality sequence length
BATCH = 2                      # must be a power of two (parity-based cross-batch mask)
TOKENS_PER_MOD = SEQ * BATCH   # 16 token-major rows per modality (batch innermost)
TOTAL_ROWS = 3 * TOKENS_PER_MOD  # 48 fused rows processed together
LN_EPS = 1e-5                  # PyTorch TransformerEncoderLayer default
NEG_INF = -1e30                # additive mask for cross-batch attention
SLAB_LANES = 128               # lane-dense parameter slab width

assert BATCH & (BATCH - 1) == 0, "parity mask requires power-of-two BATCH"
assert D_L + D_A + D_V <= HIDDEN


# ------------------------- packed-parameter layout ----------------------------
def _round8(n):
    return -(-n // 8) * 8


def _build_layout():
    """Static (row_offset, rows, cols) table; every entry is 8-row (sublane) aligned."""
    layout = {}
    off = 0

    def add(name, rows, cols):
        nonlocal off
        layout[name] = (off, rows, cols)
        off += _round8(rows)

    add('proj_w', HIDDEN, HIDDEN)          # stacked [text_w; audio_w; visual_w; 0-pad]
    add('proj_b', TOTAL_ROWS, HIDDEN)      # per-row (pre-broadcast) projection bias
    add('out_w', HIDDEN, OUTPUT_DIM)
    add('out_b', 1, OUTPUT_DIM)
    for l in range(NUM_LAYERS):
        add(f'wqkv{l}', HIDDEN, 3 * HIDDEN)
        add(f'bqkv{l}', 1, 3 * HIDDEN)
        add(f'wo{l}', HIDDEN, HIDDEN)
        add(f'bo{l}', 1, HIDDEN)
        add(f'ln1_g{l}', 1, HIDDEN)
        add(f'ln1_b{l}', 1, HIDDEN)
        add(f'w1{l}', HIDDEN, FFN_DIM)
        add(f'b1{l}', 1, FFN_DIM)
        add(f'w2{l}', FFN_DIM, HIDDEN)
        add(f'b2{l}', 1, HIDDEN)
        add(f'ln2_g{l}', 1, HIDDEN)
        add(f'ln2_b{l}', 1, HIDDEN)
    return layout, off


LAYOUT, SLAB_ROWS = _build_layout()        # (568, 128) f32 slab  (~284 KiB -> one DMA)


# ----------------------------- in-kernel math ---------------------------------
def _erf(x):
    # Abramowitz & Stegun 7.1.26 (|err| < 1.5e-7): reproduces PyTorch's exact erf GELU
    # with only exp/mul/add (exp runs on the EUP slot).
    a1, a2, a3, a4, a5 = 0.254829592, -0.284496736, 1.421413741, -1.453152027, 1.061405429
    p = 0.3275911
    ax = jnp.abs(x)
    t = 1.0 / (1.0 + p * ax)
    poly = ((((a5 * t + a4) * t + a3) * t + a2) * t + a1) * t
    y = 1.0 - poly * jnp.exp(-ax * ax)
    return jnp.where(x < 0.0, -y, y)


def _gelu_exact(x):
    return 0.5 * x * (1.0 + _erf(x * (1.0 / math.sqrt(2.0))))


def _layer_norm(x, gamma, beta):
    mean = jnp.mean(x, axis=-1, keepdims=True)
    xc = x - mean
    var = jnp.mean(xc * xc, axis=-1, keepdims=True)
    inv = jax.lax.rsqrt(var + LN_EPS)
    return xc * inv * gamma + beta


def _attention(x, bias, wqkv, bqkv, wo, bo):
    # x: (TOTAL_ROWS, H) token-major slab; bias: additive cross-batch mask.
    qkv = jnp.dot(x, wqkv, preferred_element_type=jnp.float32) + bqkv      # (R, 3H)
    q = qkv[:, 0:HIDDEN] * jnp.float32(1.0 / math.sqrt(HEAD_DIM))          # scale folded once
    k = qkv[:, HIDDEN:2 * HIDDEN]
    v = qkv[:, 2 * HIDDEN:3 * HIDDEN]
    kt = k.T                                   # ONE (48,32)->(32,48) transpose per layer

    heads = []
    for h in range(NUM_HEADS):                 # static unroll over heads
        sl = slice(h * HEAD_DIM, (h + 1) * HEAD_DIM)
        # per-head dot is a plain (R,8)@(8,R): no per-head transpose
        s = jnp.dot(q[:, sl], kt[sl, :], preferred_element_type=jnp.float32) + bias
        s = s - jnp.max(s, axis=-1, keepdims=True)
        p = jnp.exp(s)
        inv = pl.reciprocal(jnp.sum(p, axis=-1, keepdims=True), approx=True)
        ctx_h = jnp.dot(p, v[:, sl], preferred_element_type=jnp.float32)   # (R, 8)
        heads.append(ctx_h * inv)              # normalize AFTER P@V (6x fewer elements)
    ctx = jnp.concatenate(heads, axis=-1)      # (R, H)
    return jnp.dot(ctx, wo, preferred_element_type=jnp.float32) + bo


def _encoder_layer(x, bias, wqkv, bqkv, wo, bo, g1, be1, w1, b1, w2, b2, g2, be2):
    attn = _attention(x, bias, wqkv, bqkv, wo, bo)
    # dropout1: identity (eval mode)
    x = _layer_norm(x + attn, g1, be1)
    h = jnp.dot(x, w1, preferred_element_type=jnp.float32) + b1
    h = _gelu_exact(h)
    ffn = jnp.dot(h, w2, preferred_element_type=jnp.float32) + b2
    # dropout2: identity (eval mode)
    return _layer_norm(x + ffn, g2, be2)


def _read(p_ref, name):
    off, rows, cols = LAYOUT[name]
    return p_ref[off:off + rows, 0:cols]       # static, 8-row-aligned slice


# ----------------------------- the fused kernel --------------------------------
def _small_umt_kernel(x_ref, p_ref, o_ref):
    # 1) All three tanh+Linear projections as ONE matmul:
    #    x_ref is block-diagonal packed (48, 32); zero padding -> tanh(0)=0 -> no
    #    cross-modality terms against the stacked (32, 32) projection weight.
    x = (jnp.dot(jnp.tanh(x_ref[...]), _read(p_ref, 'proj_w'),
                 preferred_element_type=jnp.float32)
         + _read(p_ref, 'proj_b'))                                   # (48, 32)

    # 2) Additive cross-batch attention mask. batch_id(row r) = r % BATCH in this
    #    token-major layout; BATCH is a power of two -> one bitwise parity op.
    r = jax.lax.broadcasted_iota(jnp.int32, (TOTAL_ROWS, TOTAL_ROWS), 0)
    c = jax.lax.broadcasted_iota(jnp.int32, (TOTAL_ROWS, TOTAL_ROWS), 1)
    bias = jnp.where(((r ^ c) & (BATCH - 1)) == 0,
                     jnp.float32(0.0), jnp.float32(NEG_INF))

    # 3) Transformer encoder layers (statically unrolled).
    for l in range(NUM_LAYERS):
        x = _encoder_layer(
            x, bias,
            _read(p_ref, f'wqkv{l}'), _read(p_ref, f'bqkv{l}'),
            _read(p_ref, f'wo{l}'), _read(p_ref, f'bo{l}'),
            _read(p_ref, f'ln1_g{l}'), _read(p_ref, f'ln1_b{l}'),
            _read(p_ref, f'w1{l}'), _read(p_ref, f'b1{l}'),
            _read(p_ref, f'w2{l}'), _read(p_ref, f'b2{l}'),
            _read(p_ref, f'ln2_g{l}'), _read(p_ref, f'ln2_b{l}'))

    # 4) Pool fused position 0 of each batch (first text token = rows 0..B-1) + fc_out.
    pooled = x[0:BATCH, :]                                            # (B, H)
    o_ref[...] = (jnp.dot(pooled, _read(p_ref, 'out_w'),
                          preferred_element_type=jnp.float32)
                  + _read(p_ref, 'out_b'))


# ----------------------------- wrapper ------------------------------------------
def small_umt_forward(param_slab, x_l, x_a, x_v):
    """x_* are seq-first (T, B, D_*) exactly like the PyTorch module."""
    T, B, _ = x_l.shape
    # Layout plumbing only (tanh stays inside the kernel):
    #   free contiguous reshape (T,B,D)->(T*B,D)  (row r -> token r//B, batch r%B),
    #   then block-diagonal column placement so the 3 projections fuse into 1 matmul.
    xl2 = x_l.reshape(T * B, D_L)
    xa2 = x_a.reshape(T * B, D_A)
    xv2 = x_v.reshape(T * B, D_V)
    x_packed = jnp.concatenate([
        jnp.pad(xl2, ((0, 0), (0, HIDDEN - D_L))),
        jnp.pad(xa2, ((0, 0), (D_L, HIDDEN - D_L - D_A))),
        jnp.pad(xv2, ((0, 0), (D_L + D_A, HIDDEN - D_L - D_A - D_V))),
    ], axis=0)                                                        # (48, 32)

    vmem = pl.BlockSpec(memory_space=pltpu.MemorySpace.VMEM)
    return pl.pallas_call(
        _small_umt_kernel,
        out_shape=jax.ShapeDtypeStruct((B, OUTPUT_DIM), jnp.float32),
        in_specs=[vmem, vmem],          # exactly TWO input DMAs
        out_specs=vmem,                 # single (B, 2) output write
    )(x_packed, param_slab)


# ----------------------------- parameter init / packing -------------------------
def _xavier_uniform(key, fan_in, fan_out):
    limit = math.sqrt(6.0 / (fan_in + fan_out))
    return jax.random.uniform(key, (fan_in, fan_out), jnp.float32, -limit, limit)


def init_param_slab(key):
    """Builds the single lane-dense parameter slab ONCE (outside the per-call path)."""
    keys = iter(jax.random.split(key, 4 + 4 * NUM_LAYERS))
    slab = np.zeros((SLAB_ROWS, SLAB_LANES), np.float32)

    def put(name, value):
        off, rows, cols = LAYOUT[name]
        slab[off:off + rows, 0:cols] = np.asarray(value, np.float32).reshape(rows, cols)

    # Stacked modality projection weight: rows [text | audio | visual | zero pad].
    proj_w = np.zeros((HIDDEN, HIDDEN), np.float32)
    proj_w[0:D_L] = np.asarray(_xavier_uniform(next(keys), D_L, HIDDEN))
    proj_w[D_L:D_L + D_A] = np.asarray(_xavier_uniform(next(keys), D_A, HIDDEN))
    proj_w[D_L + D_A:D_L + D_A + D_V] = np.asarray(_xavier_uniform(next(keys), D_V, HIDDEN))
    put('proj_w', proj_w)

    # Pre-broadcast per-row projection bias (PyTorch init: zeros); row blocks match
    # the fused slab: text tokens | audio tokens | visual tokens.
    text_b = np.zeros((HIDDEN,), np.float32)
    audio_b = np.zeros((HIDDEN,), np.float32)
    visual_b = np.zeros((HIDDEN,), np.float32)
    put('proj_b', np.concatenate([np.tile(text_b, (TOKENS_PER_MOD, 1)),
                                  np.tile(audio_b, (TOKENS_PER_MOD, 1)),
                                  np.tile(visual_b, (TOKENS_PER_MOD, 1))], axis=0))

    put('out_w', _xavier_uniform(next(keys), HIDDEN, OUTPUT_DIM))
    put('out_b', np.zeros((1, OUTPUT_DIM), np.float32))

    for l in range(NUM_LAYERS):
        put(f'wqkv{l}', _xavier_uniform(next(keys), HIDDEN, 3 * HIDDEN))  # q|k|v columns
        put(f'bqkv{l}', np.zeros((1, 3 * HIDDEN), np.float32))
        put(f'wo{l}', _xavier_uniform(next(keys), HIDDEN, HIDDEN))
        put(f'bo{l}', np.zeros((1, HIDDEN), np.float32))
        put(f'ln1_g{l}', np.ones((1, HIDDEN), np.float32))
        put(f'ln1_b{l}', np.zeros((1, HIDDEN), np.float32))
        put(f'w1{l}', _xavier_uniform(next(keys), HIDDEN, FFN_DIM))
        put(f'b1{l}', np.zeros((1, FFN_DIM), np.float32))
        put(f'w2{l}', _xavier_uniform(next(keys), FFN_DIM, HIDDEN))
        put(f'b2{l}', np.zeros((1, HIDDEN), np.float32))
        put(f'ln2_g{l}', np.ones((1, HIDDEN), np.float32))
        put(f'ln2_b{l}', np.zeros((1, HIDDEN), np.float32))

    return jnp.asarray(slab)


# ----------------------------- main ----------------------------------------------
if __name__ == "__main__":
    key = jax.random.PRNGKey(0)
    kp, kl, ka, kv = jax.random.split(key, 4)
    param_slab = init_param_slab(kp)

    # seq-first inputs, matching the PyTorch module's expected (T, B, D) layout
    x_l = jax.random.normal(kl, (SEQ, BATCH, D_L), jnp.float32)
    x_a = jax.random.normal(ka, (SEQ, BATCH, D_A), jnp.float32)
    x_v = jax.random.normal(kv, (SEQ, BATCH, D_V), jnp.float32)

    fwd = jax.jit(small_umt_forward)
    out = jax.block_until_ready(fwd(param_slab, x_l, x_a, x_v))
    assert out.shape == (BATCH, OUTPUT_DIM), out.shape
    assert bool(jnp.all(jnp.isfinite(out)))
    print("KERNEL_OK")
</pallas_src>

<mosaic_0001>
module attributes {stable_mosaic.version = 11 : i64} {
  func.func @_small_umt_kernel(%arg0: memref<48x32xf32, #tpu.memory_space<vmem>>, %arg1: memref<568x128xf32, #tpu.memory_space<vmem>>, %arg2: memref<2x2xf32, #tpu.memory_space<vmem>>) attributes {dimension_semantics = [], scalar_prefetch = 0 : i64, scratch_operands = 0 : i64, tpu.core_type = #tpu.core_type<tc>} {
    %c0 = arith.constant 0 : index
    %c0_0 = arith.constant 0 : index
    %0 = vector.load %arg0[%c0, %c0_0] : memref<48x32xf32, #tpu.memory_space<vmem>>, vector<48x32xf32>
    %1 = math.tanh %0 : vector<48x32xf32>
    %c0_1 = arith.constant 0 : index
    %c0_2 = arith.constant 0 : index
    %2 = vector.load %arg1[%c0_1, %c0_2] : memref<568x128xf32, #tpu.memory_space<vmem>>, vector<32x32xf32>
    %cst = arith.constant dense<0.000000e+00> : vector<48x32xf32>
    %3 = tpu.matmul %1, %2, %cst {dimension_numbers = #tpu.dot_dimension_numbers<[1], [0], [0], [1], [0, 0, 1, 1], [], []>} : vector<48x32xf32>, vector<32x32xf32>, vector<48x32xf32> -> vector<48x32xf32>
    %c32 = arith.constant 32 : index
    %c0_3 = arith.constant 0 : index
    %4 = vector.load %arg1[%c32, %c0_3] : memref<568x128xf32, #tpu.memory_space<vmem>>, vector<48x32xf32>
    %5 = arith.addf %3, %4 : vector<48x32xf32>
    %6 = tpu.iota {dimensions = array<i32: 0>} : vector<48x48xi32>
    %7 = tpu.iota {dimensions = array<i32: 1>} : vector<48x48xi32>
    %8 = arith.xori %6, %7 : vector<48x48xi32>
    %c1_i32 = arith.constant 1 : i32
    %9 = vector.broadcast %c1_i32 : i32 to vector<48x48xi32>
    %10 = arith.andi %8, %9 : vector<48x48xi32>
    %c0_i32 = arith.constant 0 : i32
    %11 = vector.broadcast %c0_i32 : i32 to vector<48x48xi32>
    %12 = arith.cmpi eq, %10, %11 : vector<48x48xi32>
    %cst_4 = arith.constant 0.000000e+00 : f32
    %cst_5 = arith.constant -1.000000e+30 : f32
    %13 = vector.broadcast %cst_4 : f32 to vector<48x48xf32>
    %14 = vector.broadcast %cst_5 : f32 to vector<48x48xf32>
    %15 = arith.select %12, %13, %14 : vector<48x48xi1>, vector<48x48xf32>
    %c120 = arith.constant 120 : index
    %c0_6 = arith.constant 0 : index
    %16 = vector.load %arg1[%c120, %c0_6] : memref<568x128xf32, #tpu.memory_space<vmem>>, vector<32x96xf32>
    %c152 = arith.constant 152 : index
    %c0_7 = arith.constant 0 : index
    %17 = vector.load %arg1[%c152, %c0_7] : memref<568x128xf32, #tpu.memory_space<vmem>>, vector<1x96xf32>
    %c160 = arith.constant 160 : index
    %c0_8 = arith.constant 0 : index
    %18 = vector.load %arg1[%c160, %c0_8] : memref<568x128xf32, #tpu.memory_space<vmem>>, vector<32x32xf32>
    %c192 = arith.constant 192 : index
    %c0_9 = arith.constant 0 : index
    %19 = vector.load %arg1[%c192, %c0_9] : memref<568x128xf32, #tpu.memory_space<vmem>>, vector<1x32xf32>
    %c200 = arith.constant 200 : index
    %c0_10 = arith.constant 0 : index
    %20 = vector.load %arg1[%c200, %c0_10] : memref<568x128xf32, #tpu.memory_space<vmem>>, vector<1x32xf32>
    %c208 = arith.constant 208 : index
    %c0_11 = arith.constant 0 : index
    %21 = vector.load %arg1[%c208, %c0_11] : memref<568x128xf32, #tpu.memory_space<vmem>>, vector<1x32xf32>
    %c216 = arith.constant 216 : index
    %c0_12 = arith.constant 0 : index
    %22 = vector.load %arg1[%c216, %c0_12] : memref<568x128xf32, #tpu.memory_space<vmem>>, vector<32x64xf32>
    %c248 = arith.constant 248 : index
    %c0_13 = arith.constant 0 : index
    %23 = vector.load %arg1[%c248, %c0_13] : memref<568x128xf32, #tpu.memory_space<vmem>>, vector<1x64xf32>
    %c256 = arith.constant 256 : index
    %c0_14 = arith.constant 0 : index
    %24 = vector.load %arg1[%c256, %c0_14] : memref<568x128xf32, #tpu.memory_space<vmem>>, vector<64x32xf32>
    %c320 = arith.constant 320 : index
    %c0_15 = arith.constant 0 : index
    %25 = vector.load %arg1[%c320, %c0_15] : memref<568x128xf32, #tpu.memory_space<vmem>>, vector<1x32xf32>
    %c328 = arith.constant 328 : index
    %c0_16 = arith.constant 0 : index
    %26 = vector.load %arg1[%c328, %c0_16] : memref<568x128xf32, #tpu.memory_space<vmem>>, vector<1x32xf32>
    %c336 = arith.constant 336 : index
    %c0_17 = arith.constant 0 : index
    %27 = vector.load %arg1[%c336, %c0_17] : memref<568x128xf32, #tpu.memory_space<vmem>>, vector<1x32xf32>
    %cst_18 = arith.constant dense<0.000000e+00> : vector<48x96xf32>
    %28 = tpu.matmul %5, %16, %cst_18 {dimension_numbers = #tpu.dot_dimension_numbers<[1], [0], [0], [1], [0, 0, 1, 1], [], []>} : vector<48x32xf32>, vector<32x96xf32>, vector<48x96xf32> -> vector<48x96xf32>
    %29 = vector.broadcast %17 : vector<1x96xf32> to vector<48x96xf32>
    %30 = arith.addf %28, %29 : vector<48x96xf32>
    %31 = vector.extract_strided_slice %30 {offsets = [0, 0], sizes = [48, 32], strides = [1, 1]} : vector<48x96xf32> to vector<48x32xf32>
    %cst_19 = arith.constant 0.353553385 : f32
    %32 = vector.broadcast %cst_19 : f32 to vector<48x32xf32>
    %33 = arith.mulf %31, %32 : vector<48x32xf32>
    %34 = vector.extract_strided_slice %30 {offsets = [0, 32], sizes = [48, 32], strides = [1, 1]} : vector<48x96xf32> to vector<48x32xf32>
    %35 = vector.extract_strided_slice %30 {offsets = [0, 64], sizes = [48, 32], strides = [1, 1]} : vector<48x96xf32> to vector<48x32xf32>
    %36 = tpu.transpose %34, [1, 0] : vector<48x32xf32> -> vector<32x48xf32>
    %37 = vector.extract_strided_slice %33 {offsets = [0, 0], sizes = [48, 8], strides = [1, 1]} : vector<48x32xf32> to vector<48x8xf32>
    %38 = vector.extract_strided_slice %36 {offsets = [0, 0], sizes = [8, 48], strides = [1, 1]} : vector<32x48xf32> to vector<8x48xf32>
    %cst_20 = arith.constant dense<0.000000e+00> : vector<48x48xf32>
    %39 = tpu.matmul %37, %38, %cst_20 {dimension_numbers = #tpu.dot_dimension_numbers<[1], [0], [0], [1], [0, 0, 1, 1], [], []>} : vector<48x8xf32>, vector<8x48xf32>, vector<48x48xf32> -> vector<48x48xf32>
    %40 = arith.addf %39, %15 : vector<48x48xf32>
    %cst_21 = arith.constant dense<0xFF800000> : vector<48xf32>
    %41 = vector.multi_reduction <maximumf>, %40, %cst_21 [1] : vector<48x48xf32> to vector<48xf32>
    %42 = vector.shape_cast %41 : vector<48xf32> to vector<48x1xf32>
    %43 = vector.broadcast %42 : vector<48x1xf32> to vector<48x48xf32>
    %44 = arith.subf %40, %43 : vector<48x48xf32>
    %45 = math.exp %44 : vector<48x48xf32>
    %cst_22 = arith.constant dense<0.000000e+00> : vector<48xf32>
    %46 = vector.multi_reduction <add>, %45, %cst_22 [1] : vector<48x48xf32> to vector<48xf32>
    %47 = vector.shape_cast %46 : vector<48xf32> to vector<48x1xf32>
    %48 = tpu.reciprocal %47 {approx = true} : vector<48x1xf32> -> vector<48x1xf32>
    %49 = vector.extract_strided_slice %35 {offsets = [0, 0], sizes = [48, 8], strides = [1, 1]} : vector<48x32xf32> to vector<48x8xf32>
    %cst_23 = arith.constant dense<0.000000e+00> : vector<48x8xf32>
    %50 = tpu.matmul %45, %49, %cst_23 {dimension_numbers = #tpu.dot_dimension_numbers<[1], [0], [0], [1], [0, 0, 1, 1], [], []>} : vector<48x48xf32>, vector<48x8xf32>, vector<48x8xf32> -> vector<48x8xf32>
    %51 = vector.broadcast %48 : vector<48x1xf32> to vector<48x8xf32>
    %52 = arith.mulf %50, %51 : vector<48x8xf32>
    %53 = vector.extract_strided_slice %33 {offsets = [0, 8], sizes = [48, 8], strides = [1, 1]} : vector<48x32xf32> to vector<48x8xf32>
    %54 = vector.extract_strided_slice %36 {offsets = [8, 0], sizes = [8, 48], strides = [1, 1]} : vector<32x48xf32> to vector<8x48xf32>
    %cst_24 = arith.constant dense<0.000000e+00> : vector<48x48xf32>
    %55 = tpu.matmul %53, %54, %cst_24 {dimension_numbers = #tpu.dot_dimension_numbers<[1], [0], [0], [1], [0, 0, 1, 1], [], []>} : vector<48x8xf32>, vector<8x48xf32>, vector<48x48xf32> -> vector<48x48xf32>
    %56 = arith.addf %55, %15 : vector<48x48xf32>
    %cst_25 = arith.constant dense<0xFF800000> : vector<48xf32>
    %57 = vector.multi_reduction <maximumf>, %56, %cst_25 [1] : vector<48x48xf32> to vector<48xf32>
    %58 = vector.shape_cast %57 : vector<48xf32> to vector<48x1xf32>
    %59 = vector.broadcast %58 : vector<48x1xf32> to vector<48x48xf32>
    %60 = arith.subf %56, %59 : vector<48x48xf32>
    %61 = math.exp %60 : vector<48x48xf32>
    %cst_26 = arith.constant dense<0.000000e+00> : vector<48xf32>
    %62 = vector.multi_reduction <add>, %61, %cst_26 [1] : vector<48x48xf32> to vector<48xf32>
    %63 = vector.shape_cast %62 : vector<48xf32> to vector<48x1xf32>
    %64 = tpu.reciprocal %63 {approx = true} : vector<48x1xf32> -> vector<48x1xf32>
    %65 = vector.extract_strided_slice %35 {offsets = [0, 8], sizes = [48, 8], strides = [1, 1]} : vector<48x32xf32> to vector<48x8xf32>
    %cst_27 = arith.constant dense<0.000000e+00> : vector<48x8xf32>
    %66 = tpu.matmul %61, %65, %cst_27 {dimension_numbers = #tpu.dot_dimension_numbers<[1], [0], [0], [1], [0, 0, 1, 1], [], []>} : vector<48x48xf32>, vector<48x8xf32>, vector<48x8xf32> -> vector<48x8xf32>
    %67 = vector.broadcast %64 : vector<48x1xf32> to vector<48x8xf32>
    %68 = arith.mulf %66, %67 : vector<48x8xf32>
    %69 = vector.extract_strided_slice %33 {offsets = [0, 16], sizes = [48, 8], strides = [1, 1]} : vector<48x32xf32> to vector<48x8xf32>
    %70 = vector.extract_strided_slice %36 {offsets = [16, 0], sizes = [8, 48], strides = [1, 1]} : vector<32x48xf32> to vector<8x48xf32>
    %cst_28 = arith.constant dense<0.000000e+00> : vector<48x48xf32>
    %71 = tpu.matmul %69, %70, %cst_28 {dimension_numbers = #tpu.dot_dimension_numbers<[1], [0], [0], [1], [0, 0, 1, 1], [], []>} : vector<48x8xf32>, vector<8x48xf32>, vector<48x48xf32> -> vector<48x48xf32>
    %72 = arith.addf %71, %15 : vector<48x48xf32>
    %cst_29 = arith.constant dense<0xFF800000> : vector<48xf32>
    %73 = vector.multi_reduction <maximumf>, %72, %cst_29 [1] : vector<48x48xf32> to vector<48xf32>
    %74 = vector.shape_cast %73 : vector<48xf32> to vector<48x1xf32>
    %75 = vector.broadcast %74 : vector<48x1xf32> to vector<48x48xf32>
    %76 = arith.subf %72, %75 : vector<48x48xf32>
    %77 = math.exp %76 : vector<48x48xf32>
    %cst_30 = arith.constant dense<0.000000e+00> : vector<48xf32>
    %78 = vector.multi_reduction <add>, %77, %cst_30 [1] : vector<48x48xf32> to vector<48xf32>
    %79 = vector.shape_cast %78 : vector<48xf32> to vector<48x1xf32>
    %80 = tpu.reciprocal %79 {approx = true} : vector<48x1xf32> -> vector<48x1xf32>
    %81 = vector.extract_strided_slice %35 {offsets = [0, 16], sizes = [48, 8], strides = [1, 1]} : vector<48x32xf32> to vector<48x8xf32>
    %cst_31 = arith.constant dense<0.000000e+00> : vector<48x8xf32>
    %82 = tpu.matmul %77, %81, %cst_31 {dimension_numbers = #tpu.dot_dimension_numbers<[1], [0], [0], [1], [0, 0, 1, 1], [], []>} : vector<48x48xf32>, vector<48x8xf32>, vector<48x8xf32> -> vector<48x8xf32>
    %83 = vector.broadcast %80 : vector<48x1xf32> to vector<48x8xf32>
    %84 = arith.mulf %82, %83 : vector<48x8xf32>
    %85 = vector.extract_strided_slice %33 {offsets = [0, 24], sizes = [48, 8], strides = [1, 1]} : vector<48x32xf32> to vector<48x8xf32>
    %86 = vector.extract_strided_slice %36 {offsets = [24, 0], sizes = [8, 48], strides = [1, 1]} : vector<32x48xf32> to vector<8x48xf32>
    %cst_32 = arith.constant dense<0.000000e+00> : vector<48x48xf32>
    %87 = tpu.matmul %85, %86, %cst_32 {dimension_numbers = #tpu.dot_dimension_numbers<[1], [0], [0], [1], [0, 0, 1, 1], [], []>} : vector<48x8xf32>, vector<8x48xf32>, vector<48x48xf32> -> vector<48x48xf32>
    %88 = arith.addf %87, %15 : vector<48x48xf32>
    %cst_33 = arith.constant dense<0xFF800000> : vector<48xf32>
    %89 = vector.multi_reduction <maximumf>, %88, %cst_33 [1] : vector<48x48xf32> to vector<48xf32>
    %90 = vector.shape_cast %89 : vector<48xf32> to vector<48x1xf32>
    %91 = vector.broadcast %90 : vector<48x1xf32> to vector<48x48xf32>
    %92 = arith.subf %88, %91 : vector<48x48xf32>
    %93 = math.exp %92 : vector<48x48xf32>
    %cst_34 = arith.constant dense<0.000000e+00> : vector<48xf32>
    %94 = vector.multi_reduction <add>, %93, %cst_34 [1] : vector<48x48xf32> to vector<48xf32>
    %95 = vector.shape_cast %94 : vector<48xf32> to vector<48x1xf32>
    %96 = tpu.reciprocal %95 {approx = true} : vector<48x1xf32> -> vector<48x1xf32>
    %97 = vector.extract_strided_slice %35 {offsets = [0, 24], sizes = [48, 8], strides = [1, 1]} : vector<48x32xf32> to vector<48x8xf32>
    %cst_35 = arith.constant dense<0.000000e+00> : vector<48x8xf32>
    %98 = tpu.matmul %93, %97, %cst_35 {dimension_numbers = #tpu.dot_dimension_numbers<[1], [0], [0], [1], [0, 0, 1, 1], [], []>} : vector<48x48xf32>, vector<48x8xf32>, vector<48x8xf32> -> vector<48x8xf32>
    %99 = vector.broadcast %96 : vector<48x1xf32> to vector<48x8xf32>
    %100 = arith.mulf %98, %99 : vector<48x8xf32>
    %101 = tpu.concatenate %52, %68, %84, %100 in 1 : vector<48x8xf32>, vector<48x8xf32>, vector<48x8xf32>, vector<48x8xf32> -> vector<48x32xf32>
    %cst_36 = arith.constant dense<0.000000e+00> : vector<48x32xf32>
    %102 = tpu.matmul %101, %18, %cst_36 {dimension_numbers = #tpu.dot_dimension_numbers<[1], [0], [0], [1], [0, 0, 1, 1], [], []>} : vector<48x32xf32>, vector<32x32xf32>, vector<48x32xf32> -> vector<48x32xf32>
    %103 = vector.broadcast %19 : vector<1x32xf32> to vector<48x32xf32>
    %104 = arith.addf %102, %103 : vector<48x32xf32>
    %105 = arith.addf %5, %104 : vector<48x32xf32>
    %cst_37 = arith.constant dense<0.000000e+00> : vector<48xf32>
    %106 = vector.multi_reduction <add>, %105, %cst_37 [1] : vector<48x32xf32> to vector<48xf32>
    %107 = vector.shape_cast %106 : vector<48xf32> to vector<48x1xf32>
    %cst_38 = arith.constant 3.200000e+01 : f32
    %108 = vector.broadcast %cst_38 : f32 to vector<48x1xf32>
    %109 = arith.divf %107, %108 : vector<48x1xf32>
    %110 = vector.broadcast %109 : vector<48x1xf32> to vector<48x32xf32>
    %111 = arith.subf %105, %110 : vector<48x32xf32>
    %112 = arith.mulf %111, %111 : vector<48x32xf32>
    %cst_39 = arith.constant dense<0.000000e+00> : vector<48xf32>
    %113 = vector.multi_reduction <add>, %112, %cst_39 [1] : vector<48x32xf32> to vector<48xf32>
    %114 = vector.shape_cast %113 : vector<48xf32> to vector<48x1xf32>
    %cst_40 = arith.constant 3.200000e+01 : f32
    %115 = vector.broadcast %cst_40 : f32 to vector<48x1xf32>
    %116 = arith.divf %114, %115 : vector<48x1xf32>
    %cst_41 = arith.constant 9.99999974E-6 : f32
    %117 = vector.broadcast %cst_41 : f32 to vector<48x1xf32>
    %118 = arith.addf %116, %117 : vector<48x1xf32>
    %119 = math.rsqrt %118 : vector<48x1xf32>
    %120 = vector.broadcast %119 : vector<48x1xf32> to vector<48x32xf32>
    %121 = arith.mulf %111, %120 : vector<48x32xf32>
    %122 = vector.broadcast %20 : vector<1x32xf32> to vector<48x32xf32>
    %123 = arith.mulf %121, %122 : vector<48x32xf32>
    %124 = vector.broadcast %21 : vector<1x32xf32> to vector<48x32xf32>
    %125 = arith.addf %123, %124 : vector<48x32xf32>
    %cst_42 = arith.constant dense<0.000000e+00> : vector<48x64xf32>
    %126 = tpu.matmul %125, %22, %cst_42 {dimension_numbers = #tpu.dot_dimension_numbers<[1], [0], [0], [1], [0, 0, 1, 1], [], []>} : vector<48x32xf32>, vector<32x64xf32>, vector<48x64xf32> -> vector<48x64xf32>
    %127 = vector.broadcast %23 : vector<1x64xf32> to vector<48x64xf32>
    %128 = arith.addf %126, %127 : vector<48x64xf32>
    %cst_43 = arith.constant 5.000000e-01 : f32
    %129 = vector.broadcast %cst_43 : f32 to vector<48x64xf32>
    %130 = arith.mulf %129, %128 : vector<48x64xf32>
    %cst_44 = arith.constant 0.707106769 : f32
    %131 = vector.broadcast %cst_44 : f32 to vector<48x64xf32>
    %132 = arith.mulf %128, %131 : vector<48x64xf32>
    %133 = math.absf %132 : vector<48x64xf32>
    %cst_45 = arith.constant 0.327591091 : f32
    %134 = vector.broadcast %cst_45 : f32 to vector<48x64xf32>
    %135 = arith.mulf %134, %133 : vector<48x64xf32>
    %cst_46 = arith.constant 1.000000e+00 : f32
    %136 = vector.broadcast %cst_46 : f32 to vector<48x64xf32>
    %137 = arith.addf %136, %135 : vector<48x64xf32>
    %cst_47 = arith.constant 1.000000e+00 : f32
    %138 = vector.broadcast %cst_47 : f32 to vector<48x64xf32>
    %139 = arith.divf %138, %137 : vector<48x64xf32>
    %cst_48 = arith.constant 1.06140542 : f32
    %140 = vector.broadcast %cst_48 : f32 to vector<48x64xf32>
    %141 = arith.mulf %140, %139 : vector<48x64xf32>
    %cst_49 = arith.constant -1.45315206 : f32
    %142 = vector.broadcast %cst_49 : f32 to vector<48x64xf32>
    %143 = arith.addf %141, %142 : vector<48x64xf32>
    %144 = arith.mulf %143, %139 : vector<48x64xf32>
    %cst_50 = arith.constant 1.42141378 : f32
    %145 = vector.broadcast %cst_50 : f32 to vector<48x64xf32>
    %146 = arith.addf %144, %145 : vector<48x64xf32>
    %147 = arith.mulf %146, %139 : vector<48x64xf32>
    %cst_51 = arith.constant -0.284496725 : f32
    %148 = vector.broadcast %cst_51 : f32 to vector<48x64xf32>
    %149 = arith.addf %147, %148 : vector<48x64xf32>
    %150 = arith.mulf %149, %139 : vector<48x64xf32>
    %cst_52 = arith.constant 0.254829586 : f32
    %151 = vector.broadcast %cst_52 : f32 to vector<48x64xf32>
    %152 = arith.addf %150, %151 : vector<48x64xf32>
    %153 = arith.mulf %152, %139 : vector<48x64xf32>
    %cst_53 = arith.constant 0.000000e+00 : f32
    %154 = vector.broadcast %cst_53 : f32 to vector<48x64xf32>
    %155 = arith.subf %154, %133 : vector<48x64xf32>
    %156 = arith.mulf %155, %133 : vector<48x64xf32>
    %157 = math.exp %156 : vector<48x64xf32>
    %158 = arith.mulf %153, %157 : vector<48x64xf32>
    %cst_54 = arith.constant 1.000000e+00 : f32
    %159 = vector.broadcast %cst_54 : f32 to vector<48x64xf32>
    %160 = arith.subf %159, %158 : vector<48x64xf32>
    %cst_55 = arith.constant 0.000000e+00 : f32
    %161 = vector.broadcast %cst_55 : f32 to vector<48x64xf32>
    %162 = arith.cmpf olt, %132, %161 : vector<48x64xf32>
    %cst_56 = arith.constant 0.000000e+00 : f32
    %163 = vector.broadcast %cst_56 : f32 to vector<48x64xf32>
    %164 = arith.subf %163, %160 : vector<48x64xf32>
    %165 = arith.select %162, %164, %160 : vector<48x64xi1>, vector<48x64xf32>
    %cst_57 = arith.constant 1.000000e+00 : f32
    %166 = vector.broadcast %cst_57 : f32 to vector<48x64xf32>
    %167 = arith.addf %166, %165 : vector<48x64xf32>
    %168 = arith.mulf %130, %167 : vector<48x64xf32>
    %cst_58 = arith.constant dense<0.000000e+00> : vector<48x32xf32>
    %169 = tpu.matmul %168, %24, %cst_58 {dimension_numbers = #tpu.dot_dimension_numbers<[1], [0], [0], [1], [0, 0, 1, 1], [], []>} : vector<48x64xf32>, vector<64x32xf32>, vector<48x32xf32> -> vector<48x32xf32>
    %170 = vector.broadcast %25 : vector<1x32xf32> to vector<48x32xf32>
    %171 = arith.addf %169, %170 : vector<48x32xf32>
    %172 = arith.addf %125, %171 : vector<48x32xf32>
    %cst_59 = arith.constant dense<0.000000e+00> : vector<48xf32>
    %173 = vector.multi_reduction <add>, %172, %cst_59 [1] : vector<48x32xf32> to vector<48xf32>
    %174 = vector.shape_cast %173 : vector<48xf32> to vector<48x1xf32>
    %cst_60 = arith.constant 3.200000e+01 : f32
    %175 = vector.broadcast %cst_60 : f32 to vector<48x1xf32>
    %176 = arith.divf %174, %175 : vector<48x1xf32>
    %177 = vector.broadcast %176 : vector<48x1xf32> to vector<48x32xf32>
    %178 = arith.subf %172, %177 : vector<48x32xf32>
    %179 = arith.mulf %178, %178 : vector<48x32xf32>
    %cst_61 = arith.constant dense<0.000000e+00> : vector<48xf32>
    %180 = vector.multi_reduction <add>, %179, %cst_61 [1] : vector<48x32xf32> to vector<48xf32>
    %181 = vector.shape_cast %180 : vector<48xf32> to vector<48x1xf32>
    %cst_62 = arith.constant 3.200000e+01 : f32
    %182 = vector.broadcast %cst_62 : f32 to vector<48x1xf32>
    %183 = arith.divf %181, %182 : vector<48x1xf32>
    %cst_63 = arith.constant 9.99999974E-6 : f32
    %184 = vector.broadcast %cst_63 : f32 to vector<48x1xf32>
    %185 = arith.addf %183, %184 : vector<48x1xf32>
    %186 = math.rsqrt %185 : vector<48x1xf32>
    %187 = vector.broadcast %186 : vector<48x1xf32> to vector<48x32xf32>
    %188 = arith.mulf %178, %187 : vector<48x32xf32>
    %189 = vector.broadcast %26 : vector<1x32xf32> to vector<48x32xf32>
    %190 = arith.mulf %188, %189 : vector<48x32xf32>
    %191 = vector.broadcast %27 : vector<1x32xf32> to vector<48x32xf32>
    %192 = arith.addf %190, %191 : vector<48x32xf32>
    %c344 = arith.constant 344 : index
    %c0_64 = arith.constant 0 : index
    %193 = vector.load %arg1[%c344, %c0_64] : memref<568x128xf32, #tpu.memory_space<vmem>>, vector<32x96xf32>
    %c376 = arith.constant 376 : index
    %c0_65 = arith.constant 0 : index
    %194 = vector.load %arg1[%c376, %c0_65] : memref<568x128xf32, #tpu.memory_space<vmem>>, vector<1x96xf32>
    %c384 = arith.constant 384 : index
    %c0_66 = arith.constant 0 : index
    %195 = vector.load %arg1[%c384, %c0_66] : memref<568x128xf32, #tpu.memory_space<vmem>>, vector<32x32xf32>
    %c416 = arith.constant 416 : index
    %c0_67 = arith.constant 0 : index
    %196 = vector.load %arg1[%c416, %c0_67] : memref<568x128xf32, #tpu.memory_space<vmem>>, vector<1x32xf32>
    %c424 = arith.constant 424 : index
    %c0_68 = arith.constant 0 : index
    %197 = vector.load %arg1[%c424, %c0_68] : memref<568x128xf32, #tpu.memory_space<vmem>>, vector<1x32xf32>
    %c432 = arith.constant 432 : index
    %c0_69 = arith.constant 0 : index
    %198 = vector.load %arg1[%c432, %c0_69] : memref<568x128xf32, #tpu.memory_space<vmem>>, vector<1x32xf32>
    %c440 = arith.constant 440 : index
    %c0_70 = arith.constant 0 : index
    %199 = vector.load %arg1[%c440, %c0_70] : memref<568x128xf32, #tpu.memory_space<vmem>>, vector<32x64xf32>
    %c472 = arith.constant 472 : index
    %c0_71 = arith.constant 0 : index
    %200 = vector.load %arg1[%c472, %c0_71] : memref<568x128xf32, #tpu.memory_space<vmem>>, vector<1x64xf32>
    %c480 = arith.constant 480 : index
    %c0_72 = arith.constant 0 : index
    %201 = vector.load %arg1[%c480, %c0_72] : memref<568x128xf32, #tpu.memory_space<vmem>>, vector<64x32xf32>
    %c544 = arith.constant 544 : index
    %c0_73 = arith.constant 0 : index
    %202 = vector.load %arg1[%c544, %c0_73] : memref<568x128xf32, #tpu.memory_space<vmem>>, vector<1x32xf32>
    %c552 = arith.constant 552 : index
    %c0_74 = arith.constant 0 : index
    %203 = vector.load %arg1[%c552, %c0_74] : memref<568x128xf32, #tpu.memory_space<vmem>>, vector<1x32xf32>
    %c560 = arith.constant 560 : index
    %c0_75 = arith.constant 0 : index
    %204 = vector.load %arg1[%c560, %c0_75] : memref<568x128xf32, #tpu.memory_space<vmem>>, vector<1x32xf32>
    %cst_76 = arith.constant dense<0.000000e+00> : vector<48x96xf32>
    %205 = tpu.matmul %192, %193, %cst_76 {dimension_numbers = #tpu.dot_dimension_numbers<[1], [0], [0], [1], [0, 0, 1, 1], [], []>} : vector<48x32xf32>, vector<32x96xf32>, vector<48x96xf32> -> vector<48x96xf32>
    %206 = vector.broadcast %194 : vector<1x96xf32> to vector<48x96xf32>
    %207 = arith.addf %205, %206 : vector<48x96xf32>
    %208 = vector.extract_strided_slice %207 {offsets = [0, 0], sizes = [48, 32], strides = [1, 1]} : vector<48x96xf32> to vector<48x32xf32>
    %cst_77 = arith.constant 0.353553385 : f32
    %209 = vector.broadcast %cst_77 : f32 to vector<48x32xf32>
    %210 = arith.mulf %208, %209 : vector<48x32xf32>
    %211 = vector.extract_strided_slice %207 {offsets = [0, 32], sizes = [48, 32], strides = [1, 1]} : vector<48x96xf32> to vector<48x32xf32>
    %212 = vector.extract_strided_slice %207 {offsets = [0, 64], sizes = [48, 32], strides = [1, 1]} : vector<48x96xf32> to vector<48x32xf32>
    %213 = tpu.transpose %211, [1, 0] : vector<48x32xf32> -> vector<32x48xf32>
    %214 = vector.extract_strided_slice %210 {offsets = [0, 0], sizes = [48, 8], strides = [1, 1]} : vector<48x32xf32> to vector<48x8xf32>
    %215 = vector.extract_strided_slice %213 {offsets = [0, 0], sizes = [8, 48], strides = [1, 1]} : vector<32x48xf32> to vector<8x48xf32>
    %cst_78 = arith.constant dense<0.000000e+00> : vector<48x48xf32>
    %216 = tpu.matmul %214, %215, %cst_78 {dimension_numbers = #tpu.dot_dimension_numbers<[1], [0], [0], [1], [0, 0, 1, 1], [], []>} : vector<48x8xf32>, vector<8x48xf32>, vector<48x48xf32> -> vector<48x48xf32>
    %217 = arith.addf %216, %15 : vector<48x48xf32>
    %cst_79 = arith.constant dense<0xFF800000> : vector<48xf32>
    %218 = vector.multi_reduction <maximumf>, %217, %cst_79 [1] : vector<48x48xf32> to vector<48xf32>
    %219 = vector.shape_cast %218 : vector<48xf32> to vector<48x1xf32>
    %220 = vector.broadcast %219 : vector<48x1xf32> to vector<48x48xf32>
    %221 = arith.subf %217, %220 : vector<48x48xf32>
    %222 = math.exp %221 : vector<48x48xf32>
    %cst_80 = arith.constant dense<0.000000e+00> : vector<48xf32>
    %223 = vector.multi_reduction <add>, %222, %cst_80 [1] : vector<48x48xf32> to vector<48xf32>
    %224 = vector.shape_cast %223 : vector<48xf32> to vector<48x1xf32>
    %225 = tpu.reciprocal %224 {approx = true} : vector<48x1xf32> -> vector<48x1xf32>
    %226 = vector.extract_strided_slice %212 {offsets = [0, 0], sizes = [48, 8], strides = [1, 1]} : vector<48x32xf32> to vector<48x8xf32>
    %cst_81 = arith.constant dense<0.000000e+00> : vector<48x8xf32>
    %227 = tpu.matmul %222, %226, %cst_81 {dimension_numbers = #tpu.dot_dimension_numbers<[1], [0], [0], [1], [0, 0, 1, 1], [], []>} : vector<48x48xf32>, vector<48x8xf32>, vector<48x8xf32> -> vector<48x8xf32>
    %228 = vector.broadcast %225 : vector<48x1xf32> to vector<48x8xf32>
    %229 = arith.mulf %227, %228 : vector<48x8xf32>
    %230 = vector.extract_strided_slice %210 {offsets = [0, 8], sizes = [48, 8], strides = [1, 1]} : vector<48x32xf32> to vector<48x8xf32>
    %231 = vector.extract_strided_slice %213 {offsets = [8, 0], sizes = [8, 48], strides = [1, 1]} : vector<32x48xf32> to vector<8x48xf32>
    %cst_82 = arith.constant dense<0.000000e+00> : vector<48x48xf32>
    %232 = tpu.matmul %230, %231, %cst_82 {dimension_numbers = #tpu.dot_dimension_numbers<[1], [0], [0], [1], [0, 0, 1, 1], [], []>} : vector<48x8xf32>, vector<8x48xf32>, vector<48x48xf32> -> vector<48x48xf32>
    %233 = arith.addf %232, %15 : vector<48x48xf32>
    %cst_83 = arith.constant dense<0xFF800000> : vector<48xf32>
    %234 = vector.multi_reduction <maximumf>, %233, %cst_83 [1] : vector<48x48xf32> to vector<48xf32>
    %235 = vector.shape_cast %234 : vector<48xf32> to vector<48x1xf32>
    %236 = vector.broadcast %235 : vector<48x1xf32> to vector<48x48xf32>
    %237 = arith.subf %233, %236 : vector<48x48xf32>
    %238 = math.exp %237 : vector<48x48xf32>
    %cst_84 = arith.constant dense<0.000000e+00> : vector<48xf32>
    %239 = vector.multi_reduction <add>, %238, %cst_84 [1] : vector<48x48xf32> to vector<48xf32>
    %240 = vector.shape_cast %239 : vector<48xf32> to vector<48x1xf32>
    %241 = tpu.reciprocal %240 {approx = true} : vector<48x1xf32> -> vector<48x1xf32>
    %242 = vector.extract_strided_slice %212 {offsets = [0, 8], sizes = [48, 8], strides = [1, 1]} : vector<48x32xf32> to vector<48x8xf32>
    %cst_85 = arith.constant dense<0.000000e+00> : vector<48x8xf32>
    %243 = tpu.matmul %238, %242, %cst_85 {dimension_numbers = #tpu.dot_dimension_numbers<[1], [0], [0], [1], [0, 0, 1, 1], [], []>} : vector<48x48xf32>, vector<48x8xf32>, vector<48x8xf32> -> vector<48x8xf32>
    %244 = vector.broadcast %241 : vector<48x1xf32> to vector<48x8xf32>
    %245 = arith.mulf %243, %244 : vector<48x8xf32>
    %246 = vector.extract_strided_slice %210 {offsets = [0, 16], sizes = [48, 8], strides = [1, 1]} : vector<48x32xf32> to vector<48x8xf32>
    %247 = vector.extract_strided_slice %213 {offsets = [16, 0], sizes = [8, 48], strides = [1, 1]} : vector<32x48xf32> to vector<8x48xf32>
    %cst_86 = arith.constant dense<0.000000e+00> : vector<48x48xf32>
    %248 = tpu.matmul %246, %247, %cst_86 {dimension_numbers = #tpu.dot_dimension_numbers<[1], [0], [0], [1], [0, 0, 1, 1], [], []>} : vector<48x8xf32>, vector<8x48xf32>, vector<48x48xf32> -> vector<48x48xf32>
    %249 = arith.addf %248, %15 : vector<48x48xf32>
    %cst_87 = arith.constant dense<0xFF800000> : vector<48xf32>
    %250 = vector.multi_reduction <maximumf>, %249, %cst_87 [1] : vector<48x48xf32> to vector<48xf32>
    %251 = vector.shape_cast %250 : vector<48xf32> to vector<48x1xf32>
    %252 = vector.broadcast %251 : vector<48x1xf32> to vector<48x48xf32>
    %253 = arith.subf %249, %252 : vector<48x48xf32>
    %254 = math.exp %253 : vector<48x48xf32>
    %cst_88 = arith.constant dense<0.000000e+00> : vector<48xf32>
    %255 = vector.multi_reduction <add>, %254, %cst_88 [1] : vector<48x48xf32> to vector<48xf32>
    %256 = vector.shape_cast %255 : vector<48xf32> to vector<48x1xf32>
    %257 = tpu.reciprocal %256 {approx = true} : vector<48x1xf32> -> vector<48x1xf32>
    %258 = vector.extract_strided_slice %212 {offsets = [0, 16], sizes = [48, 8], strides = [1, 1]} : vector<48x32xf32> to vector<48x8xf32>
    %cst_89 = arith.constant dense<0.000000e+00> : vector<48x8xf32>
    %259 = tpu.matmul %254, %258, %cst_89 {dimension_numbers = #tpu.dot_dimension_numbers<[1], [0], [0], [1], [0, 0, 1, 1], [], []>} : vector<48x48xf32>, vector<48x8xf32>, vector<48x8xf32> -> vector<48x8xf32>
    %260 = vector.broadcast %257 : vector<48x1xf32> to vector<48x8xf32>
    %261 = arith.mulf %259, %260 : vector<48x8xf32>
    %262 = vector.extract_strided_slice %210 {offsets = [0, 24], sizes = [48, 8], strides = [1, 1]} : vector<48x32xf32> to vector<48x8xf32>
    %263 = vector.extract_strided_slice %213 {offsets = [24, 0], sizes = [8, 48], strides = [1, 1]} : vector<32x48xf32> to vector<8x48xf32>
    %cst_90 = arith.constant dense<0.000000e+00> : vector<48x48xf32>
    %264 = tpu.matmul %262, %263, %cst_90 {dimension_numbers = #tpu.dot_dimension_numbers<[1], [0], [0], [1], [0, 0, 1, 1], [], []>} : vector<48x8xf32>, vector<8x48xf32>, vector<48x48xf32> -> vector<48x48xf32>
    %265 = arith.addf %264, %15 : vector<48x48xf32>
    %cst_91 = arith.constant dense<0xFF800000> : vector<48xf32>
    %266 = vector.multi_reduction <maximumf>, %265, %cst_91 [1] : vector<48x48xf32> to vector<48xf32>
    %267 = vector.shape_cast %266 : vector<48xf32> to vector<48x1xf32>
    %268 = vector.broadcast %267 : vector<48x1xf32> to vector<48x48xf32>
    %269 = arith.subf %265, %268 : vector<48x48xf32>
    %270 = math.exp %269 : vector<48x48xf32>
    %cst_92 = arith.constant dense<0.000000e+00> : vector<48xf32>
    %271 = vector.multi_reduction <add>, %270, %cst_92 [1] : vector<48x48xf32> to vector<48xf32>
    %272 = vector.shape_cast %271 : vector<48xf32> to vector<48x1xf32>
    %273 = tpu.reciprocal %272 {approx = true} : vector<48x1xf32> -> vector<48x1xf32>
    %274 = vector.extract_strided_slice %212 {offsets = [0, 24], sizes = [48, 8], strides = [1, 1]} : vector<48x32xf32> to vector<48x8xf32>
    %cst_93 = arith.constant dense<0.000000e+00> : vector<48x8xf32>
    %275 = tpu.matmul %270, %274, %cst_93 {dimension_numbers = #tpu.dot_dimension_numbers<[1], [0], [0], [1], [0, 0, 1, 1], [], []>} : vector<48x48xf32>, vector<48x8xf32>, vector<48x8xf32> -> vector<48x8xf32>
    %276 = vector.broadcast %273 : vector<48x1xf32> to vector<48x8xf32>
    %277 = arith.mulf %275, %276 : vector<48x8xf32>
    %278 = tpu.concatenate %229, %245, %261, %277 in 1 : vector<48x8xf32>, vector<48x8xf32>, vector<48x8xf32>, vector<48x8xf32> -> vector<48x32xf32>
    %cst_94 = arith.constant dense<0.000000e+00> : vector<48x32xf32>
    %279 = tpu.matmul %278, %195, %cst_94 {dimension_numbers = #tpu.dot_dimension_numbers<[1], [0], [0], [1], [0, 0, 1, 1], [], []>} : vector<48x32xf32>, vector<32x32xf32>, vector<48x32xf32> -> vector<48x32xf32>
    %280 = vector.broadcast %196 : vector<1x32xf32> to vector<48x32xf32>
    %281 = arith.addf %279, %280 : vector<48x32xf32>
    %282 = arith.addf %192, %281 : vector<48x32xf32>
    %cst_95 = arith.constant dense<0.000000e+00> : vector<48xf32>
    %283 = vector.multi_reduction <add>, %282, %cst_95 [1] : vector<48x32xf32> to vector<48xf32>
    %284 = vector.shape_cast %283 : vector<48xf32> to vector<48x1xf32>
    %cst_96 = arith.constant 3.200000e+01 : f32
    %285 = vector.broadcast %cst_96 : f32 to vector<48x1xf32>
    %286 = arith.divf %284, %285 : vector<48x1xf32>
    %287 = vector.broadcast %286 : vector<48x1xf32> to vector<48x32xf32>
    %288 = arith.subf %282, %287 : vector<48x32xf32>
    %289 = arith.mulf %288, %288 : vector<48x32xf32>
    %cst_97 = arith.constant dense<0.000000e+00> : vector<48xf32>
    %290 = vector.multi_reduction <add>, %289, %cst_97 [1] : vector<48x32xf32> to vector<48xf32>
    %291 = vector.shape_cast %290 : vector<48xf32> to vector<48x1xf32>
    %cst_98 = arith.constant 3.200000e+01 : f32
    %292 = vector.broadcast %cst_98 : f32 to vector<48x1xf32>
    %293 = arith.divf %291, %292 : vector<48x1xf32>
    %cst_99 = arith.constant 9.99999974E-6 : f32
    %294 = vector.broadcast %cst_99 : f32 to vector<48x1xf32>
    %295 = arith.addf %293, %294 : vector<48x1xf32>
    %296 = math.rsqrt %295 : vector<48x1xf32>
    %297 = vector.broadcast %296 : vector<48x1xf32> to vector<48x32xf32>
    %298 = arith.mulf %288, %297 : vector<48x32xf32>
    %299 = vector.broadcast %197 : vector<1x32xf32> to vector<48x32xf32>
    %300 = arith.mulf %298, %299 : vector<48x32xf32>
    %301 = vector.broadcast %198 : vector<1x32xf32> to vector<48x32xf32>
    %302 = arith.addf %300, %301 : vector<48x32xf32>
    %cst_100 = arith.constant dense<0.000000e+00> : vector<48x64xf32>
    %303 = tpu.matmul %302, %199, %cst_100 {dimension_numbers = #tpu.dot_dimension_numbers<[1], [0], [0], [1], [0, 0, 1, 1], [], []>} : vector<48x32xf32>, vector<32x64xf32>, vector<48x64xf32> -> vector<48x64xf32>
    %304 = vector.broadcast %200 : vector<1x64xf32> to vector<48x64xf32>
    %305 = arith.addf %303, %304 : vector<48x64xf32>
    %cst_101 = arith.constant 5.000000e-01 : f32
    %306 = vector.broadcast %cst_101 : f32 to vector<48x64xf32>
    %307 = arith.mulf %306, %305 : vector<48x64xf32>
    %cst_102 = arith.constant 0.707106769 : f32
    %308 = vector.broadcast %cst_102 : f32 to vector<48x64xf32>
    %309 = arith.mulf %305, %308 : vector<48x64xf32>
    %310 = math.absf %309 : vector<48x64xf32>
    %cst_103 = arith.constant 0.327591091 : f32
    %311 = vector.broadcast %cst_103 : f32 to vector<48x64xf32>
    %312 = arith.mulf %311, %310 : vector<48x64xf32>
    %cst_104 = arith.constant 1.000000e+00 : f32
    %313 = vector.broadcast %cst_104 : f32 to vector<48x64xf32>
    %314 = arith.addf %313, %312 : vector<48x64xf32>
    %cst_105 = arith.constant 1.000000e+00 : f32
    %315 = vector.broadcast %cst_105 : f32 to vector<48x64xf32>
    %316 = arith.divf %315, %314 : vector<48x64xf32>
    %cst_106 = arith.constant 1.06140542 : f32
    %317 = vector.broadcast %cst_106 : f32 to vector<48x64xf32>
    %318 = arith.mulf %317, %316 : vector<48x64xf32>
    %cst_107 = arith.constant -1.45315206 : f32
    %319 = vector.broadcast %cst_107 : f32 to vector<48x64xf32>
    %320 = arith.addf %318, %319 : vector<48x64xf32>
    %321 = arith.mulf %320, %316 : vector<48x64xf32>
    %cst_108 = arith.constant 1.42141378 : f32
    %322 = vector.broadcast %cst_108 : f32 to vector<48x64xf32>
    %323 = arith.addf %321, %322 : vector<48x64xf32>
    %324 = arith.mulf %323, %316 : vector<48x64xf32>
    %cst_109 = arith.constant -0.284496725 : f32
    %325 = vector.broadcast %cst_109 : f32 to vector<48x64xf32>
    %326 = arith.addf %324, %325 : vector<48x64xf32>
    %327 = arith.mulf %326, %316 : vector<48x64xf32>
    %cst_110 = arith.constant 0.254829586 : f32
    %328 = vector.broadcast %cst_110 : f32 to vector<48x64xf32>
    %329 = arith.addf %327, %328 : vector<48x64xf32>
    %330 = arith.mulf %329, %316 : vector<48x64xf32>
    %cst_111 = arith.constant 0.000000e+00 : f32
    %331 = vector.broadcast %cst_111 : f32 to vector<48x64xf32>
    %332 = arith.subf %331, %310 : vector<48x64xf32>
    %333 = arith.mulf %332, %310 : vector<48x64xf32>
    %334 = math.exp %333 : vector<48x64xf32>
    %335 = arith.mulf %330, %334 : vector<48x64xf32>
    %cst_112 = arith.constant 1.000000e+00 : f32
    %336 = vector.broadcast %cst_112 : f32 to vector<48x64xf32>
    %337 = arith.subf %336, %335 : vector<48x64xf32>
    %cst_113 = arith.constant 0.000000e+00 : f32
    %338 = vector.broadcast %cst_113 : f32 to vector<48x64xf32>
    %339 = arith.cmpf olt, %309, %338 : vector<48x64xf32>
    %cst_114 = arith.constant 0.000000e+00 : f32
    %340 = vector.broadcast %cst_114 : f32 to vector<48x64xf32>
    %341 = arith.subf %340, %337 : vector<48x64xf32>
    %342 = arith.select %339, %341, %337 : vector<48x64xi1>, vector<48x64xf32>
    %cst_115 = arith.constant 1.000000e+00 : f32
    %343 = vector.broadcast %cst_115 : f32 to vector<48x64xf32>
    %344 = arith.addf %343, %342 : vector<48x64xf32>
    %345 = arith.mulf %307, %344 : vector<48x64xf32>
    %cst_116 = arith.constant dense<0.000000e+00> : vector<48x32xf32>
    %346 = tpu.matmul %345, %201, %cst_116 {dimension_numbers = #tpu.dot_dimension_numbers<[1], [0], [0], [1], [0, 0, 1, 1], [], []>} : vector<48x64xf32>, vector<64x32xf32>, vector<48x32xf32> -> vector<48x32xf32>
    %347 = vector.broadcast %202 : vector<1x32xf32> to vector<48x32xf32>
    %348 = arith.addf %346, %347 : vector<48x32xf32>
    %349 = arith.addf %302, %348 : vector<48x32xf32>
    %cst_117 = arith.constant dense<0.000000e+00> : vector<48xf32>
    %350 = vector.multi_reduction <add>, %349, %cst_117 [1] : vector<48x32xf32> to vector<48xf32>
    %351 = vector.shape_cast %350 : vector<48xf32> to vector<48x1xf32>
    %cst_118 = arith.constant 3.200000e+01 : f32
    %352 = vector.broadcast %cst_118 : f32 to vector<48x1xf32>
    %353 = arith.divf %351, %352 : vector<48x1xf32>
    %354 = vector.broadcast %353 : vector<48x1xf32> to vector<48x32xf32>
    %355 = arith.subf %349, %354 : vector<48x32xf32>
    %356 = arith.mulf %355, %355 : vector<48x32xf32>
    %cst_119 = arith.constant dense<0.000000e+00> : vector<48xf32>
    %357 = vector.multi_reduction <add>, %356, %cst_119 [1] : vector<48x32xf32> to vector<48xf32>
    %358 = vector.shape_cast %357 : vector<48xf32> to vector<48x1xf32>
    %cst_120 = arith.constant 3.200000e+01 : f32
    %359 = vector.broadcast %cst_120 : f32 to vector<48x1xf32>
    %360 = arith.divf %358, %359 : vector<48x1xf32>
    %cst_121 = arith.constant 9.99999974E-6 : f32
    %361 = vector.broadcast %cst_121 : f32 to vector<48x1xf32>
    %362 = arith.addf %360, %361 : vector<48x1xf32>
    %363 = math.rsqrt %362 : vector<48x1xf32>
    %364 = vector.broadcast %363 : vector<48x1xf32> to vector<48x32xf32>
    %365 = arith.mulf %355, %364 : vector<48x32xf32>
    %366 = vector.broadcast %203 : vector<1x32xf32> to vector<48x32xf32>
    %367 = arith.mulf %365, %366 : vector<48x32xf32>
    %368 = vector.broadcast %204 : vector<1x32xf32> to vector<48x32xf32>
    %369 = arith.addf %367, %368 : vector<48x32xf32>
    %370 = vector.extract_strided_slice %369 {offsets = [0, 0], sizes = [2, 32], strides = [1, 1]} : vector<48x32xf32> to vector<2x32xf32>
    %c80 = arith.constant 80 : index
    %c0_122 = arith.constant 0 : index
    %371 = vector.load %arg1[%c80, %c0_122] : memref<568x128xf32, #tpu.memory_space<vmem>>, vector<32x2xf32>
    %cst_123 = arith.constant dense<0.000000e+00> : vector<2x2xf32>
    %372 = tpu.matmul %370, %371, %cst_123 {dimension_numbers = #tpu.dot_dimension_numbers<[1], [0], [0], [1], [0, 0, 1, 1], [], []>} : vector<2x32xf32>, vector<32x2xf32>, vector<2x2xf32> -> vector<2x2xf32>
    %c112 = arith.constant 112 : index
    %c0_124 = arith.constant 0 : index
    %373 = vector.load %arg1[%c112, %c0_124] : memref<568x128xf32, #tpu.memory_space<vmem>>, vector<1x2xf32>
    %374 = vector.broadcast %373 : vector<1x2xf32> to vector<2x2xf32>
    %375 = arith.addf %372, %374 : vector<2x2xf32>
    %c0_125 = arith.constant 0 : index
    %c0_126 = arith.constant 0 : index
    %376 = vector.load %arg2[%c0_125, %c0_126] : memref<2x2xf32, #tpu.memory_space<vmem>>, vector<2x2xf32>
    tpu.vector_store %arg2[%c0_125, %c0_126], %375 {strides = array<i32>} : memref<2x2xf32, #tpu.memory_space<vmem>>, vector<2x2xf32>,
    return
  }
}

</mosaic_0001>

<bundles_post_ra>
// kernel: small_umt_forward.1
= control target key start
LH: loop header
LB: loop body
LE: loop exit
PB: predicated region body
PF: predicated region fallthrough
CT: control target
= control target key end

     0   :  { %7 = vsyncpa [#allocation3], 0  ;;  %s7723_s0 = inlined_call_operand.vmem [shape: f32[48,32], index: 0, kind: input, shape index: {}]   ;;  %s7724_s1 = inlined_call_operand.hbm [shape: f32[568,128], index: 1, kind: input, shape index: {}]   ;;  %s7725_s2 = inlined_call_operand.hbm [shape: f32[2,2], index: 2, kind: output, shape index: {}]  }
   0x1   :  { %8 = vsyncpa [#allocation4], 0  ;;  %s6240_s9 = smov [#allocation2]  }
   0x2   :  { %s16_s10 = sshll.u32 %s6240_s9, 4  ;;  %s17_s10 = int_to_ptr.vmem [resolvable:$true] %s16_s10 }
   0x3   :  { %s6204_s11 = scalar_lea.vmem %s17_s10, 9088  ;;  %p6209_p1 = scmp.lt.s32.totalorder %s17_s10, %s17_s10 }
   0x4   :  { %p6205_p0 = scmp.ne.s32.totalorder %s17_s10, %s6204_s11  ;;  %p6210_p2 = scmp.lt.s32.totalorder %s6204_s11, %s6204_s11 }
   0x6   :  { %p6211_p3 = por %p6210_p2, %p6209_p1 }
   0x8   :  { %p6212_p4 = pnand %p6211_p3, %p6205_p0 }
   0xa   :  { %6215 = shalt.err (!%p6212_p4)
}
   0xb   :  { %s6241_s12 = smov 128   ;;  %s6242_s13 = smov 8  }
   0xc   :  { %22 = dma.hbm_to_vmem [thread:$0]  %s7724_s1, 9088, %s17_s10, [#allocation3], %s6241_s12, %s6241_s12, %s6242_s13  }
   0xd   :  { %6236 = dma.done.wait [#allocation3], 9088  }
   0xe   :  { %6237 = vsyncadd [#allocation3], 4294958208  ;;  %v41_v0 = vld [vmem:[#allocation2 + $0x18] sm:$0xff]  ;;  %v40_v1 = vld [vmem:[#allocation2 + $0x10] sm:$0xff]  ;;  %vm48_vm0 = vcmask 261120   ;;  %vm364_vm1 = vcmask 64512  }
   0xf   :  { %5370 = vmatprep.subr.mxu0 %v41_v0  ;;  %v26_v2 = vld [vmem:[%s7723_s0] sm:$0xff]  ;;  %v27_v3 = vld [vmem:[%s7723_s0 + $0x8] sm:$0xff]  ;;  %v28_v5 = vld [vmem:[%s7723_s0 + $0x10] sm:$0xff]  ;;  %s6244_s27 = smov 64   ;;  %s6245_s28 = smov 88   ;;  %vm490_vm5 = vcmask 392192  }
  0x10   :  { %5371 = vmatpush3.msra.mxu0 %v41_v0  ;;  %v39_v4 = vld [vmem:[#allocation2 + $0x8] sm:$0xff]  ;;  %5906 = vtanh.f32 %v26_v2  ;;  %v29_v6 = vld [vmem:[%s7723_s0 + $0x18] sm:$0xff]  ;;  %v30_v7 = vld [vmem:[%s7723_s0 + $0x20] sm:$0xff]  ;;  %s6247_s29 = smov 120   ;;  %s6248_s30 = smov 56   ;;  %vm1786_vm9 = vcmask 130048  }
  0x11   :  { %5372 = vmatprep.subr.mxu0 %v40_v1  ;;  %5908 = vtanh.f32 %v27_v3  ;;  %v198_v8 = vld [vmem:[#allocation2 + $0x90] sm:$0xff]  ;;  %v38_v9 = vld [vmem:[#allocation2] sm:$0xff]  ;;  %v31_v10 = vld [vmem:[%s7723_s0 + $0x28] sm:$0xff]  ;;  %s6243_s0 = smov 96   ;;  %s6249_s3 = smov 80   ;;  %vm1793_vm10 = vcmask 195584  }
  0x12   :  { %5373 = vmatpush3.msra.mxu0 %v40_v1  ;;  %5910 = vtanh.f32 %v28_v5  ;;  %5387 = vmatprep.subr.mxu1 %v198_v8  ;;  %v197_v17 = vld [vmem:[#allocation2 + $0x88] sm:$0xff]  ;;  %v196_v18 = vld [vmem:[#allocation2 + $0x80] sm:$0xff]  ;;  %v195_v19 = vld [vmem:[#allocation2 + $0x78] sm:$0xff]  ;;  %s6250_s4 = smov 112   ;;  %s6251_s5 = smov 48   ;;  %vm2305_vm13 = vcmask 523264  }
  0x13   :  { %5374 = vmatprep.subr.mxu0 %v39_v4  ;;  %5912 = vtanh.f32 %v29_v6  ;;  %5388 = vmatpush3.msra.mxu1 %v198_v8  ;;  %v42_v21 = vld [vmem:[#allocation2 + $0x20] sm:$0xff]  ;;  %v43_v22 = vld [vmem:[#allocation2 + $0x28] sm:$0xff]  ;;  %v44_v27 = vld [vmem:[#allocation2 + $0x30] sm:$0xff]  ;;  %v162_v6 = vlaneseq  ;;  %s6252_s6 = smov 72   ;;  %s6253_s7 = smov 104  }
  0x14   :  { %5375 = vmatpush3.msra.mxu0 %v39_v4  ;;  %5914 = vtanh.f32 %v30_v7  ;;  %5389 = vmatprep.subr.mxu1 %v197_v17  ;;  %v45_v28 = vld [vmem:[#allocation2 + $0x38] sm:$0xff]  ;;  %v46_v33 = vld [vmem:[#allocation2 + $0x40] sm:$0xff]  ;;  %v47_v34 = vld [vmem:[#allocation2 + $0x48] sm:$0xff]  ;;  %s6254_s8 = smov 40   ;;  %s6255_s9 = smov 16  }
  0x15   :  { %5376 = vmatprep.subr.mxu0 %v38_v9  ;;  %5916 = vtanh.f32 %v31_v10  ;;  %5390 = vmatpush3.msra.mxu1 %v197_v17  ;;  %v4865_v39 = vld [vmem:[#allocation2 + $0x98] ss:$0 sm:$0xff]  ;;  %v163_v7 = vshrl.u32 %v162_v6, 7  ;;  %s6256_s10 = smov 24   ;;  %s6259_s11 = smov [#allocation5]  }
  0x16   :  { %5377 = vmatpush3.msra.mxu0 %v38_v9  ;;  %5391 = vmatprep.subr.mxu1 %v196_v18  ;;  %v170_v9 = vand.u32 127, %v162_v6  ;;  %s4850_s12 = sshll.u32 %s6259_s11, 4  ;;  %s4851_s12 = int_to_ptr.vmem [resolvable:$true] %s4850_s12 }
  0x17   :  { %5392 = vmatpush3.msra.mxu1 %v196_v18  ;;  %v164_v8 = vadd.s32 8, %v163_v7  ;;  %p6221_p6 = scmp.lt.s32.totalorder %s4851_s12, %s4851_s12 }
  0x18   :  { %5393 = vmatprep.subr.mxu1 %v195_v19 }
  0x19   :  { %5394 = vmatpush3.msra.mxu1 %v195_v19  ;;  %v172_v10 = vxor.u32 %v170_v9, %v164_v8  ;;  %v168_v19 = vadd.s32 40, %v163_v7 }
  0x1d   :  { %v5907_v11 = vpop.eup %5906 }
  0x1e   :  { %v5909_v12 = vpop.eup %5908  ;;  %5378 = vmatprep.mubr.msk.f32.mxu0 %vm48_vm0, %v5907_v11  ;;  %v166_v11 = vadd.s32 24, %v163_v7 }
  0x1f   :  { %v5911_v13 = vpop.eup %5910  ;;  %5379 = vmatmul.mubr.msk.f32.vlgmr.msra.gmra.mxu0 %vm48_vm0, %v5909_v12  ;;  %v171_v12 = vxor.u32 %v170_v9, %v163_v7 }
  0x20   :  { %v5913_v14 = vpop.eup %5912  ;;  %5381 = vmatprep.mubr.msk.f32.mxu0 %vm48_vm0, %v5911_v13  ;;  %v165_v13 = vadd.s32 16, %v163_v7 }
  0x21   :  { %v5915_v15 = vpop.eup %5914 }
  0x22   :  { %v5917_v16 = vpop.eup %5916  ;;  %v173_v17 = vxor.u32 %v170_v9, %v165_v13 }
  0x23   :  { %5382 = vmatmul.mubr.msk.f32.gmra.mxu0 %vm48_vm0, %v5913_v14  ;;  %v178_v14 = vand.u32 1, %v172_v10 }
  0x24   :  { %5384 = vmatprep.mubr.msk.f32.mxu0 %vm48_vm0, %v5915_v15  ;;  %v174_v15 = vxor.u32 %v170_v9, %v166_v11 }
  0x25   :  { %vm184_vm2 = vcmp.eq.s32.totalorder %v178_v14, 0 }
  0x26   :  { %v180_v18 = vand.u32 1, %v174_v15 }
  0x27   :  { %5385 = vmatmul.mubr.msk.f32.gmra.mxu0 %vm48_vm0, %v5917_v16  ;;  %v177_v16 = vand.u32 1, %v171_v12 }
  0x28   :  { %vm186_vm4 = vcmp.eq.s32.totalorder %v180_v18, 0 }
  0x29   :  { %vm183_vm3 = vcmp.eq.s32.totalorder %v177_v16, 0 }
  0xdf   :  { %v5380_v20 = vpop.f32.mrf.mxu0 }
  0xe0   :  { %v6305_v25 = vadd.f32 %v5380_v20, %v43_v22  ;;  %v6246_v20 = vmov -1e+30   ;;  %v179_v22 = vand.u32 1, %v173_v17 }
  0xe1   :  { %v133_v23 = vpop.f32.mrf.mxu0 }
  0xe2   :  { %v6303_v24 = vadd.f32 %v133_v23, %v42_v21  ;;  %v6413_v21 = vsel %vm184_vm2, 0.0, %v6246_v20  ;;  %v176_v23 = vxor.u32 %v170_v9, %v168_v19  ;;  %vm185_vm6 = vcmp.eq.s32.totalorder %v179_v22, 0 }
  0xe3   :  { %v5383_v26 = vpop.f32.mrf.mxu0 }
  0xe4   :  { %5395 = vmatprep.mubr.msk.f32.mxu1 %vm48_vm0, %v6303_v24  ;;  %v6313_v31 = vadd.f32 %v5383_v26, %v45_v28  ;;  %v167_v26 = vadd.s32 32, %v163_v7  ;;  %v6415_v28 = vsel %vm183_vm3, 0.0, %v6246_v20 }
  0xe5   :  { %v143_v29 = vpop.f32.mrf.mxu0  ;;  %5396 = vmatmul.mubr.msk.f32.vlgmr.msra.gmra.mxu1 %vm48_vm0, %v6305_v25 }
  0xe6   :  { %v6311_v30 = vadd.f32 %v143_v29, %v44_v27 }
  0xe7   :  { %v5386_v32 = vpop.f32.mrf.mxu0 }
  0xe8   :  { %5398 = vmatprep.mubr.msk.f32.mxu1 %vm48_vm0, %v6311_v30  ;;  %v6321_v37 = vadd.f32 %v5386_v32, %v47_v34 }
  0xe9   :  { %v153_v35 = vpop.f32.mrf.mxu0  ;;  %5399 = vmatmul.mubr.msk.f32.gmra.mxu1 %vm48_vm0, %v6313_v31 }
  0xea   :  { %v6319_v36 = vadd.f32 %v153_v35, %v46_v33  ;;  %v6418_v33 = vsel %vm186_vm4, 0.0, %v6246_v20 }
  0xec   :  { %5401 = vmatprep.mubr.msk.f32.mxu1 %vm48_vm0, %v6319_v36 }
  0xed   :  { %5402 = vmatmul.mubr.msk.f32.gmra.mxu1 %vm48_vm0, %v6321_v37 }
 0x1a5   :  { %v5397_v38 = vpop.f32.mrf.mxu1 }
 0x1a6   :  { %v6352_v51 = vadd.f32 %v5397_v38, %v4865_v39  ;;  %v182_v38 = vand.u32 1, %v176_v23 }
 0x1a7   :  { %v311_v40 = vpop.f32.mrf.mxu1 }
 0x1a8   :  { %v6327_v41 = vadd.f32 %v4865_v39, %v311_v40  ;;  %v6387_v0 = vmul.f32 0.35355338, %v6352_v51  ;;  %vm188_vm7 = vcmp.eq.s32.totalorder %v182_v38, 0 }
 0x1a9   :  { %v5400_v42 = vpop.f32.mrf.mxu1 }
 0x1aa   :  { %v6329_v43 = vadd.f32 %v5400_v42, %v4865_v39  ;;  %v6332_v44 = vmul.f32 0.35355338, %v6327_v41 }
 0x1ab   :  { %v321_v45 = vpop.f32.mrf.mxu1 }
 0x1ac   :  { %358 = vrot.lane.b32.xlu1 %v6329_v43, %s6243_s0  ;;  %5416 = vmatprep.mubr.msk.f32.mxu0 %vm364_vm1, %v6332_v44  ;;  %v6338_v47 = vadd.f32 %v4865_v39, %v321_v45  ;;  %v6399_v3 = vmul.f32 0.35355338, %v6329_v43 }
 0x1ad   :  { %v5403_v46 = vpop.f32.mrf.mxu1 }
 0x1ae   :  { %v6340_v48 = vadd.f32 %v5403_v46, %v4865_v39  ;;  %v6390_v2 = vmul.f32 0.35355338, %v6338_v47  ;;  %v6424_v46 = vsel %vm185_vm6, 0.0, %v6246_v20 }
 0x1af   :  { %v331_v49 = vpop.f32.mrf.mxu1 }
 0x1b0   :  { %362 = vrot.lane.b32.xlu0 %v6340_v48, %s6243_s0  ;;  %356 = vrot.lane.b32.xlu1 %v6338_v47, %s6243_s0  ;;  %v6346_v50 = vadd.f32 %v4865_v39, %v331_v49  ;;  %v6409_v5 = vmul.f32 0.35355338, %v6340_v48  ;;  %v175_v39 = vxor.u32 %v170_v9, %v167_v26 }
 0x1b2   :  { %v6402_v4 = vmul.f32 0.35355338, %v6346_v50 }
 0x1b4   :  { %360 = vrot.lane.b32.xlu0 %v6346_v50, %s6243_s0  ;;  %352 = vrot.lane.b32.xlu1 %v6327_v41, %s6243_s0 }
 0x1b8   :  { %354 = vrot.lane.b32.xlu0 %v6352_v51, %s6243_s0  ;;  %561 = vrot.lane.b32.xlu1 %v6340_v48, %s6244_s27 }
 0x1bc   :  { %710 = vrot.lane.b32.xlu0 %v6340_v48, %s6245_s28  ;;  %557 = vrot.lane.b32.xlu1 %v6329_v43, %s6244_s27 }
 0x1c0   :  { %559 = vrot.lane.b32.xlu0 %v6346_v50, %s6244_s27  ;;  %555 = vrot.lane.b32.xlu1 %v6338_v47, %s6244_s27 }
 0x1c4   :  { %706 = vrot.lane.b32.xlu0 %v6329_v43, %s6245_s28  ;;  %553 = vrot.lane.b32.xlu1 %v6352_v51, %s6244_s27 }
 0x1c8   :  { %551 = vrot.lane.b32.xlu1 %v6327_v41, %s6244_s27 }
 0x21e   :  { %v359_v52 = vpop.permute.xlu1 %358 }
 0x222   :  { %v363_v53 = vpop.permute.xlu0 %362  ;;  %v357_v54 = vpop.permute.xlu1 %356 }
 0x223   :  { %5404 = vmatprep.subr.msk.mxu0 %vm364_vm1, %v363_v53 }
 0x224   :  { %5405 = vmatpush3.xpose.msk.msra.mxu0 %vm364_vm1, %v363_v53 }
 0x226   :  { %v361_v55 = vpop.permute.xlu0 %360  ;;  %v353_v56 = vpop.permute.xlu1 %352 }
 0x227   :  { %5406 = vmatprep.subr.msk.mxu0 %vm364_vm1, %v361_v55 }
 0x228   :  { %5407 = vmatpush3.xpose.msk.msra.mxu0 %vm364_vm1, %v361_v55  ;;  %v6428_v55 = vsel %vm188_vm7, 0.0, %v6246_v20  ;;  %vm6258_vm7 = vmmov 0  }
 0x229   :  { %5408 = vmatprep.subr.msk.mxu0 %vm364_vm1, %v359_v52 }
 0x22a   :  { %v355_v57 = vpop.permute.xlu0 %354  ;;  %v562_v58 = vpop.permute.xlu1 %561 }
 0x22b   :  { %5425 = vmatprep.subr.mxu1 %v562_v58 }
 0x22c   :  { %5409 = vmatpush3.xpose.msk.msra.mxu0 %vm364_vm1, %v359_v52  ;;  %5426 = vmatpush3.msra.mxu1 %v562_v58  ;;  %v181_v52 = vand.u32 1, %v175_v39 }
 0x22d   :  { %5410 = vmatprep.subr.msk.mxu0 %vm364_vm1, %v357_v54 }
 0x22e   :  { %v6379_v59 = vpop.permute.xlu0 %710  ;;  %v558_v60 = vpop.permute.xlu1 %557  ;;  %vm187_vm8 = vcmp.eq.s32.totalorder %v181_v52, 0 }
 0x230   :  { %5411 = vmatpush3.xpose.msk.msra.mxu0 %vm364_vm1, %v357_v54 }
 0x231   :  { %5412 = vmatprep.subr.msk.mxu0 %vm364_vm1, %v355_v57 }
 0x232   :  { %v560_v61 = vpop.permute.xlu0 %559  ;;  %v556_v62 = vpop.permute.xlu1 %555 }
 0x233   :  { %5427 = vmatprep.subr.mxu1 %v560_v61 }
 0x234   :  { %5413 = vmatpush3.xpose.msk.msra.mxu0 %vm364_vm1, %v355_v57  ;;  %5428 = vmatpush3.msra.mxu1 %v560_v61 }
 0x235   :  { %5414 = vmatprep.subr.msk.mxu0 %vm364_vm1, %v353_v56  ;;  %5429 = vmatprep.subr.mxu1 %v558_v60 }
 0x236   :  { %5430 = vmatpush3.msra.mxu1 %v558_v60  ;;  %v554_v63 = vpop.permute.xlu1 %553  ;;  %v6432_v60 = vsel %vm187_vm8, 0.0, %v6246_v20  ;;  %v707_v6 = vpop.permute.xlu0 %706 }
 0x237   :  { %5431 = vmatprep.subr.mxu1 %v556_v62 }
 0x238   :  { %5415 = vmatpush3.xpose.msk.msra.mxu0 %vm364_vm1, %v353_v56  ;;  %5432 = vmatpush3.msra.mxu1 %v556_v62 }
 0x239   :  { %5433 = vmatprep.subr.mxu1 %v554_v63 }
 0x23a   :  { %5434 = vmatpush3.msra.mxu1 %v554_v63  ;;  %v552_v1 = vpop.permute.xlu1 %551 }
 0x23b   :  { %5417 = vmatmul.mubr.msk.f32.vlgmr.msra.gmra.mxu0 %vm364_vm1, %v6387_v0  ;;  %5435 = vmatprep.subr.mxu1 %v552_v1 }
 0x23c   :  { %5419 = vmatprep.mubr.msk.f32.mxu0 %vm364_vm1, %v6390_v2  ;;  %5436 = vmatpush3.msra.mxu1 %v552_v1 }
 0x23d   :  { %5446 = vmatprep.subr.msk.mxu1 %vm364_vm1, %v6379_v59 }
 0x23f   :  { %5420 = vmatmul.mubr.msk.f32.gmra.mxu0 %vm364_vm1, %v6399_v3 }
 0x240   :  { %5422 = vmatprep.mubr.msk.f32.mxu0 %vm364_vm1, %v6402_v4 }
 0x243   :  { %5423 = vmatmul.mubr.msk.f32.gmra.mxu0 %vm364_vm1, %v6409_v5 }
 0x2fb   :  { %v5418_v27 = vpop.f32.mrf.mxu0 }
 0x2fc   :  { %v467_v29 = vadd.f32 %v5418_v27, %v6413_v21 }
 0x2fd   :  { %v461_v32 = vpop.f32.mrf.mxu0 }
 0x2fe   :  { %v462_v34 = vadd.f32 %v461_v32, %v6415_v28  ;;  %v494_v35 = vsel %vm490_vm5, %v467_v29, -inf }
 0x2ff   :  { %495 = vmax.xlane.f32.xlu1 %v494_v35  ;;  %v5421_v40 = vpop.f32.mrf.mxu0 }
 0x300   :  { %v477_v42 = vadd.f32 %v5421_v40, %v6418_v33  ;;  %v491_v45 = vsel %vm490_vm5, %v462_v34, -inf }
 0x301   :  { %v471_v49 = vpop.f32.mrf.mxu0  ;;  %492 = vmax.xlane.f32.xlu0 %v491_v45 }
 0x302   :  { %v472_v53 = vadd.f32 %v471_v49, %v6424_v46  ;;  %v500_v54 = vsel %vm490_vm5, %v477_v42, -inf }
 0x303   :  { %v5424_v56 = vpop.f32.mrf.mxu0 }
 0x304   :  { %v487_v57 = vadd.f32 %v5424_v56, %v6428_v55  ;;  %v497_v58 = vsel %vm490_vm5, %v472_v53, -inf }
 0x305   :  { %501 = vmax.xlane.f32.xlu0 %v500_v54  ;;  %v481_v61 = vpop.f32.mrf.mxu0 }
 0x306   :  { %v482_v62 = vadd.f32 %v481_v61, %v6432_v60  ;;  %v506_v63 = vsel %vm490_vm5, %v487_v57, -inf }
 0x308   :  { %v503_v1 = vsel %vm490_vm5, %v482_v62, -inf }
 0x309   :  { %498 = vmax.xlane.f32.xlu0 %v497_v58 }
 0x30d   :  { %507 = vmax.xlane.f32.xlu0 %v506_v63 }
 0x310   :  { %708 = vrot.lane.b32.xlu1 %v6346_v50, %s6245_s28 }
 0x311   :  { %504 = vmax.xlane.f32.xlu0 %v503_v1 }
 0x314   :  { %704 = vrot.lane.b32.xlu1 %v6338_v47, %s6245_s28 }
 0x318   :  { %700 = vrot.lane.b32.xlu1 %v6327_v41, %s6245_s28 }
 0x31c   :  { %690 = vrot.lane.b32.xlu1 %v6387_v0, %s6247_s29 }
 0x320   :  { %694 = vrot.lane.b32.xlu1 %v6399_v3, %s6247_s29 }
 0x324   :  { %698 = vrot.lane.b32.xlu1 %v6409_v5, %s6247_s29 }
 0x327   :  { %702 = vrot.lane.b32.xlu0 %v6352_v51, %s6245_s28 }
 0x328   :  { %901 = vrot.lane.b32.xlu1 %v6340_v48, %s6248_s30 }
 0x32b   :  { %688 = vrot.lane.b32.xlu0 %v6332_v44, %s6247_s29 }
 0x32c   :  { %897 = vrot.lane.b32.xlu1 %v6329_v43, %s6248_s30 }
 0x32f   :  { %692 = vrot.lane.b32.xlu0 %v6390_v2, %s6247_s29 }
 0x330   :  { %895 = vrot.lane.b32.xlu1 %v6338_v47, %s6248_s30 }
 0x333   :  { %696 = vrot.lane.b32.xlu0 %v6402_v4, %s6247_s29 }
 0x334   :  { %893 = vrot.lane.b32.xlu1 %v6352_v51, %s6248_s30 }
 0x337   :  { %899 = vrot.lane.b32.xlu0 %v6346_v50, %s6248_s30 }
 0x338   :  { %891 = vrot.lane.b32.xlu1 %v6327_v41, %s6248_s30 }
 0x33b   :  { %1050 = vrot.lane.b32.xlu0 %v6340_v48, %s6249_s3 }
 0x33f   :  { %1046 = vrot.lane.b32.xlu0 %v6329_v43, %s6249_s3 }
 0x388   :  { %v496_v7 = vpop.xlane.xlu1 %495 }
 0x389   :  { %v510_v8 = vsub.f32 %v467_v29, %v496_v7 }
 0x38a   :  { %v493_v9 = vpop.xlane.xlu0 %492 }
 0x38b   :  { %v509_v10 = vsub.f32 %v462_v34, %v493_v9  ;;  %v517_v11 = vmul.f32 1.442695, %v510_v8 }
 0x38c   :  { %v709_v12 = vpop.permute.xlu1 %708 }
 0x38d   :  { %v515_v13 = vmul.f32 1.442695, %v509_v10 }
 0x38e   :  { %v502_v14 = vpop.xlane.xlu0 %501 }
 0x38f   :  { %5918 = vpow2.f32 %v515_v13  ;;  %v512_v15 = vsub.f32 %v477_v42, %v502_v14 }
 0x390   :  { %5920 = vpow2.f32 %v517_v11  ;;  %v705_v16 = vpop.permute.xlu1 %704 }
 0x391   :  { %v521_v19 = vmul.f32 1.442695, %v512_v15 }
 0x392   :  { %v499_v17 = vpop.xlane.xlu0 %498 }
 0x393   :  { %v511_v18 = vsub.f32 %v472_v53, %v499_v17 }
 0x394   :  { %v701_v20 = vpop.permute.xlu1 %700 }
 0x395   :  { %v519_v22 = vmul.f32 1.442695, %v511_v18 }
 0x396   :  { %v508_v23 = vpop.xlane.xlu0 %507 }
 0x397   :  { %5922 = vpow2.f32 %v519_v22  ;;  %v514_v26 = vsub.f32 %v487_v57, %v508_v23 }
 0x398   :  { %5924 = vpow2.f32 %v521_v19  ;;  %v691_v27 = vpop.permute.xlu1 %690 }
 0x399   :  { %v525_v35 = vmul.f32 1.442695, %v514_v26 }
 0x39a   :  { %v505_v29 = vpop.xlane.xlu0 %504 }
 0x39b   :  { %v513_v32 = vsub.f32 %v482_v62, %v505_v29 }
 0x39c   :  { %v6473_v34 = vpop.eup %5918  ;;  %v695_v38 = vpop.permute.xlu1 %694 }
 0x39d   :  { %v6475_v39 = vpop.eup %5920  ;;  %v523_v40 = vmul.f32 1.442695, %v513_v32  ;;  %5437 = vmatprep.mubr.msk.f32.mxu1 %vm490_vm5, %v6473_v34 }
 0x39e   :  { %5438 = vmatmul.mubr.msk.f32.vlgmr.msra.gmra.mxu1 %vm490_vm5, %v6475_v39  ;;  %v703_v42 = vpop.permute.xlu0 %702 }
 0x39f   :  { %5926 = vpow2.f32 %v523_v40  ;;  %5447 = vmatpush3.xpose.msk.msra.mxu1 %vm364_vm1, %v6379_v59 }
 0x3a0   :  { %5928 = vpow2.f32 %v525_v35  ;;  %5448 = vmatprep.subr.msk.mxu1 %vm364_vm1, %v709_v12  ;;  %v699_v45 = vpop.permute.xlu1 %698 }
 0x3a2   :  { %v689_v49 = vpop.permute.xlu0 %688 }
 0x3a3   :  { %5449 = vmatpush3.xpose.msk.msra.mxu1 %vm364_vm1, %v709_v12 }
 0x3a4   :  { %v6485_v52 = vpop.eup %5922  ;;  %5450 = vmatprep.subr.msk.mxu1 %vm364_vm1, %v707_v6  ;;  %v902_v53 = vpop.permute.xlu1 %901 }
 0x3a5   :  { %v6488_v54 = vpop.eup %5924  ;;  %5440 = vmatprep.mubr.msk.f32.mxu1 %vm490_vm5, %v6485_v52  ;;  %5467 = vmatprep.subr.mxu0 %v902_v53 }
 0x3a6   :  { %5441 = vmatmul.mubr.msk.f32.gmra.mxu1 %vm490_vm5, %v6488_v54  ;;  %5468 = vmatpush3.msra.mxu0 %v902_v53  ;;  %v693_v59 = vpop.permute.xlu0 %692 }
 0x3a7   :  { %5451 = vmatpush3.xpose.msk.msra.mxu1 %vm364_vm1, %v707_v6 }
 0x3a8   :  { %5452 = vmatprep.subr.msk.mxu1 %vm364_vm1, %v705_v16  ;;  %v898_v56 = vpop.permute.xlu1 %897 }
 0x3aa   :  { %v697_v57 = vpop.permute.xlu0 %696 }
 0x3ab   :  { %5453 = vmatpush3.xpose.msk.msra.mxu1 %vm364_vm1, %v705_v16 }
 0x3ac   :  { %v6497_v58 = vpop.eup %5926  ;;  %5454 = vmatprep.subr.msk.mxu1 %vm364_vm1, %v703_v42  ;;  %v896_v61 = vpop.permute.xlu1 %895 }
 0x3ad   :  { %v6500_v62 = vpop.eup %5928  ;;  %5443 = vmatprep.mubr.msk.f32.mxu1 %vm490_vm5, %v6497_v58 }
 0x3ae   :  { %5444 = vmatmul.mubr.msk.f32.gmra.mxu1 %vm490_vm5, %v6500_v62  ;;  %v900_v63 = vpop.permute.xlu0 %899 }
 0x3af   :  { %5455 = vmatpush3.xpose.msk.msra.mxu1 %vm364_vm1, %v703_v42  ;;  %5458 = vmatprep.mubr.msk.f32.mxu1 %vm364_vm1, %v689_v49 }
 0x3b0   :  { %5456 = vmatprep.subr.msk.mxu1 %vm364_vm1, %v701_v20  ;;  %5469 = vmatprep.subr.mxu0 %v900_v63  ;;  %v894_v1 = vpop.permute.xlu1 %893 }
 0x3b1   :  { %5470 = vmatpush3.msra.mxu0 %v900_v63 }
 0x3b2   :  { %5471 = vmatprep.subr.mxu0 %v898_v56  ;;  %v6512_v7 = vpop.permute.xlu0 %1050 }
 0x3b3   :  { %5457 = vmatpush3.xpose.msk.msra.mxu1 %vm364_vm1, %v701_v20  ;;  %5472 = vmatpush3.msra.mxu0 %v898_v56 }
 0x3b4   :  { %5473 = vmatprep.subr.mxu0 %v896_v61  ;;  %v892_v6 = vpop.permute.xlu1 %891 }
 0x3b5   :  { %5474 = vmatpush3.msra.mxu0 %v896_v61 }
 0x3b6   :  { %5459 = vmatmul.mubr.msk.f32.vlgmr.msra.gmra.mxu1 %vm364_vm1, %v691_v27  ;;  %5475 = vmatprep.subr.mxu0 %v894_v1  ;;  %v1047_v49 = vpop.permute.xlu0 %1046 }
 0x3b7   :  { %5461 = vmatprep.mubr.msk.f32.mxu1 %vm364_vm1, %v693_v59  ;;  %5476 = vmatpush3.msra.mxu0 %v894_v1 }
 0x3b8   :  { %5477 = vmatprep.subr.mxu0 %v892_v6 }
 0x3b9   :  { %5478 = vmatpush3.msra.mxu0 %v892_v6 }
 0x3ba   :  { %5462 = vmatmul.mubr.msk.f32.gmra.mxu1 %vm364_vm1, %v695_v38  ;;  %5488 = vmatprep.subr.msk.mxu0 %vm364_vm1, %v6512_v7 }
 0x3bb   :  { %5464 = vmatprep.mubr.msk.f32.mxu1 %vm364_vm1, %v697_v57 }
 0x3be   :  { %5465 = vmatmul.mubr.msk.f32.gmra.mxu1 %vm364_vm1, %v699_v45 }
 0x45e   :  { %v6519_v8 = vpop.f32.mrf.mxu1 }
 0x460   :  { %v6521_v9 = vpop.f32.mrf.mxu1 }
 0x466   :  { %v6523_v10 = vpop.f32.mrf.mxu1 }
 0x468   :  { %v6525_v11 = vpop.f32.mrf.mxu1 }
 0x46e   :  { %v6527_v12 = vpop.f32.mrf.mxu1 }
 0x470   :  { %v6529_v13 = vpop.f32.mrf.mxu1 }
 0x476   :  { %v5460_v14 = vpop.f32.mrf.mxu1 }
 0x477   :  { %v808_v15 = vadd.f32 %v5460_v14, %v6413_v21 }
 0x478   :  { %v802_v16 = vpop.f32.mrf.mxu1 }
 0x479   :  { %v803_v17 = vadd.f32 %v802_v16, %v6415_v28  ;;  %v834_v18 = vsel %vm490_vm5, %v808_v15, -inf }
 0x47a   :  { %835 = vmax.xlane.f32.xlu1 %v834_v18  ;;  %v5463_v19 = vpop.f32.mrf.mxu1 }
 0x47b   :  { %v818_v20 = vadd.f32 %v5463_v19, %v6418_v33  ;;  %v831_v22 = vsel %vm490_vm5, %v803_v17, -inf }
 0x47c   :  { %832 = vmax.xlane.f32.xlu0 %v831_v22  ;;  %v812_v23 = vpop.f32.mrf.mxu1 }
 0x47d   :  { %v813_v26 = vadd.f32 %v812_v23, %v6424_v46  ;;  %v840_v27 = vsel %vm490_vm5, %v818_v20, -inf }
 0x47e   :  { %v5466_v29 = vpop.f32.mrf.mxu1 }
 0x47f   :  { %v828_v32 = vadd.f32 %v5466_v29, %v6428_v55  ;;  %v837_v35 = vsel %vm490_vm5, %v813_v26, -inf }
 0x480   :  { %841 = vmax.xlane.f32.xlu0 %v840_v27  ;;  %v822_v38 = vpop.f32.mrf.mxu1 }
 0x481   :  { %v823_v40 = vadd.f32 %v822_v38, %v6432_v60  ;;  %v846_v42 = vsel %vm490_vm5, %v828_v32, -inf }
 0x483   :  { %v843_v45 = vsel %vm490_vm5, %v823_v40, -inf }
 0x484   :  { %838 = vmax.xlane.f32.xlu0 %v837_v35 }
 0x488   :  { %847 = vmax.xlane.f32.xlu0 %v846_v42 }
 0x48b   :  { %1048 = vrot.lane.b32.xlu1 %v6346_v50, %s6249_s3 }
 0x48c   :  { %844 = vmax.xlane.f32.xlu0 %v843_v45 }
 0x48f   :  { %1044 = vrot.lane.b32.xlu1 %v6338_v47, %s6249_s3 }
 0x493   :  { %1040 = vrot.lane.b32.xlu1 %v6327_v41, %s6249_s3 }
 0x497   :  { %1030 = vrot.lane.b32.xlu1 %v6387_v0, %s6250_s4 }
 0x49b   :  { %1034 = vrot.lane.b32.xlu1 %v6399_v3, %s6250_s4 }
 0x49f   :  { %1038 = vrot.lane.b32.xlu1 %v6409_v5, %s6250_s4 }
 0x4a2   :  { %1042 = vrot.lane.b32.xlu0 %v6352_v51, %s6249_s3 }
 0x4a3   :  { %1241 = vrot.lane.b32.xlu1 %v6340_v48, %s6251_s5 }
 0x4a6   :  { %1028 = vrot.lane.b32.xlu0 %v6332_v44, %s6250_s4 }
 0x4a7   :  { %1237 = vrot.lane.b32.xlu1 %v6329_v43, %s6251_s5 }
 0x4aa   :  { %1032 = vrot.lane.b32.xlu0 %v6390_v2, %s6250_s4 }
 0x4ab   :  { %1235 = vrot.lane.b32.xlu1 %v6338_v47, %s6251_s5 }
 0x4ae   :  { %1036 = vrot.lane.b32.xlu0 %v6402_v4, %s6250_s4 }
 0x4af   :  { %1233 = vrot.lane.b32.xlu1 %v6352_v51, %s6251_s5 }
 0x4b2   :  { %1239 = vrot.lane.b32.xlu0 %v6346_v50, %s6251_s5 }
 0x4b3   :  { %1231 = vrot.lane.b32.xlu1 %v6327_v41, %s6251_s5 }
 0x4b6   :  { %1390 = vrot.lane.b32.xlu0 %v6340_v48, %s6252_s6 }
 0x4ba   :  { %1386 = vrot.lane.b32.xlu0 %v6329_v43, %s6252_s6 }
 0x503   :  { %v836_v53 = vpop.xlane.xlu1 %835 }
 0x504   :  { %v850_v59 = vsub.f32 %v808_v15, %v836_v53 }
 0x505   :  { %v833_v56 = vpop.xlane.xlu0 %832 }
 0x506   :  { %v849_v57 = vsub.f32 %v803_v17, %v833_v56  ;;  %v857_v61 = vmul.f32 1.442695, %v850_v59 }
 0x507   :  { %v1049_v63 = vpop.permute.xlu1 %1048 }
 0x508   :  { %v855_v1 = vmul.f32 1.442695, %v849_v57 }
 0x509   :  { %v842_v6 = vpop.xlane.xlu0 %841 }
 0x50a   :  { %5930 = vpow2.f32 %v855_v1  ;;  %v852_v14 = vsub.f32 %v818_v20, %v842_v6 }
 0x50b   :  { %5932 = vpow2.f32 %v857_v61  ;;  %v1045_v16 = vpop.permute.xlu1 %1044 }
 0x50c   :  { %v861_v22 = vmul.f32 1.442695, %v852_v14 }
 0x50d   :  { %v839_v18 = vpop.xlane.xlu0 %838 }
 0x50e   :  { %v851_v19 = vsub.f32 %v813_v26, %v839_v18 }
 0x50f   :  { %v1041_v23 = vpop.permute.xlu1 %1040 }
 0x510   :  { %v859_v27 = vmul.f32 1.442695, %v851_v19 }
 0x511   :  { %v848_v29 = vpop.xlane.xlu0 %847 }
 0x512   :  { %5934 = vpow2.f32 %v859_v27  ;;  %v854_v35 = vsub.f32 %v828_v32, %v848_v29 }
 0x513   :  { %5936 = vpow2.f32 %v861_v22  ;;  %v1031_v15 = vpop.permute.xlu1 %1030 }
 0x514   :  { %v865_v45 = vmul.f32 1.442695, %v854_v35 }
 0x515   :  { %v845_v38 = vpop.xlane.xlu0 %844 }
 0x516   :  { %v853_v17 = vsub.f32 %v823_v40, %v845_v38 }
 0x517   :  { %v6579_v42 = vpop.eup %5930  ;;  %v1035_v53 = vpop.permute.xlu1 %1034 }
 0x518   :  { %v6581_v59 = vpop.eup %5932  ;;  %v863_v20 = vmul.f32 1.442695, %v853_v17  ;;  %5479 = vmatprep.mubr.msk.f32.mxu0 %vm490_vm5, %v6579_v42 }
 0x519   :  { %5480 = vmatmul.mubr.msk.f32.vlgmr.msra.gmra.mxu0 %vm490_vm5, %v6581_v59  ;;  %v1043_v26 = vpop.permute.xlu0 %1042 }
 0x51a   :  { %5938 = vpow2.f32 %v863_v20  ;;  %5489 = vmatpush3.xpose.msk.msra.mxu0 %vm364_vm1, %v6512_v7 }
 0x51b   :  { %5940 = vpow2.f32 %v865_v45  ;;  %5490 = vmatprep.subr.msk.mxu0 %vm364_vm1, %v1049_v63  ;;  %v1039_v32 = vpop.permute.xlu1 %1038 }
 0x51d   :  { %v1029_v40 = vpop.permute.xlu0 %1028 }
 0x51e   :  { %5491 = vmatpush3.xpose.msk.msra.mxu0 %vm364_vm1, %v1049_v63 }
 0x51f   :  { %v6591_v56 = vpop.eup %5934  ;;  %5492 = vmatprep.subr.msk.mxu0 %vm364_vm1, %v1047_v49  ;;  %v1242_v57 = vpop.permute.xlu1 %1241 }
 0x520   :  { %v6594_v61 = vpop.eup %5936  ;;  %5482 = vmatprep.mubr.msk.f32.mxu0 %vm490_vm5, %v6591_v56  ;;  %5509 = vmatprep.subr.mxu1 %v1242_v57 }
 0x521   :  { %5483 = vmatmul.mubr.msk.f32.gmra.mxu0 %vm490_vm5, %v6594_v61  ;;  %5510 = vmatpush3.msra.mxu1 %v1242_v57  ;;  %v1033_v7 = vpop.permute.xlu0 %1032 }
 0x522   :  { %5493 = vmatpush3.xpose.msk.msra.mxu0 %vm364_vm1, %v1047_v49 }
 0x523   :  { %5494 = vmatprep.subr.msk.mxu0 %vm364_vm1, %v1045_v16  ;;  %v1238_v63 = vpop.permute.xlu1 %1237 }
 0x525   :  { %v1037_v1 = vpop.permute.xlu0 %1036 }
 0x526   :  { %5495 = vmatpush3.xpose.msk.msra.mxu0 %vm364_vm1, %v1045_v16 }
 0x527   :  { %v6603_v6 = vpop.eup %5938  ;;  %5496 = vmatprep.subr.msk.mxu0 %vm364_vm1, %v1043_v26  ;;  %v1236_v14 = vpop.permute.xlu1 %1235 }
 0x528   :  { %v6606_v18 = vpop.eup %5940  ;;  %5485 = vmatprep.mubr.msk.f32.mxu0 %vm490_vm5, %v6603_v6 }
 0x529   :  { %5486 = vmatmul.mubr.msk.f32.gmra.mxu0 %vm490_vm5, %v6606_v18  ;;  %v1240_v49 = vpop.permute.xlu0 %1239 }
 0x52a   :  { %5497 = vmatpush3.xpose.msk.msra.mxu0 %vm364_vm1, %v1043_v26  ;;  %5500 = vmatprep.mubr.msk.f32.mxu0 %vm364_vm1, %v1029_v40 }
 0x52b   :  { %5498 = vmatprep.subr.msk.mxu0 %vm364_vm1, %v1041_v23  ;;  %5511 = vmatprep.subr.mxu1 %v1240_v49  ;;  %v1234_v16 = vpop.permute.xlu1 %1233 }
 0x52c   :  { %5512 = vmatpush3.msra.mxu1 %v1240_v49 }
 0x52d   :  { %5513 = vmatprep.subr.mxu1 %v1238_v63  ;;  %v6618_v22 = vpop.permute.xlu0 %1390 }
 0x52e   :  { %5499 = vmatpush3.xpose.msk.msra.mxu0 %vm364_vm1, %v1041_v23  ;;  %5514 = vmatpush3.msra.mxu1 %v1238_v63 }
 0x52f   :  { %5515 = vmatprep.subr.mxu1 %v1236_v14  ;;  %v1232_v19 = vpop.permute.xlu1 %1231 }
 0x530   :  { %5516 = vmatpush3.msra.mxu1 %v1236_v14 }
 0x531   :  { %5501 = vmatmul.mubr.msk.f32.vlgmr.msra.gmra.mxu0 %vm364_vm1, %v1031_v15  ;;  %5517 = vmatprep.subr.mxu1 %v1234_v16 }
 0x532   :  { %5503 = vmatprep.mubr.msk.f32.mxu0 %vm364_vm1, %v1033_v7  ;;  %5518 = vmatpush3.msra.mxu1 %v1234_v16 }
 0x533   :  { %5519 = vmatprep.subr.mxu1 %v1232_v19 }
 0x534   :  { %5520 = vmatpush3.msra.mxu1 %v1232_v19 }
 0x535   :  { %5504 = vmatmul.mubr.msk.f32.gmra.mxu0 %vm364_vm1, %v1035_v53  ;;  %5530 = vmatprep.subr.msk.mxu1 %vm364_vm1, %v6618_v22 }
 0x536   :  { %5506 = vmatprep.mubr.msk.f32.mxu0 %vm364_vm1, %v1037_v1 }
 0x539   :  { %5507 = vmatmul.mubr.msk.f32.gmra.mxu0 %vm364_vm1, %v1039_v32 }
 0x5d9   :  { %v6625_v23 = vpop.f32.mrf.mxu0 }
 0x5db   :  { %v6627_v27 = vpop.f32.mrf.mxu0 }
 0x5e1   :  { %v6629_v29 = vpop.f32.mrf.mxu0 }
 0x5e3   :  { %v6631_v35 = vpop.f32.mrf.mxu0 }
 0x5e9   :  { %v6633_v15 = vpop.f32.mrf.mxu0 }
 0x5eb   :  { %v6635_v38 = vpop.f32.mrf.mxu0 }
 0x5f1   :  { %v5502_v17 = vpop.f32.mrf.mxu0 }
 0x5f2   :  { %v1148_v45 = vadd.f32 %v5502_v17, %v6413_v21 }
 0x5f3   :  { %v1142_v53 = vpop.f32.mrf.mxu0 }
 0x5f4   :  { %v1143_v20 = vadd.f32 %v1142_v53, %v6415_v28  ;;  %v1174_v26 = vsel %vm490_vm5, %v1148_v45, -inf }
 0x5f5   :  { %1175 = vmax.xlane.f32.xlu1 %v1174_v26  ;;  %v5505_v32 = vpop.f32.mrf.mxu0 }
 0x5f6   :  { %v1158_v40 = vadd.f32 %v5505_v32, %v6418_v33  ;;  %v1171_v57 = vsel %vm490_vm5, %v1143_v20, -inf }
 0x5f7   :  { %1172 = vmax.xlane.f32.xlu0 %v1171_v57  ;;  %v1152_v7 = vpop.f32.mrf.mxu0 }
 0x5f8   :  { %v1153_v63 = vadd.f32 %v1152_v7, %v6424_v46  ;;  %v1180_v1 = vsel %vm490_vm5, %v1158_v40, -inf }
 0x5f9   :  { %v5508_v14 = vpop.f32.mrf.mxu0 }
 0x5fa   :  { %v1168_v49 = vadd.f32 %v5508_v14, %v6428_v55  ;;  %v1177_v16 = vsel %vm490_vm5, %v1153_v63, -inf }
 0x5fb   :  { %1181 = vmax.xlane.f32.xlu0 %v1180_v1  ;;  %v1162_v19 = vpop.f32.mrf.mxu0 }
 0x5fc   :  { %v1163_v17 = vadd.f32 %v1162_v19, %v6432_v60  ;;  %v1186_v53 = vsel %vm490_vm5, %v1168_v49, -inf }
 0x5fe   :  { %v1183_v26 = vsel %vm490_vm5, %v1163_v17, -inf }
 0x5ff   :  { %1178 = vmax.xlane.f32.xlu0 %v1177_v16 }
 0x603   :  { %1187 = vmax.xlane.f32.xlu0 %v1186_v53 }
 0x606   :  { %1388 = vrot.lane.b32.xlu1 %v6346_v50, %s6252_s6 }
 0x607   :  { %1184 = vmax.xlane.f32.xlu0 %v1183_v26 }
 0x60a   :  { %1384 = vrot.lane.b32.xlu1 %v6338_v47, %s6252_s6 }
 0x60e   :  { %1380 = vrot.lane.b32.xlu1 %v6327_v41, %s6252_s6 }
 0x612   :  { %1370 = vrot.lane.b32.xlu1 %v6387_v0, %s6253_s7  ;;  %v1387_v0 = vpop.permute.xlu0 %1386 }
 0x616   :  { %1374 = vrot.lane.b32.xlu1 %v6399_v3, %s6253_s7 }
 0x61a   :  { %1378 = vrot.lane.b32.xlu1 %v6409_v5, %s6253_s7 }
 0x61d   :  { %1382 = vrot.lane.b32.xlu0 %v6352_v51, %s6252_s6 }
 0x61e   :  { %1581 = vrot.lane.b32.xlu1 %v6340_v48, %s6254_s8 }
 0x621   :  { %1368 = vrot.lane.b32.xlu0 %v6332_v44, %s6253_s7 }
 0x622   :  { %1577 = vrot.lane.b32.xlu1 %v6329_v43, %s6254_s8 }
 0x625   :  { %1372 = vrot.lane.b32.xlu0 %v6390_v2, %s6253_s7 }
 0x626   :  { %1575 = vrot.lane.b32.xlu1 %v6338_v47, %s6254_s8 }
 0x629   :  { %1376 = vrot.lane.b32.xlu0 %v6402_v4, %s6253_s7 }
 0x62d   :  { %1579 = vrot.lane.b32.xlu0 %v6346_v50, %s6254_s8 }
 0x67e   :  { %v1176_v48 = vpop.xlane.xlu1 %1175 }
 0x67f   :  { %v1190_v3 = vsub.f32 %v1148_v45, %v1176_v48 }
 0x680   :  { %v1173_v5 = vpop.xlane.xlu0 %1172 }
 0x681   :  { %v1189_v44 = vsub.f32 %v1143_v20, %v1173_v5  ;;  %v1197_v32 = vmul.f32 1.442695, %v1190_v3 }
 0x682   :  { %v1389_v57 = vpop.permute.xlu1 %1388 }
 0x683   :  { %v1195_v43 = vmul.f32 1.442695, %v1189_v44 }
 0x684   :  { %v1182_v7 = vpop.xlane.xlu0 %1181 }
 0x685   :  { %5942 = vpow2.f32 %v1195_v43  ;;  %v1192_v2 = vsub.f32 %v1158_v40, %v1182_v7 }
 0x686   :  { %5944 = vpow2.f32 %v1197_v32  ;;  %v1385_v1 = vpop.permute.xlu1 %1384 }
 0x687   :  { %v1201_v16 = vmul.f32 1.442695, %v1192_v2 }
 0x688   :  { %v1179_v47 = vpop.xlane.xlu0 %1178 }
 0x689   :  { %v1191_v14 = vsub.f32 %v1153_v63, %v1179_v47 }
 0x68a   :  { %v1381_v4 = vpop.permute.xlu1 %1380 }
 0x68b   :  { %v1199_v19 = vmul.f32 1.442695, %v1191_v14 }
 0x68c   :  { %v1188_v53 = vpop.xlane.xlu0 %1187 }
 0x68d   :  { %5946 = vpow2.f32 %v1199_v19  ;;  %v1194_v50 = vsub.f32 %v1168_v49, %v1188_v53 }
 0x68e   :  { %5948 = vpow2.f32 %v1201_v16  ;;  %v1371_v45 = vpop.permute.xlu1 %1370 }
 0x68f   :  { %v1205_v3 = vmul.f32 1.442695, %v1194_v50 }
 0x690   :  { %v1185_v26 = vpop.xlane.xlu0 %1184 }
 0x691   :  { %v1193_v20 = vsub.f32 %v1163_v17, %v1185_v26 }
 0x692   :  { %v6677_v48 = vpop.eup %5942  ;;  %v1375_v5 = vpop.permute.xlu1 %1374 }
 0x693   :  { %v6679_v44 = vpop.eup %5944  ;;  %v1203_v40 = vmul.f32 1.442695, %v1193_v20  ;;  %5521 = vmatprep.mubr.msk.f32.mxu1 %vm490_vm5, %v6677_v48 }
 0x694   :  { %5522 = vmatmul.mubr.msk.f32.vlgmr.msra.gmra.mxu1 %vm490_vm5, %v6679_v44  ;;  %v1383_v63 = vpop.permute.xlu0 %1382 }
 0x695   :  { %5950 = vpow2.f32 %v1203_v40  ;;  %5531 = vmatpush3.xpose.msk.msra.mxu1 %vm364_vm1, %v6618_v22 }
 0x696   :  { %5952 = vpow2.f32 %v1205_v3  ;;  %5532 = vmatprep.subr.msk.mxu1 %vm364_vm1, %v1389_v57  ;;  %v1379_v49 = vpop.permute.xlu1 %1378 }
 0x698   :  { %v1369_v17 = vpop.permute.xlu0 %1368 }
 0x699   :  { %5533 = vmatpush3.xpose.msk.msra.mxu1 %vm364_vm1, %v1389_v57 }
 0x69a   :  { %v6689_v32 = vpop.eup %5946  ;;  %5534 = vmatprep.subr.msk.mxu1 %vm364_vm1, %v1387_v0  ;;  %v1582_v43 = vpop.permute.xlu1 %1581 }
 0x69b   :  { %v6692_v7 = vpop.eup %5948  ;;  %5524 = vmatprep.mubr.msk.f32.mxu1 %vm490_vm5, %v6689_v32  ;;  %5551 = vmatprep.subr.mxu0 %v1582_v43 }
 0x69c   :  { %5525 = vmatmul.mubr.msk.f32.gmra.mxu1 %vm490_vm5, %v6692_v7  ;;  %5552 = vmatpush3.msra.mxu0 %v1582_v43  ;;  %v1373_v22 = vpop.permute.xlu0 %1372 }
 0x69d   :  { %5535 = vmatpush3.xpose.msk.msra.mxu1 %vm364_vm1, %v1387_v0 }
 0x69e   :  { %5536 = vmatprep.subr.msk.mxu1 %vm364_vm1, %v1385_v1  ;;  %v1578_v14 = vpop.permute.xlu1 %1577 }
 0x6a0   :  { %v1377_v57 = vpop.permute.xlu0 %1376 }
 0x6a1   :  { %5537 = vmatpush3.xpose.msk.msra.mxu1 %vm364_vm1, %v1385_v1 }
 0x6a2   :  { %v6701_v2 = vpop.eup %5950  ;;  %5538 = vmatprep.subr.msk.mxu1 %vm364_vm1, %v1383_v63  ;;  %v1576_v0 = vpop.permute.xlu1 %1575 }
 0x6a3   :  { %v6704_v47 = vpop.eup %5952  ;;  %5527 = vmatprep.mubr.msk.f32.mxu1 %vm490_vm5, %v6701_v2 }
 0x6a4   :  { %5528 = vmatmul.mubr.msk.f32.gmra.mxu1 %vm490_vm5, %v6704_v47  ;;  %v1580_v16 = vpop.permute.xlu0 %1579 }
 0x6a5   :  { %5539 = vmatpush3.xpose.msk.msra.mxu1 %vm364_vm1, %v1383_v63  ;;  %5542 = vmatprep.mubr.msk.f32.mxu1 %vm364_vm1, %v1369_v17 }
 0x6a6   :  { %5540 = vmatprep.subr.msk.mxu1 %vm364_vm1, %v1381_v4  ;;  %5553 = vmatprep.subr.mxu0 %v1580_v16 }
 0x6a7   :  { %5554 = vmatpush3.msra.mxu0 %v1580_v16 }
 0x6a8   :  { %5555 = vmatprep.subr.mxu0 %v1578_v14 }
 0x6a9   :  { %5541 = vmatpush3.xpose.msk.msra.mxu1 %vm364_vm1, %v1381_v4  ;;  %5556 = vmatpush3.msra.mxu0 %v1578_v14 }
 0x6aa   :  { %5557 = vmatprep.subr.mxu0 %v1576_v0 }
 0x6ab   :  { %5558 = vmatpush3.msra.mxu0 %v1576_v0 }
 0x6ac   :  { %5543 = vmatmul.mubr.msk.f32.vlgmr.msra.gmra.mxu1 %vm364_vm1, %v1371_v45 }
 0x6ad   :  { %5545 = vmatprep.mubr.msk.f32.mxu1 %vm364_vm1, %v1373_v22 }
 0x6b0   :  { %5546 = vmatmul.mubr.msk.f32.gmra.mxu1 %vm364_vm1, %v1375_v5 }
 0x6b1   :  { %5548 = vmatprep.mubr.msk.f32.mxu1 %vm364_vm1, %v1377_v57 }
 0x6b4   :  { %5549 = vmatmul.mubr.msk.f32.gmra.mxu1 %vm364_vm1, %v1379_v49 }
 0x754   :  { %v6719_v1 = vpop.f32.mrf.mxu1 }
 0x756   :  { %v6721_v19 = vpop.f32.mrf.mxu1 }
 0x75c   :  { %v6723_v53 = vpop.f32.mrf.mxu1 }
 0x75e   :  { %v6725_v4 = vpop.f32.mrf.mxu1 }
 0x764   :  { %v6727_v50 = vpop.f32.mrf.mxu1 }
 0x766   :  { %v6729_v26 = vpop.f32.mrf.mxu1 }
 0x76c   :  { %v5544_v45 = vpop.f32.mrf.mxu1 }
 0x76d   :  { %v1488_v20 = vadd.f32 %v5544_v45, %v6413_v21 }
 0x76e   :  { %v1482_v3 = vpop.f32.mrf.mxu1 }
 0x76f   :  { %v1483_v5 = vadd.f32 %v1482_v3, %v6415_v28  ;;  %v1514_v40 = vsel %vm490_vm5, %v1488_v20, -inf }
 0x770   :  { %1515 = vmax.xlane.f32.xlu1 %v1514_v40  ;;  %v5547_v63 = vpop.f32.mrf.mxu1 }
 0x771   :  { %v1498_v49 = vadd.f32 %v5547_v63, %v6418_v33  ;;  %v1511_v17 = vsel %vm490_vm5, %v1483_v5, -inf }
 0x772   :  { %1512 = vmax.xlane.f32.xlu0 %v1511_v17  ;;  %v1492_v43 = vpop.f32.mrf.mxu1  ;;  %v870_v17 = vsel %vm490_vm5, %v6581_v59, 0.0  ;;  %v879_v59 = vsel %vm490_vm5, %v6603_v6, 0.0  ;;  %v1222_v6 = vsel %vm490_vm5, %v6704_v47, 0.0 }
 0x773   :  { %v1493_v57 = vadd.f32 %v1492_v43, %v6424_v46  ;;  %v1520_v14 = vsel %vm490_vm5, %v1498_v49, -inf  ;;  %v867_v43 = vsel %vm490_vm5, %v6579_v42, 0.0  ;;  %v876_v42 = vsel %vm490_vm5, %v6594_v61, 0.0 }
 0x774   :  { %v5550_v22 = vpop.f32.mrf.mxu1 }
 0x775   :  { %v1508_v45 = vadd.f32 %v5550_v22, %v6428_v55  ;;  %v1517_v3 = vsel %vm490_vm5, %v1493_v57, -inf  ;;  %v873_v22 = vsel %vm490_vm5, %v6591_v56, 0.0  ;;  %v1219_v56 = vsel %vm490_vm5, %v6701_v2, 0.0 }
 0x776   :  { %1521 = vmax.xlane.f32.xlu0 %v1520_v14  ;;  %v1502_v16 = vpop.f32.mrf.mxu1  ;;  %v1207_v14 = vsel %vm490_vm5, %v6677_v48, 0.0  ;;  %v1216_v48 = vsel %vm490_vm5, %v6692_v7, 0.0 }
 0x777   :  { %v1503_v0 = vadd.f32 %v1502_v16, %v6432_v60  ;;  %v1526_v63 = vsel %vm490_vm5, %v1508_v45, -inf }
 0x779   :  { %v1523_v40 = vsel %vm490_vm5, %v1503_v0, -inf }
 0x77a   :  { %1518 = vmax.xlane.f32.xlu0 %v1517_v3  ;;  %1524 = vmax.xlane.f32.xlu1 %v1523_v40 }
 0x77e   :  { %1527 = vmax.xlane.f32.xlu0 %v1526_v63 }
 0x78b   :  { %1571 = vrot.lane.b32.xlu1 %v6327_v41, %s6254_s8  ;;  %v1213_v41 = vsel %vm490_vm5, %v6689_v32, 0.0 }
 0x794   :  { %1573 = vrot.lane.b32.xlu0 %v6352_v51, %s6254_s8  ;;  %v1210_v51 = vsel %vm490_vm5, %v6679_v44, 0.0  ;;  %v882_v44 = vsel %vm490_vm5, %v6606_v18, 0.0 }
 0x7af   :  { %871 = vadd.xlane.f32.xlu1 %v870_v17 }
 0x7b3   :  { %868 = vadd.xlane.f32.xlu0 %v867_v43  ;;  %874 = vadd.xlane.f32.xlu1 %v873_v22 }
 0x7b7   :  { %1208 = vadd.xlane.f32.xlu0 %v1207_v14  ;;  %1214 = vadd.xlane.f32.xlu1 %v1213_v41 }
 0x7bb   :  { %1211 = vadd.xlane.f32.xlu0 %v1210_v51  ;;  %880 = vadd.xlane.f32.xlu1 %v879_v59 }
 0x7bf   :  { %877 = vadd.xlane.f32.xlu0 %v876_v42  ;;  %1220 = vadd.xlane.f32.xlu1 %v1219_v56 }
 0x7c3   :  { %1217 = vadd.xlane.f32.xlu0 %v1216_v48 }
 0x7c7   :  { %883 = vadd.xlane.f32.xlu0 %v882_v44 }
 0x7cb   :  { %1223 = vadd.xlane.f32.xlu0 %v1222_v6 }
 0x7f9   :  { %v1516_v32 = vpop.xlane.xlu1 %1515 }
 0x7fa   :  { %v1530_v16 = vsub.f32 %v1488_v20, %v1516_v32 }
 0x7fb   :  { %v1513_v61 = vpop.xlane.xlu0 %1512 }
 0x7fc   :  { %v1537_v3 = vmul.f32 1.442695, %v1530_v16  ;;  %v1529_v40 = vsub.f32 %v1483_v5, %v1513_v61 }
 0x7fe   :  { %5954 = vpow2.f32 %v1537_v3  ;;  %v1535_v2 = vmul.f32 1.442695, %v1529_v40  ;;  %v530_v40 = vsel %vm490_vm5, %v6475_v39, 0.0 }
 0x7ff   :  { %v1522_v63 = vpop.xlane.xlu0 %1521 }
 0x800   :  { %5956 = vpow2.f32 %v1535_v2  ;;  %v1532_v17 = vsub.f32 %v1498_v49, %v1522_v63  ;;  %v527_v2 = vsel %vm490_vm5, %v6473_v34, 0.0  ;;  %v536_v63 = vsel %vm490_vm5, %v6488_v54, 0.0 }
 0x802   :  { %v1541_v7 = vmul.f32 1.442695, %v1532_v17  ;;  %v533_v17 = vsel %vm490_vm5, %v6485_v52, 0.0 }
 0x803   :  { %v1525_v43 = vpop.xlane.xlu1 %1524  ;;  %v1519_v22 = vpop.xlane.xlu0 %1518 }
 0x804   :  { %5958 = vpow2.f32 %v1541_v7  ;;  %v1533_v18 = vsub.f32 %v1503_v0, %v1525_v43  ;;  %v1531_v14 = vsub.f32 %v1493_v57, %v1519_v22  ;;  %v542_v7 = vsel %vm490_vm5, %v6500_v62, 0.0 }
 0x805   :  { %v539_v43 = vsel %vm490_vm5, %v6497_v58, 0.0 }
 0x806   :  { %v1539_v41 = vmul.f32 1.442695, %v1531_v14  ;;  %v1543_v51 = vmul.f32 1.442695, %v1533_v18 }
 0x807   :  { %v1528_v47 = vpop.xlane.xlu0 %1527  ;;  %v1572_v48 = vpop.permute.xlu1 %1571 }
 0x808   :  { %v1534_v59 = vsub.f32 %v1508_v45, %v1528_v47  ;;  %5960 = vpow2.f32 %v1539_v41 }
 0x809   :  { %5962 = vpow2.f32 %v1543_v51 }
 0x80a   :  { %v1545_v20 = vmul.f32 1.442695, %v1534_v59 }
 0x80b   :  { %v5955_v42 = vpop.eup %5954  ;;  %v1574_v5 = vpop.permute.xlu0 %1573 }
 0x80c   :  { %5964 = vpow2.f32 %v1545_v20  ;;  %5559 = vmatprep.subr.mxu0 %v1574_v5  ;;  %v1550_v56 = vsel %vm490_vm5, %v5955_v42, 0.0 }
 0x80d   :  { %v5957_v49 = vpop.eup %5956  ;;  %1551 = vadd.xlane.f32.xlu0 %v1550_v56  ;;  %5560 = vmatpush3.msra.mxu0 %v1574_v5 }
 0x80e   :  { %5561 = vmatprep.subr.mxu0 %v1572_v48  ;;  %5563 = vmatprep.mubr.msk.f32.mxu0 %vm490_vm5, %v5957_v49  ;;  %v1547_v57 = vsel %vm490_vm5, %v5957_v49, 0.0 }
 0x80f   :  { %1548 = vadd.xlane.f32.xlu1 %v1547_v57  ;;  %5562 = vmatpush3.msra.mxu0 %v1572_v48 }
 0x810   :  { %5564 = vmatmul.mubr.msk.f32.vlgmr.msra.gmra.mxu0 %vm490_vm5, %v5955_v42 }
 0x811   :  { %v5959_v0 = vpop.eup %5958 }
 0x812   :  { %v1556_v45 = vsel %vm490_vm5, %v5959_v0, 0.0 }
 0x813   :  { %1557 = vadd.xlane.f32.xlu0 %v1556_v45 }
 0x815   :  { %v5961_v44 = vpop.eup %5960 }
 0x816   :  { %5566 = vmatprep.mubr.msk.f32.mxu0 %vm490_vm5, %v5961_v44  ;;  %v1553_v6 = vsel %vm490_vm5, %v5961_v44, 0.0  ;;  %v5963_v32 = vpop.eup %5962 }
 0x817   :  { %1554 = vadd.xlane.f32.xlu1 %v1553_v6  ;;  %5567 = vmatmul.mubr.msk.f32.gmra.mxu0 %vm490_vm5, %v5959_v0  ;;  %v1559_v3 = vsel %vm490_vm5, %v5963_v32, 0.0 }
 0x818   :  { %5569 = vmatprep.mubr.msk.f32.mxu0 %vm490_vm5, %v5963_v32 }
 0x819   :  { %v5965_v16 = vpop.eup %5964 }
 0x81a   :  { %v1562_v61 = vsel %vm490_vm5, %v5965_v16, 0.0 }
 0x81b   :  { %1563 = vadd.xlane.f32.xlu0 %v1562_v61  ;;  %1560 = vadd.xlane.f32.xlu1 %v1559_v3  ;;  %v203_v3 = vld [vmem:[#allocation2 + $0xb8] sm:$0xff] }
 0x81c   :  { %5570 = vmatmul.mubr.msk.f32.gmra.mxu0 %vm490_vm5, %v5965_v16  ;;  %5572 = vmatprep.subr.mxu0 %v203_v3 }
 0x81d   :  { %5573 = vmatpush3.msra.mxu0 %v203_v3 }
 0x81f   :  { %531 = vadd.xlane.f32.xlu0 %v530_v40  ;;  %528 = vadd.xlane.f32.xlu1 %v527_v2  ;;  %v202_v40 = vld [vmem:[#allocation2 + $0xb0] sm:$0xff] }
 0x820   :  { %5574 = vmatprep.subr.mxu0 %v202_v40 }
 0x821   :  { %5575 = vmatpush3.msra.mxu0 %v202_v40 }
 0x823   :  { %537 = vadd.xlane.f32.xlu0 %v536_v63  ;;  %534 = vadd.xlane.f32.xlu1 %v533_v17  ;;  %v201_v63 = vld [vmem:[#allocation2 + $0xa8] sm:$0xff] }
 0x824   :  { %5576 = vmatprep.subr.mxu0 %v201_v63 }
 0x825   :  { %5577 = vmatpush3.msra.mxu0 %v201_v63 }
 0x827   :  { %543 = vadd.xlane.f32.xlu0 %v542_v7  ;;  %540 = vadd.xlane.f32.xlu1 %v539_v43  ;;  %v200_v7 = vld [vmem:[#allocation2 + $0xa0] sm:$0xff] }
 0x828   :  { %5578 = vmatprep.subr.mxu0 %v200_v7 }
 0x829   :  { %5579 = vmatpush3.msra.mxu0 %v200_v7 }
 0x838   :  { %v872_v39 = vpop.xlane.xlu1 %871 }
 0x839   :  { %5966 = vrcp.f32 %v872_v39 }
 0x83c   :  { %v875_v34 = vpop.xlane.xlu1 %874  ;;  %v869_v22 = vpop.xlane.xlu0 %868 }
 0x83d   :  { %5968 = vrcp.f32 %v875_v34 }
 0x83e   :  { %5970 = vrcp.f32 %v869_v22 }
 0x840   :  { %v1215_v54 = vpop.xlane.xlu1 %1214  ;;  %v1209_v18 = vpop.xlane.xlu0 %1208 }
 0x841   :  { %5972 = vrcp.f32 %v1215_v54 }
 0x842   :  { %5974 = vrcp.f32 %v1209_v18 }
 0x844   :  { %v881_v52 = vpop.xlane.xlu1 %880  ;;  %v1212_v14 = vpop.xlane.xlu0 %1211 }
 0x845   :  { %5976 = vrcp.f32 %v881_v52 }
 0x846   :  { %v5967_v41 = vpop.eup %5966  ;;  %5978 = vrcp.f32 %v1212_v14 }
 0x847   :  { %v1023_v62 = vmul.f32 %v5967_v41, %v6625_v23 }
 0x848   :  { %v1221_v58 = vpop.xlane.xlu1 %1220  ;;  %v878_v51 = vpop.xlane.xlu0 %877 }
 0x849   :  { %5980 = vrcp.f32 %v1221_v58  ;;  %1716 = vrot.lane.b32.xlu0 %v1023_v62, %s6242_s13 }
 0x84a   :  { %v5969_v47 = vpop.eup %5968  ;;  %5982 = vrcp.f32 %v878_v51 }
 0x84b   :  { %v5971_v59 = vpop.eup %5970  ;;  %v1024_v20 = vmul.f32 %v5969_v47, %v6631_v35 }
 0x84c   :  { %v1218_v42 = vpop.xlane.xlu0 %1217  ;;  %v1022_v5 = vmul.f32 %v5971_v59, %v6627_v27 }
 0x84d   :  { %5984 = vrcp.f32 %v1218_v42  ;;  %1718 = vrot.lane.b32.xlu0 %v1024_v20, %s6242_s13 }
 0x84e   :  { %v5973_v56 = vpop.eup %5972  ;;  %1714 = vrot.lane.b32.xlu1 %v1022_v5, %s6242_s13 }
 0x84f   :  { %v5975_v23 = vpop.eup %5974  ;;  %v1364_v49 = vmul.f32 %v5973_v56, %v6725_v4 }
 0x850   :  { %v884_v48 = vpop.xlane.xlu0 %883  ;;  %v1362_v57 = vmul.f32 %v5975_v23, %v6721_v19 }
 0x851   :  { %5986 = vrcp.f32 %v884_v48  ;;  %1742 = vrot.lane.b32.xlu0 %v1364_v49, %s6255_s9 }
 0x852   :  { %v5977_v35 = vpop.eup %5976  ;;  %1738 = vrot.lane.b32.xlu1 %v1362_v57, %s6255_s9 }
 0x853   :  { %v5979_v27 = vpop.eup %5978  ;;  %v1026_v0 = vmul.f32 %v5977_v35, %v6635_v38 }
 0x854   :  { %v1224_v45 = vpop.xlane.xlu0 %1223  ;;  %v1363_v44 = vmul.f32 %v5979_v27, %v6719_v1 }
 0x855   :  { %5988 = vrcp.f32 %v1224_v45  ;;  %1722 = vrot.lane.b32.xlu0 %v1026_v0, %s6242_s13 }
 0x856   :  { %v5981_v4 = vpop.eup %5980  ;;  %1740 = vrot.lane.b32.xlu1 %v1363_v44, %s6255_s9 }
 0x857   :  { %v5983_v19 = vpop.eup %5982  ;;  %v1366_v6 = vmul.f32 %v5981_v4, %v6729_v26 }
 0x858   :  { %v1025_v32 = vmul.f32 %v5983_v19, %v6629_v29 }
 0x859   :  { %1746 = vrot.lane.b32.xlu0 %v1366_v6, %s6255_s9 }
 0x85a   :  { %v5985_v16 = vpop.eup %5984  ;;  %1720 = vrot.lane.b32.xlu1 %v1025_v32, %s6242_s13 }
 0x85b   :  { %v1365_v38 = vmul.f32 %v5985_v16, %v6723_v53 }
 0x85e   :  { %v5987_v61 = vpop.eup %5986  ;;  %1744 = vrot.lane.b32.xlu1 %v1365_v38, %s6255_s9 }
 0x85f   :  { %v1027_v1 = vmul.f32 %v5987_v61, %v6633_v15 }
 0x862   :  { %v5989_v2 = vpop.eup %5988  ;;  %1724 = vrot.lane.b32.xlu1 %v1027_v1, %s6242_s13 }
 0x863   :  { %v1367_v29 = vmul.f32 %v5989_v2, %v6727_v50 }
 0x866   :  { %1748 = vrot.lane.b32.xlu1 %v1367_v29, %s6255_s9 }
 0x896   :  { %v1552_v26 = vpop.xlane.xlu0 %1551 }
 0x897   :  { %5990 = vrcp.f32 %v1552_v26 }
 0x898   :  { %v1549_v53 = vpop.xlane.xlu1 %1548 }
 0x899   :  { %5992 = vrcp.f32 %v1549_v53 }
 0x89c   :  { %v1558_v15 = vpop.xlane.xlu0 %1557 }
 0x89d   :  { %5994 = vrcp.f32 %v1558_v15 }
 0x8a0   :  { %v1555_v17 = vpop.xlane.xlu1 %1554 }
 0x8a1   :  { %5996 = vrcp.f32 %v1555_v17 }
 0x8a4   :  { %v1564_v43 = vpop.xlane.xlu0 %1563  ;;  %v1561_v50 = vpop.xlane.xlu1 %1560 }
 0x8a5   :  { %5998 = vrcp.f32 %v1564_v43  ;;  %v5991_v39 = vpop.eup %5990 }
 0x8a6   :  { %6000 = vrcp.f32 %v1561_v50  ;;  %v5993_v54 = vpop.eup %5992 }
 0x8a8   :  { %v529_v49 = vpop.xlane.xlu1 %528  ;;  %v532_v35 = vpop.xlane.xlu0 %531 }
 0x8a9   :  { %6002 = vrcp.f32 %v529_v49 }
 0x8aa   :  { %v5995_v14 = vpop.eup %5994  ;;  %6004 = vrcp.f32 %v532_v35 }
 0x8ac   :  { %v535_v48 = vpop.xlane.xlu1 %534  ;;  %v538_v0 = vpop.xlane.xlu0 %537 }
 0x8ad   :  { %6006 = vrcp.f32 %v535_v48 }
 0x8ae   :  { %v5997_v58 = vpop.eup %5996  ;;  %6008 = vrcp.f32 %v538_v0 }
 0x8b0   :  { %v541_v57 = vpop.xlane.xlu1 %540  ;;  %v544_v44 = vpop.xlane.xlu0 %543 }
 0x8b1   :  { %6010 = vrcp.f32 %v541_v57  ;;  %v4944_v57 = vld [vmem:[#allocation2 + $0xc0] ss:$0 sm:$0xff] }
 0x8b2   :  { %v5999_v59 = vpop.eup %5998  ;;  %6012 = vrcp.f32 %v544_v44 }
 0x8b3   :  { %v6001_v5 = vpop.eup %6000 }
 0x8b6   :  { %v6003_v3 = vpop.eup %6002 }
 0x8b7   :  { %v6005_v40 = vpop.eup %6004  ;;  %v682_v26 = vmul.f32 %v6003_v3, %v6521_v9 }
 0x8b8   :  { %v683_v53 = vmul.f32 %v6005_v40, %v6519_v8 }
 0x8bb   :  { %v1717_v19 = vpop.permute.xlu0 %1716 }
 0x8bc   :  { %v1781_v17 = vsel %vm364_vm1, %v683_v53, %v1717_v19 }
 0x8bf   :  { %v1719_v32 = vpop.permute.xlu0 %1718 }
 0x8c0   :  { %v1715_v27 = vpop.permute.xlu1 %1714 }
 0x8c1   :  { %v1780_v63 = vsel %vm364_vm1, %v682_v26, %v1715_v27 }
 0x8c3   :  { %v1743_v38 = vpop.permute.xlu0 %1742 }
 0x8c4   :  { %v1739_v45 = vpop.permute.xlu1 %1738 }
 0x8c5   :  { %v1787_v7 = vsel %vm1786_vm9, %v1780_v63, %v1739_v45 }
 0x8c7   :  { %v1723_v1 = vpop.permute.xlu0 %1722 }
 0x8c8   :  { %v1741_v4 = vpop.permute.xlu1 %1740 }
 0x8c9   :  { %v1788_v50 = vsel %vm1786_vm9, %v1781_v17, %v1741_v4 }
 0x8cb   :  { %v1747_v29 = vpop.permute.xlu0 %1746 }
 0x8cc   :  { %v1721_v6 = vpop.permute.xlu1 %1720 }
 0x8d0   :  { %v5565_v34 = vpop.f32.mrf.mxu0  ;;  %v1745_v16 = vpop.permute.xlu1 %1744 }
 0x8d1   :  { %v1703_v22 = vmul.f32 %v5991_v39, %v5565_v34  ;;  %v6007_v34 = vpop.eup %6006 }
 0x8d2   :  { %v1673_v18 = vpop.f32.mrf.mxu0  ;;  %v6009_v9 = vpop.eup %6008  ;;  %v684_v8 = vmul.f32 %v6007_v34, %v6525_v11 }
 0x8d3   :  { %v1702_v52 = vmul.f32 %v5993_v54, %v1673_v18  ;;  %1764 = vrot.lane.b32.xlu1 %v1703_v22, %s6256_s10  ;;  %v6011_v54 = vpop.eup %6010  ;;  %v685_v18 = vmul.f32 %v6009_v9, %v6523_v10 }
 0x8d4   :  { %v1725_v61 = vpop.permute.xlu1 %1724 }
 0x8d5   :  { %1762 = vrot.lane.b32.xlu0 %v1702_v52, %s6256_s10 }
 0x8d7   :  { %v5568_v41 = vpop.f32.mrf.mxu0 }
 0x8d8   :  { %v1705_v62 = vmul.f32 %v5995_v14, %v5568_v41  ;;  %v1749_v2 = vpop.permute.xlu1 %1748  ;;  %v6013_v14 = vpop.eup %6012  ;;  %v1782_v41 = vsel %vm364_vm1, %v684_v8, %v1719_v32 }
 0x8d9   :  { %v1683_v51 = vpop.f32.mrf.mxu0  ;;  %v687_v11 = vmul.f32 %v6013_v14, %v6527_v12 }
 0x8da   :  { %v1704_v47 = vmul.f32 %v5997_v58, %v1683_v51  ;;  %1768 = vrot.lane.b32.xlu1 %v1705_v62, %s6256_s10  ;;  %v1789_v62 = vsel %vm1786_vm9, %v1782_v41, %v1743_v38  ;;  %v1783_v58 = vsel %vm364_vm1, %v685_v18, %v1721_v6 }
 0x8dc   :  { %v5571_v20 = vpop.f32.mrf.mxu0  ;;  %1766 = vrot.lane.b32.xlu0 %v1704_v47, %s6256_s10  ;;  %v686_v47 = vmul.f32 %v6011_v54, %v6529_v13 }
 0x8dd   :  { %v1707_v42 = vmul.f32 %v5999_v59, %v5571_v20  ;;  %v1790_v59 = vsel %vm1786_vm9, %v1783_v58, %v1745_v16 }
 0x8de   :  { %v1693_v56 = vpop.f32.mrf.mxu0  ;;  %v1784_v10 = vsel %vm364_vm1, %v686_v47, %v1723_v1 }
 0x8df   :  { %v1706_v23 = vmul.f32 %v6001_v5, %v1693_v56  ;;  %1772 = vrot.lane.b32.xlu1 %v1707_v42, %s6256_s10  ;;  %v1791_v56 = vsel %vm1786_vm9, %v1784_v10, %v1747_v29 }
 0x8e1   :  { %1770 = vrot.lane.b32.xlu0 %v1706_v23, %s6256_s10  ;;  %v1785_v23 = vsel %vm364_vm1, %v687_v11, %v1725_v61 }
 0x8e2   :  { %v1792_v49 = vsel %vm1786_vm9, %v1785_v23, %v1749_v2 }
 0x945   :  { %v1765_v15 = vpop.permute.xlu1 %1764 }
 0x946   :  { %v1795_v22 = vsel %vm1793_vm10, %v1788_v50, %v1765_v15 }
 0x947   :  { %v1763_v43 = vpop.permute.xlu0 %1762 }
 0x948   :  { %v1794_v39 = vsel %vm1793_vm10, %v1787_v7, %v1763_v43 }
 0x949   :  { %5580 = vmatprep.mubr.msk.f32.mxu0 %vm48_vm0, %v1794_v39 }
 0x94a   :  { %5581 = vmatmul.mubr.msk.f32.vlgmr.msra.gmra.mxu0 %vm48_vm0, %v1795_v22 }
 0x94c   :  { %v1769_v52 = vpop.permute.xlu1 %1768 }
 0x94d   :  { %v1797_v42 = vsel %vm1793_vm10, %v1790_v59, %v1769_v52 }
 0x94e   :  { %v1767_v51 = vpop.permute.xlu0 %1766 }
 0x94f   :  { %v1796_v20 = vsel %vm1793_vm10, %v1789_v62, %v1767_v51 }
 0x950   :  { %5583 = vmatprep.mubr.msk.f32.mxu0 %vm48_vm0, %v1796_v20 }
 0x951   :  { %v1773_v5 = vpop.permute.xlu1 %1772  ;;  %5584 = vmatmul.mubr.msk.f32.gmra.mxu0 %vm48_vm0, %v1797_v42 }
 0x952   :  { %v1799_v12 = vsel %vm1793_vm10, %v1792_v49, %v1773_v5  ;;  %v210_v49 = vld [vmem:[#allocation2 + $0xf0] sm:$0xff] }
 0x953   :  { %v1771_v13 = vpop.permute.xlu0 %1770  ;;  %5589 = vmatprep.subr.mxu1 %v210_v49 }
 0x954   :  { %v1798_v48 = vsel %vm1793_vm10, %v1791_v56, %v1771_v13  ;;  %5590 = vmatpush3.msra.mxu1 %v210_v49 }
 0x955   :  { %5586 = vmatprep.mubr.msk.f32.mxu0 %vm48_vm0, %v1798_v48  ;;  %v209_v48 = vld [vmem:[#allocation2 + $0xe8] sm:$0xff] }
 0x956   :  { %5587 = vmatmul.mubr.msk.f32.gmra.mxu0 %vm48_vm0, %v1799_v12  ;;  %v208_v12 = vld [vmem:[#allocation2 + $0xe0] sm:$0xff]  ;;  %5591 = vmatprep.subr.mxu1 %v209_v48 }
 0x957   :  { %5592 = vmatpush3.msra.mxu1 %v209_v48 }
 0x958   :  { %5593 = vmatprep.subr.mxu1 %v208_v12 }
 0x959   :  { %5594 = vmatpush3.msra.mxu1 %v208_v12 }
 0xa0a   :  { %v5582_v35 = vpop.f32.mrf.mxu0 }
 0xa0b   :  { %v1894_v27 = vadd.f32 %v5582_v35, %v4944_v57 }
 0xa0c   :  { %v1888_v0 = vpop.f32.mrf.mxu0 }
 0xa0d   :  { %v1918_v45 = vadd.f32 %v1894_v27, %v6305_v25  ;;  %v1889_v44 = vadd.f32 %v4944_v57, %v1888_v0 }
 0xa0f   :  { %v1917_v4 = vadd.f32 %v1889_v44, %v6303_v24  ;;  %v1926_v19 = vsel %vm48_vm0, %v1918_v45, 0.0 }
 0xa10   :  { %1927 = vadd.xlane.f32.xlu1 %v1926_v19 }
 0xa11   :  { %v1923_v6 = vsel %vm48_vm0, %v1917_v4, 0.0  ;;  %v5585_v32 = vpop.f32.mrf.mxu0 }
 0xa12   :  { %1924 = vadd.xlane.f32.xlu0 %v1923_v6  ;;  %v1904_v38 = vadd.f32 %v5585_v32, %v4944_v57 }
 0xa13   :  { %v1898_v16 = vpop.f32.mrf.mxu0 }
 0xa14   :  { %v1899_v61 = vadd.f32 %v4944_v57, %v1898_v16  ;;  %v1920_v2 = vadd.f32 %v1904_v38, %v6313_v31 }
 0xa16   :  { %v5588_v1 = vpop.f32.mrf.mxu0  ;;  %v1919_v3 = vadd.f32 %v1899_v61, %v6311_v30  ;;  %v1932_v63 = vsel %vm48_vm0, %v1920_v2, 0.0 }
 0xa17   :  { %v1914_v25 = vadd.f32 %v5588_v1, %v4944_v57 }
 0xa18   :  { %v1908_v40 = vpop.f32.mrf.mxu0  ;;  %v1929_v24 = vsel %vm48_vm0, %v1919_v3, 0.0 }
 0xa19   :  { %v1909_v29 = vadd.f32 %v4944_v57, %v1908_v40  ;;  %1930 = vadd.xlane.f32.xlu0 %v1929_v24  ;;  %v1922_v53 = vadd.f32 %v1914_v25, %v6321_v37  ;;  %v207_v57 = vld [vmem:[#allocation2 + $0xd8] sm:$0xff] }
 0xa1a   :  { %5595 = vmatprep.subr.mxu1 %v207_v57 }
 0xa1b   :  { %v1921_v26 = vadd.f32 %v1909_v29, %v6319_v36  ;;  %v1938_v30 = vsel %vm48_vm0, %v1922_v53, 0.0  ;;  %5596 = vmatpush3.msra.mxu1 %v207_v57 }
 0xa1d   :  { %v1935_v15 = vsel %vm48_vm0, %v1921_v26, 0.0  ;;  %1933 = vadd.xlane.f32.xlu0 %v1932_v63 }
 0xa1e   :  { %1936 = vadd.xlane.f32.xlu1 %v1935_v15 }
 0xa21   :  { %1939 = vadd.xlane.f32.xlu0 %v1938_v30 }
 0xa99   :  { %v1928_v17 = vpop.xlane.xlu1 %1927 }
 0xa9a   :  { %v1943_v31 = vmul.f32 0.03125, %v1928_v17  ;;  %v4952_v17 = vld [vmem:[#allocation2 + $0xd0] ss:$0 sm:$0xff] }
 0xa9b   :  { %v1925_v7 = vpop.xlane.xlu0 %1924 }
 0xa9c   :  { %v6867_v43 = vsub.f32 %v1918_v45, %v1943_v31  ;;  %v1942_v50 = vmul.f32 0.03125, %v1925_v7 }
 0xa9e   :  { %v6869_v39 = vsub.f32 %v1917_v4, %v1942_v50  ;;  %v1955_v36 = vmul.f32 %v6867_v43, %v6867_v43 }
 0xaa0   :  { %v1963_v37 = vsel %vm48_vm0, %v1955_v36, 0.0  ;;  %v1954_v34 = vmul.f32 %v6869_v39, %v6869_v39 }
 0xaa1   :  { %1964 = vadd.xlane.f32.xlu0 %v1963_v37 }
 0xaa2   :  { %v1960_v22 = vsel %vm48_vm0, %v1954_v34, 0.0  ;;  %v1931_v9 = vpop.xlane.xlu0 %1930 }
 0xaa3   :  { %1961 = vadd.xlane.f32.xlu1 %v1960_v22  ;;  %v1944_v8 = vmul.f32 0.03125, %v1931_v9 }
 0xaa5   :  { %v6877_v54 = vsub.f32 %v1919_v3, %v1944_v8 }
 0xaa6   :  { %v1934_v52 = vpop.xlane.xlu0 %1933 }
 0xaa7   :  { %v1937_v18 = vpop.xlane.xlu1 %1936  ;;  %v1945_v41 = vmul.f32 0.03125, %v1934_v52  ;;  %v1956_v62 = vmul.f32 %v6877_v54, %v6877_v54 }
 0xaa8   :  { %v1946_v14 = vmul.f32 0.03125, %v1937_v18 }
 0xaa9   :  { %v6883_v51 = vsub.f32 %v1920_v2, %v1945_v41  ;;  %v1966_v47 = vsel %vm48_vm0, %v1956_v62, 0.0 }
 0xaaa   :  { %v6881_v58 = vsub.f32 %v1921_v26, %v1946_v14  ;;  %1967 = vadd.xlane.f32.xlu1 %v1966_v47  ;;  %v1940_v59 = vpop.xlane.xlu0 %1939  ;;  %v4951_v26 = vld [vmem:[#allocation2 + $0xc8] ss:$0 sm:$0xff] }
 0xaab   :  { %v1947_v20 = vmul.f32 0.03125, %v1940_v59  ;;  %v1957_v42 = vmul.f32 %v6883_v51, %v6883_v51  ;;  %v218_v59 = vld [vmem:[#allocation2 + $0x130] sm:$0xff] }
 0xaac   :  { %v1958_v11 = vmul.f32 %v6881_v58, %v6881_v58 }
 0xaad   :  { %v6890_v10 = vsub.f32 %v1922_v53, %v1947_v20  ;;  %v1969_v56 = vsel %vm48_vm0, %v1957_v42, 0.0  ;;  %v217_v20 = vld [vmem:[#allocation2 + $0x128] sm:$0xff]  ;;  %v215_v42 = vld [vmem:[#allocation2 + $0x118] sm:$0xff] }
 0xaae   :  { %v1972_v5 = vsel %vm48_vm0, %v1958_v11, 0.0  ;;  %1970 = vadd.xlane.f32.xlu0 %v1969_v56  ;;  %v216_v11 = vld [vmem:[#allocation2 + $0x120] sm:$0xff] }
 0xaaf   :  { %1973 = vadd.xlane.f32.xlu1 %v1972_v5  ;;  %v1959_v23 = vmul.f32 %v6890_v10, %v6890_v10  ;;  %v213_v5 = vld [vmem:[#allocation2 + $0x108] sm:$0xff]  ;;  %v212_v56 = vld [vmem:[#allocation2 + $0x100] sm:$0xff] }
 0xab1   :  { %v1975_v13 = vsel %vm48_vm0, %v1959_v23, 0.0  ;;  %v4953_v23 = vld [vmem:[#allocation2 + $0xf8] ss:$0 sm:$0xff] }
 0xab2   :  { %1976 = vadd.xlane.f32.xlu0 %v1975_v13 }
 0xb2a   :  { %v1965_v35 = vpop.xlane.xlu0 %1964 }
 0xb2b   :  { %v1979_v27 = vmul.f32 0.03125, %v1965_v35 }
 0xb2c   :  { %v1962_v0 = vpop.xlane.xlu1 %1961 }
 0xb2d   :  { %v1985_v45 = vadd.f32 1e-05, %v1979_v27  ;;  %v1978_v44 = vmul.f32 0.03125, %v1962_v0 }
 0xb2f   :  { %6014 = vrsqrt.f32 %v1985_v45  ;;  %v1984_v4 = vadd.f32 1e-05, %v1978_v44 }
 0xb31   :  { %6016 = vrsqrt.f32 %v1984_v4 }
 0xb33   :  { %v1968_v19 = vpop.xlane.xlu1 %1967 }
 0xb34   :  { %v1980_v6 = vmul.f32 0.03125, %v1968_v19 }
 0xb36   :  { %v1986_v32 = vadd.f32 1e-05, %v1980_v6 }
 0xb37   :  { %v1971_v38 = vpop.xlane.xlu0 %1970 }
 0xb38   :  { %v1974_v16 = vpop.xlane.xlu1 %1973  ;;  %6018 = vrsqrt.f32 %v1986_v32  ;;  %v1981_v1 = vmul.f32 0.03125, %v1971_v38 }
 0xb39   :  { %v1982_v61 = vmul.f32 0.03125, %v1974_v16 }
 0xb3a   :  { %v1987_v40 = vadd.f32 1e-05, %v1981_v1 }
 0xb3b   :  { %v1988_v3 = vadd.f32 1e-05, %v1982_v61  ;;  %v1977_v25 = vpop.xlane.xlu0 %1976 }
 0xb3c   :  { %v6015_v2 = vpop.eup %6014  ;;  %v1983_v24 = vmul.f32 0.03125, %v1977_v25 }
 0xb3d   :  { %v1997_v29 = vmul.f32 %v6015_v2, %v6867_v43  ;;  %6020 = vrsqrt.f32 %v1988_v3 }
 0xb3e   :  { %v6017_v53 = vpop.eup %6016  ;;  %6022 = vrsqrt.f32 %v1987_v40  ;;  %v1989_v63 = vadd.f32 1e-05, %v1983_v24 }
 0xb3f   :  { %v1996_v15 = vmul.f32 %v6017_v53, %v6869_v39  ;;  %v2007_v30 = vmul.f32 %v4951_v26, %v1997_v29 }
 0xb40   :  { %6024 = vrsqrt.f32 %v1989_v63 }
 0xb41   :  { %v2006_v31 = vmul.f32 %v4951_v26, %v1996_v15  ;;  %v6901_v50 = vadd.f32 %v4952_v17, %v2007_v30 }
 0xb43   :  { %v6899_v7 = vadd.f32 %v4952_v17, %v2006_v31 }
 0xb45   :  { %5597 = vmatprep.mubr.msk.f32.mxu1 %vm48_vm0, %v6899_v7  ;;  %v6019_v43 = vpop.eup %6018 }
 0xb46   :  { %5598 = vmatmul.mubr.msk.f32.vlgmr.msra.gmra.mxu1 %vm48_vm0, %v6901_v50  ;;  %v1998_v36 = vmul.f32 %v6019_v43, %v6877_v54 }
 0xb48   :  { %v2008_v37 = vmul.f32 %v4951_v26, %v1998_v36 }
 0xb4a   :  { %v6021_v34 = vpop.eup %6020  ;;  %v6908_v22 = vadd.f32 %v4952_v17, %v2008_v37 }
 0xb4b   :  { %v6023_v39 = vpop.eup %6022  ;;  %v2000_v9 = vmul.f32 %v6021_v34, %v6881_v58 }
 0xb4c   :  { %v1999_v8 = vmul.f32 %v6023_v39, %v6883_v51  ;;  %5600 = vmatprep.mubr.msk.f32.mxu1 %vm48_vm0, %v6908_v22  ;;  %v219_v51 = vld [vmem:[#allocation2 + $0x138] sm:$0xff] }
 0xb4d   :  { %v2010_v18 = vmul.f32 %v4951_v26, %v2000_v9  ;;  %v6025_v52 = vpop.eup %6024  ;;  %5606 = vmatprep.subr.mxu0 %v219_v51 }
 0xb4e   :  { %v2009_v14 = vmul.f32 %v4951_v26, %v1999_v8  ;;  %v2001_v62 = vmul.f32 %v6025_v52, %v6890_v10  ;;  %5607 = vmatpush3.msra.mxu0 %v219_v51  ;;  %v214_v10 = vld [vmem:[#allocation2 + $0x110] sm:$0xff] }
 0xb4f   :  { %v6914_v41 = vadd.f32 %v4952_v17, %v2010_v18  ;;  %5608 = vmatprep.subr.mxu0 %v218_v59 }
 0xb50   :  { %v6917_v54 = vadd.f32 %v4952_v17, %v2009_v14  ;;  %v2011_v47 = vmul.f32 %v4951_v26, %v2001_v62  ;;  %5609 = vmatpush3.msra.mxu0 %v218_v59 }
 0xb51   :  { %5610 = vmatprep.subr.mxu0 %v217_v20 }
 0xb52   :  { %5601 = vmatmul.mubr.msk.f32.gmra.mxu1 %vm48_vm0, %v6917_v54  ;;  %v6923_v58 = vadd.f32 %v4952_v17, %v2011_v47  ;;  %5611 = vmatpush3.msra.mxu0 %v217_v20 }
 0xb53   :  { %5603 = vmatprep.mubr.msk.f32.mxu1 %vm48_vm0, %v6914_v41  ;;  %5612 = vmatprep.subr.mxu0 %v216_v11 }
 0xb54   :  { %5613 = vmatpush3.msra.mxu0 %v216_v11 }
 0xb55   :  { %5614 = vmatprep.subr.mxu0 %v215_v42 }
 0xb56   :  { %5604 = vmatmul.mubr.msk.f32.gmra.mxu1 %vm48_vm0, %v6923_v58  ;;  %5615 = vmatpush3.msra.mxu0 %v215_v42 }
 0xb57   :  { %5616 = vmatprep.subr.mxu0 %v214_v10 }
 0xb58   :  { %5617 = vmatpush3.msra.mxu0 %v214_v10 }
 0xb59   :  { %5618 = vmatprep.subr.mxu0 %v213_v5 }
 0xb5a   :  { %5619 = vmatpush3.msra.mxu0 %v213_v5 }
 0xb5b   :  { %5620 = vmatprep.subr.mxu0 %v212_v56 }
 0xb5c   :  { %5621 = vmatpush3.msra.mxu0 %v212_v56 }
 0xc06   :  { %v5599_v13 = vpop.f32.mrf.mxu1 }
 0xc07   :  { %v6927_v49 = vadd.f32 %v5599_v13, %v4953_v23 }
 0xc08   :  { %v2110_v48 = vpop.f32.mrf.mxu1 }
 0xc09   :  { %v6930_v12 = vmul.f32 0.70710677, %v6927_v49  ;;  %v6932_v57 = vadd.f32 %v4953_v23, %v2110_v48 }
 0xc0b   :  { %v2152_v35 = vand.u32 2147483647, %v6930_v12  ;;  %v6936_v27 = vmul.f32 0.70710677, %v6932_v57  ;;  %vm2272_vm11 = vcmp.lt.f32.partialorder %v6930_v12, 0.0 }
 0xc0d   :  { %v2158_v0 = vmul.f32 0.3275911, %v2152_v35  ;;  %v2151_v45 = vand.u32 2147483647, %v6936_v27  ;;  %v2236_v3 = vsub.f32 0.0, %v2152_v35  ;;  %vm2271_vm12 = vcmp.lt.f32.partialorder %v6936_v27, 0.0 }
 0xc0f   :  { %v2164_v44 = vadd.f32 1.0, %v2158_v0  ;;  %v2157_v4 = vmul.f32 0.3275911, %v2151_v45  ;;  %v2235_v24 = vsub.f32 0.0, %v2151_v45  ;;  %v2242_v30 = vmul.f32 %v2236_v3, %v2152_v35 }
 0xc11   :  { %6026 = vrcp.f32 %v2164_v44  ;;  %v2163_v19 = vadd.f32 1.0, %v2157_v4  ;;  %v2241_v37 = vmul.f32 %v2235_v24, %v2151_v45  ;;  %v2249_v52 = vmul.f32 1.442695, %v2242_v30 }
 0xc12   :  { %v5602_v6 = vpop.f32.mrf.mxu1 }
 0xc13   :  { %v6939_v32 = vadd.f32 %v5602_v6, %v4953_v23  ;;  %6028 = vrcp.f32 %v2163_v19  ;;  %v2247_v59 = vmul.f32 1.442695, %v2241_v37 }
 0xc14   :  { %v2120_v16 = vpop.f32.mrf.mxu1 }
 0xc15   :  { %v6942_v38 = vmul.f32 0.70710677, %v6939_v32  ;;  %v6944_v61 = vadd.f32 %v4953_v23, %v2120_v16 }
 0xc16   :  { %v5605_v1 = vpop.f32.mrf.mxu1 }
 0xc17   :  { %v2154_v40 = vand.u32 2147483647, %v6942_v38  ;;  %v6948_v2 = vmul.f32 0.70710677, %v6944_v61  ;;  %v6950_v25 = vadd.f32 %v5605_v1, %v4953_v23  ;;  %vm2274_vm14 = vcmp.lt.f32.partialorder %v6942_v38, 0.0 }
 0xc18   :  { %v2130_v29 = vpop.f32.mrf.mxu1 }
 0xc19   :  { %v2160_v26 = vmul.f32 0.3275911, %v2154_v40  ;;  %v2153_v53 = vand.u32 2147483647, %v6948_v2  ;;  %v6954_v63 = vmul.f32 0.70710677, %v6950_v25  ;;  %v6956_v15 = vadd.f32 %v4953_v23, %v2130_v29 }
 0xc1a   :  { %v2238_v11 = vsub.f32 0.0, %v2154_v40  ;;  %vm2273_vm15 = vcmp.lt.f32.partialorder %v6948_v2, 0.0 }
 0xc1b   :  { %v2166_v17 = vadd.f32 1.0, %v2160_v26  ;;  %v2159_v31 = vmul.f32 0.3275911, %v2153_v53  ;;  %v2156_v43 = vand.u32 2147483647, %v6954_v63  ;;  %v2237_v48 = vsub.f32 0.0, %v2153_v53 }
 0xc1c   :  { %v6960_v36 = vmul.f32 0.70710677, %v6956_v15  ;;  %v2244_v13 = vmul.f32 %v2238_v11, %v2154_v40  ;;  %vm2276_vm2 = vcmp.lt.f32.partialorder %v6954_v63, 0.0 }
 0xc1d   :  { %6030 = vrcp.f32 %v2166_v17  ;;  %v2165_v34 = vadd.f32 1.0, %v2159_v31  ;;  %v2162_v9 = vmul.f32 0.3275911, %v2156_v43  ;;  %v2240_v0 = vsub.f32 0.0, %v2156_v43 }
 0xc1e   :  { %v6027_v39 = vpop.eup %6026  ;;  %v2155_v8 = vand.u32 2147483647, %v6960_v36  ;;  %v2253_v6 = vmul.f32 1.442695, %v2244_v13  ;;  %v2243_v16 = vmul.f32 %v2237_v48, %v2153_v53  ;;  %vm2275_vm3 = vcmp.lt.f32.partialorder %v6960_v36, 0.0 }
 0xc1f   :  { %v2182_v18 = vmul.f32 1.0614054, %v6027_v39  ;;  %6032 = vrcp.f32 %v2165_v34  ;;  %v2168_v14 = vadd.f32 1.0, %v2162_v9  ;;  %v2246_v29 = vmul.f32 %v2240_v0, %v2156_v43 }
 0xc20   :  { %v2161_v62 = vmul.f32 0.3275911, %v2155_v8  ;;  %v6029_v47 = vpop.eup %6028  ;;  %v2239_v24 = vsub.f32 0.0, %v2155_v8  ;;  %v2251_v34 = vmul.f32 1.442695, %v2243_v16 }
 0xc21   :  { %v2188_v51 = vadd.f32 -1.4531521, %v2182_v18  ;;  %v2181_v20 = vmul.f32 1.0614054, %v6029_v47  ;;  %6034 = vrcp.f32 %v2168_v14 }
 0xc22   :  { %v2167_v42 = vadd.f32 1.0, %v2161_v62  ;;  %6036 = vpow2.f32 %v2249_v52  ;;  %v2257_v52 = vmul.f32 1.442695, %v2246_v29  ;;  %v2245_v14 = vmul.f32 %v2239_v24, %v2155_v8 }
 0xc23   :  { %v2194_v10 = vmul.f32 %v6027_v39, %v2188_v51  ;;  %v2187_v5 = vadd.f32 -1.4531521, %v2181_v20 }
 0xc24   :  { %6038 = vrcp.f32 %v2167_v42  ;;  %v2255_v48 = vmul.f32 1.442695, %v2245_v14  ;;  %v2139_v14 = vmul.f32 0.5, %v6932_v57 }
 0xc25   :  { %v2200_v56 = vadd.f32 1.4214138, %v2194_v10  ;;  %v2193_v23 = vmul.f32 %v6029_v47, %v2187_v5  ;;  %6040 = vpow2.f32 %v2247_v59 }
 0xc26   :  { %6042 = vpow2.f32 %v2253_v6 }
 0xc27   :  { %v2206_v35 = vmul.f32 %v6027_v39, %v2200_v56  ;;  %v2199_v45 = vadd.f32 1.4214138, %v2193_v23  ;;  %6044 = vpow2.f32 %v2251_v34 }
 0xc28   :  { %6046 = vpow2.f32 %v2257_v52 }
 0xc29   :  { %v2212_v44 = vadd.f32 -0.28449672, %v2206_v35  ;;  %v2205_v19 = vmul.f32 %v6029_v47, %v2199_v45  ;;  %6048 = vpow2.f32 %v2255_v48 }
 0xc2a   :  { %v6963_v4 = vpop.eup %6030 }
 0xc2b   :  { %v2218_v1 = vmul.f32 %v6027_v39, %v2212_v44  ;;  %v2184_v3 = vmul.f32 1.0614054, %v6963_v4  ;;  %v2211_v26 = vadd.f32 -0.28449672, %v2205_v19 }
 0xc2c   :  { %v6966_v30 = vpop.eup %6032 }
 0xc2d   :  { %v2224_v17 = vadd.f32 0.2548296, %v2218_v1  ;;  %v2190_v40 = vadd.f32 -1.4531521, %v2184_v3  ;;  %v2217_v31 = vmul.f32 %v6029_v47, %v2211_v26  ;;  %v2183_v37 = vmul.f32 1.0614054, %v6966_v30 }
 0xc2e   :  { %v6969_v9 = vpop.eup %6034 }
 0xc2f   :  { %v2230_v18 = vmul.f32 %v6027_v39, %v2224_v17  ;;  %v2196_v53 = vmul.f32 %v6963_v4, %v2190_v40  ;;  %v6037_v62 = vpop.eup %6036  ;;  %v2223_v43 = vadd.f32 0.2548296, %v2217_v31  ;;  %v2189_v51 = vadd.f32 -1.4531521, %v2183_v37 }
 0xc30   :  { %v2186_v59 = vmul.f32 1.0614054, %v6969_v9 }
 0xc31   :  { %v2260_v20 = vmul.f32 %v6037_v62, %v2230_v18  ;;  %v2202_v11 = vadd.f32 1.4214138, %v2196_v53  ;;  %v6973_v42 = vpop.eup %6038  ;;  %v2229_v10 = vmul.f32 %v6029_v47, %v2223_v43  ;;  %v2195_v5 = vmul.f32 %v6966_v30, %v2189_v51 }
 0xc32   :  { %v2192_v56 = vadd.f32 -1.4531521, %v2186_v59  ;;  %v6041_v23 = vpop.eup %6040  ;;  %v2185_v8 = vmul.f32 1.0614054, %v6973_v42  ;;  %v2140_v59 = vmul.f32 0.5, %v6927_v49 }
 0xc33   :  { %v2266_v39 = vsub.f32 1.0, %v2260_v20  ;;  %v2208_v13 = vmul.f32 %v6963_v4, %v2202_v11  ;;  %v2259_v35 = vmul.f32 %v6041_v23, %v2229_v10  ;;  %v2201_v0 = vadd.f32 1.4214138, %v2195_v5  ;;  %v6043_v52 = vpop.eup %6042 }
 0xc34   :  { %v2198_v45 = vmul.f32 %v6969_v9, %v2192_v56  ;;  %v2191_v6 = vadd.f32 -1.4531521, %v2185_v8 }
 0xc35   :  { %v2278_v44 = vsub.f32 0.0, %v2266_v39  ;;  %v2214_v19 = vadd.f32 -0.28449672, %v2208_v13  ;;  %v2265_v47 = vsub.f32 1.0, %v2259_v35  ;;  %v2207_v16 = vmul.f32 %v6966_v30, %v2201_v0  ;;  %v6045_v13 = vpop.eup %6044 }
 0xc36   :  { %v2204_v1 = vadd.f32 1.4214138, %v2198_v45  ;;  %v2197_v24 = vmul.f32 %v6973_v42, %v2191_v6  ;;  %v6047_v48 = vpop.eup %6046 }
 0xc37   :  { %v2284_v3 = vsel %vm2272_vm11, %v2278_v44, %v2266_v39  ;;  %v2220_v29 = vmul.f32 %v6963_v4, %v2214_v19  ;;  %v2277_v26 = vsub.f32 0.0, %v2265_v47  ;;  %v2213_v17 = vadd.f32 -0.28449672, %v2207_v16  ;;  %v6049_v6 = vpop.eup %6048 }
 0xc38   :  { %v2210_v40 = vmul.f32 %v6969_v9, %v2204_v1  ;;  %v2203_v37 = vadd.f32 1.4214138, %v2197_v24  ;;  %v2290_v34 = vadd.f32 1.0, %v2284_v3  ;;  %v2141_v24 = vmul.f32 0.5, %v6944_v61 }
 0xc39   :  { %v2226_v31 = vadd.f32 0.2548296, %v2220_v29  ;;  %v2283_v12 = vsel %vm2271_vm12, %v2277_v26, %v2265_v47  ;;  %v2219_v18 = vmul.f32 %v6966_v30, %v2213_v17  ;;  %v2142_v17 = vmul.f32 0.5, %v6939_v32  ;;  %v4960_v32 = vld [vmem:[#allocation2 + $0x140] ss:$0 sm:$0xff] }
 0xc3a   :  { %v2216_v53 = vadd.f32 -0.28449672, %v2210_v40  ;;  %v2289_v62 = vadd.f32 1.0, %v2283_v12  ;;  %v2209_v51 = vmul.f32 %v6973_v42, %v2203_v37  ;;  %v2296_v56 = vmul.f32 %v2290_v34, %v2140_v59 }
 0xc3b   :  { %v2232_v43 = vmul.f32 %v6963_v4, %v2226_v31  ;;  %v2225_v20 = vadd.f32 0.2548296, %v2219_v18  ;;  %v2143_v12 = vmul.f32 0.5, %v6956_v15  ;;  %v2144_v61 = vmul.f32 0.5, %v6950_v25 }
 0xc3c   :  { %v2222_v27 = vmul.f32 %v6969_v9, %v2216_v53  ;;  %v2295_v11 = vmul.f32 %v2289_v62, %v2139_v14  ;;  %v2215_v5 = vadd.f32 -0.28449672, %v2209_v51 }
 0xc3d   :  { %v2262_v10 = vmul.f32 %v6043_v52, %v2232_v43  ;;  %v2231_v23 = vmul.f32 %v6966_v30, %v2225_v20 }
 0xc3e   :  { %v2228_v39 = vadd.f32 0.2548296, %v2222_v27  ;;  %v2221_v8 = vmul.f32 %v6973_v42, %v2215_v5  ;;  %5622 = vmatprep.mubr.msk.f32.mxu0 %vm2305_vm13, %v2295_v11 }
 0xc3f   :  { %v2268_v57 = vsub.f32 1.0, %v2262_v10  ;;  %v2261_v4 = vmul.f32 %v6045_v13, %v2231_v23  ;;  %5623 = vmatmul.mubr.msk.f32.vlgmr.msra.gmra.mxu0 %vm2305_vm13, %v2296_v56 }
 0xc40   :  { %v2234_v49 = vmul.f32 %v6969_v9, %v2228_v39  ;;  %v2227_v0 = vadd.f32 0.2548296, %v2221_v8 }
 0xc41   :  { %v2280_v35 = vsub.f32 0.0, %v2268_v57  ;;  %v2267_v45 = vsub.f32 1.0, %v2261_v4 }
 0xc42   :  { %v2264_v44 = vmul.f32 %v6047_v48, %v2234_v49  ;;  %v2233_v19 = vmul.f32 %v6973_v42, %v2227_v0 }
 0xc43   :  { %v2286_v30 = vsel %vm2274_vm14, %v2280_v35, %v2268_v57  ;;  %v2279_v47 = vsub.f32 0.0, %v2267_v45 }
 0xc44   :  { %v2270_v16 = vsub.f32 1.0, %v2264_v44  ;;  %v2263_v1 = vmul.f32 %v6049_v6, %v2233_v19  ;;  %v2292_v3 = vadd.f32 1.0, %v2286_v30 }
 0xc45   :  { %v2285_v9 = vsel %vm2273_vm15, %v2279_v47, %v2267_v45 }
 0xc46   :  { %v2282_v29 = vsub.f32 0.0, %v2270_v16  ;;  %v2291_v26 = vadd.f32 1.0, %v2285_v9  ;;  %v2269_v38 = vsub.f32 1.0, %v2263_v1  ;;  %v2298_v37 = vmul.f32 %v2292_v3, %v2142_v17 }
 0xc48   :  { %v2288_v40 = vsel %vm2276_vm2, %v2282_v29, %v2270_v16  ;;  %v2297_v31 = vmul.f32 %v2291_v26, %v2141_v24  ;;  %v2281_v42 = vsub.f32 0.0, %v2269_v38 }
 0xc49   :  { %v2294_v34 = vadd.f32 1.0, %v2288_v40 }
 0xc4a   :  { %v2287_v2 = vsel %vm2275_vm3, %v2281_v42, %v2269_v38  ;;  %5625 = vmatprep.mubr.msk.f32.mxu0 %vm2305_vm13, %v2297_v31 }
 0xc4b   :  { %v2293_v18 = vadd.f32 1.0, %v2287_v2  ;;  %5626 = vmatmul.mubr.msk.f32.gmra.mxu0 %vm2305_vm13, %v2298_v37  ;;  %v2300_v53 = vmul.f32 %v2294_v34, %v2144_v61  ;;  %v2526_v61 = vld [vmem:[#allocation2 + $0x170] sm:$0xff] }
 0xc4c   :  { %5631 = vmatprep.subr.mxu1 %v2526_v61 }
 0xc4d   :  { %v2299_v63 = vmul.f32 %v2293_v18, %v2143_v12  ;;  %5632 = vmatpush3.msra.mxu1 %v2526_v61 }
 0xc4f   :  { %5628 = vmatprep.mubr.msk.f32.mxu0 %vm2305_vm13, %v2299_v63  ;;  %v2525_v63 = vld [vmem:[#allocation2 + $0x168] sm:$0xff] }
 0xc50   :  { %5629 = vmatmul.mubr.msk.f32.gmra.mxu0 %vm2305_vm13, %v2300_v53  ;;  %v2524_v53 = vld [vmem:[#allocation2 + $0x160] sm:$0xff]  ;;  %5633 = vmatprep.subr.mxu1 %v2525_v63 }
 0xc51   :  { %5634 = vmatpush3.msra.mxu1 %v2525_v63 }
 0xc52   :  { %5635 = vmatprep.subr.mxu1 %v2524_v53 }
 0xc53   :  { %5636 = vmatpush3.msra.mxu1 %v2524_v53 }
 0xcff   :  { %v5624_v52 = vpop.f32.mrf.mxu0 }
 0xd00   :  { %v2396_v36 = vadd.f32 %v5624_v52, %v4960_v32 }
 0xd01   :  { %v2390_v14 = vpop.f32.mrf.mxu0 }
 0xd02   :  { %v2420_v62 = vadd.f32 %v2396_v36, %v6901_v50  ;;  %v2391_v43 = vadd.f32 %v4960_v32, %v2390_v14 }
 0xd04   :  { %v2419_v15 = vadd.f32 %v2391_v43, %v6899_v7  ;;  %v2428_v51 = vsel %vm48_vm0, %v2420_v62, 0.0 }
 0xd05   :  { %2429 = vadd.xlane.f32.xlu0 %v2428_v51 }
 0xd06   :  { %v2425_v25 = vsel %vm48_vm0, %v2419_v15, 0.0 }
 0xd07   :  { %2426 = vadd.xlane.f32.xlu1 %v2425_v25 }
 0xd0b   :  { %v5627_v59 = vpop.f32.mrf.mxu0 }
 0xd0c   :  { %v2406_v20 = vadd.f32 %v5627_v59, %v4960_v32 }
 0xd0d   :  { %v2400_v27 = vpop.f32.mrf.mxu0 }
 0xd0e   :  { %v2422_v11 = vadd.f32 %v2406_v20, %v6917_v54  ;;  %v2401_v10 = vadd.f32 %v4960_v32, %v2400_v27 }
 0xd10   :  { %v2421_v5 = vadd.f32 %v2401_v10, %v6908_v22  ;;  %v5630_v56 = vpop.f32.mrf.mxu0  ;;  %v2434_v50 = vsel %vm48_vm0, %v2422_v11, 0.0 }
 0xd11   :  { %v2416_v23 = vadd.f32 %v5630_v56, %v4960_v32  ;;  %2435 = vadd.xlane.f32.xlu0 %v2434_v50 }
 0xd12   :  { %v2410_v7 = vpop.f32.mrf.mxu0  ;;  %v2431_v39 = vsel %vm48_vm0, %v2421_v5, 0.0 }
 0xd13   :  { %v2424_v13 = vadd.f32 %v2416_v23, %v6923_v58  ;;  %v2411_v57 = vadd.f32 %v4960_v32, %v2410_v7  ;;  %2432 = vadd.xlane.f32.xlu1 %v2431_v39  ;;  %v2523_v32 = vld [vmem:[#allocation2 + $0x158] sm:$0xff]  ;;  %v4967_v7 = vld [vmem:[#allocation2 + $0x148] ss:$0 sm:$0xff] }
 0xd14   :  { %5637 = vmatprep.subr.mxu1 %v2523_v32 }
 0xd15   :  { %v2423_v8 = vadd.f32 %v2411_v57, %v6914_v41  ;;  %v2440_v4 = vsel %vm48_vm0, %v2424_v13, 0.0  ;;  %5638 = vmatpush3.msra.mxu1 %v2523_v32 }
 0xd16   :  { %2441 = vadd.xlane.f32.xlu0 %v2440_v4 }
 0xd17   :  { %v2437_v54 = vsel %vm48_vm0, %v2423_v8, 0.0 }
 0xd18   :  { %2438 = vadd.xlane.f32.xlu1 %v2437_v54 }
 0xd8e   :  { %v2430_v22 = vpop.xlane.xlu0 %2429 }
 0xd8f   :  { %v2444_v49 = vmul.f32 0.03125, %v2430_v22  ;;  %v4968_v22 = vld [vmem:[#allocation2 + $0x150] ss:$0 sm:$0xff] }
 0xd90   :  { %v2427_v48 = vpop.xlane.xlu1 %2426 }
 0xd91   :  { %v7021_v35 = vsub.f32 %v2420_v62, %v2444_v49  ;;  %v2443_v0 = vmul.f32 0.03125, %v2427_v48 }
 0xd93   :  { %v7023_v45 = vsub.f32 %v2419_v15, %v2443_v0  ;;  %v2456_v58 = vmul.f32 %v7021_v35, %v7021_v35 }
 0xd95   :  { %v2464_v44 = vsel %vm48_vm0, %v2456_v58, 0.0  ;;  %v2455_v41 = vmul.f32 %v7023_v45, %v7023_v45 }
 0xd96   :  { %2465 = vadd.xlane.f32.xlu0 %v2464_v44 }
 0xd97   :  { %v2461_v30 = vsel %vm48_vm0, %v2455_v41, 0.0 }
 0xd98   :  { %2462 = vadd.xlane.f32.xlu1 %v2461_v30 }
 0xd9a   :  { %v2436_v19 = vpop.xlane.xlu0 %2435 }
 0xd9b   :  { %v2446_v6 = vmul.f32 0.03125, %v2436_v19 }
 0xd9c   :  { %v2433_v47 = vpop.xlane.xlu1 %2432 }
 0xd9d   :  { %v7031_v16 = vsub.f32 %v2422_v11, %v2446_v6  ;;  %v2445_v1 = vmul.f32 0.03125, %v2433_v47 }
 0xd9f   :  { %v7033_v3 = vsub.f32 %v2421_v5, %v2445_v1  ;;  %v2442_v9 = vpop.xlane.xlu0 %2441  ;;  %v2458_v29 = vmul.f32 %v7031_v16, %v7031_v16 }
 0xda0   :  { %v2448_v24 = vmul.f32 0.03125, %v2442_v9 }
 0xda1   :  { %v2439_v26 = vpop.xlane.xlu1 %2438  ;;  %v2470_v38 = vsel %vm48_vm0, %v2458_v29, 0.0  ;;  %v2457_v17 = vmul.f32 %v7033_v3, %v7033_v3 }
 0xda2   :  { %v7040_v40 = vsub.f32 %v2424_v13, %v2448_v24  ;;  %v2447_v31 = vmul.f32 0.03125, %v2439_v26  ;;  %2471 = vadd.xlane.f32.xlu0 %v2470_v38 }
 0xda3   :  { %v2467_v42 = vsel %vm48_vm0, %v2457_v17, 0.0  ;;  %v4969_v17 = vld [vmem:[#allocation2 + $0x178] ss:$0 sm:$0xff] }
 0xda4   :  { %v7043_v37 = vsub.f32 %v2423_v8, %v2447_v31  ;;  %2468 = vadd.xlane.f32.xlu1 %v2467_v42  ;;  %v2460_v34 = vmul.f32 %v7040_v40, %v7040_v40 }
 0xda6   :  { %v2476_v2 = vsel %vm48_vm0, %v2460_v34, 0.0  ;;  %v2459_v12 = vmul.f32 %v7043_v37, %v7043_v37 }
 0xda7   :  { %2477 = vadd.xlane.f32.xlu0 %v2476_v2 }
 0xda8   :  { %v2473_v18 = vsel %vm48_vm0, %v2459_v12, 0.0 }
 0xda9   :  { %2474 = vadd.xlane.f32.xlu1 %v2473_v18 }
 0xe1f   :  { %v2466_v52 = vpop.xlane.xlu0 %2465 }
 0xe20   :  { %v2480_v36 = vmul.f32 0.03125, %v2466_v52 }
 0xe21   :  { %v2463_v14 = vpop.xlane.xlu1 %2462 }
 0xe22   :  { %v2486_v62 = vadd.f32 1e-05, %v2480_v36  ;;  %v2479_v43 = vmul.f32 0.03125, %v2463_v14 }
 0xe24   :  { %6050 = vrsqrt.f32 %v2486_v62  ;;  %v2485_v15 = vadd.f32 1e-05, %v2479_v43 }
 0xe26   :  { %6052 = vrsqrt.f32 %v2485_v15 }
 0xe2b   :  { %v2472_v51 = vpop.xlane.xlu0 %2471 }
 0xe2c   :  { %v2482_v25 = vmul.f32 0.03125, %v2472_v51 }
 0xe2d   :  { %v2469_v59 = vpop.xlane.xlu1 %2468 }
 0xe2e   :  { %v2488_v20 = vadd.f32 1e-05, %v2482_v25  ;;  %v2481_v27 = vmul.f32 0.03125, %v2469_v59 }
 0xe30   :  { %6054 = vrsqrt.f32 %v2488_v20  ;;  %v2487_v11 = vadd.f32 1e-05, %v2481_v27  ;;  %v2478_v10 = vpop.xlane.xlu0 %2477 }
 0xe31   :  { %v6051_v5 = vpop.eup %6050  ;;  %v2484_v56 = vmul.f32 0.03125, %v2478_v10 }
 0xe32   :  { %v2498_v50 = vmul.f32 %v6051_v5, %v7021_v35  ;;  %6056 = vrsqrt.f32 %v2487_v11  ;;  %v2475_v23 = vpop.xlane.xlu1 %2474 }
 0xe33   :  { %v6053_v39 = vpop.eup %6052  ;;  %v2490_v13 = vadd.f32 1e-05, %v2484_v56  ;;  %v2483_v57 = vmul.f32 0.03125, %v2475_v23 }
 0xe34   :  { %v2497_v8 = vmul.f32 %v6053_v39, %v7023_v45  ;;  %v2508_v54 = vmul.f32 %v4967_v7, %v2498_v50 }
 0xe35   :  { %6058 = vrsqrt.f32 %v2490_v13  ;;  %v2489_v4 = vadd.f32 1e-05, %v2483_v57 }
 0xe36   :  { %v2507_v49 = vmul.f32 %v4967_v7, %v2497_v8  ;;  %v7055_v0 = vadd.f32 %v4968_v22, %v2508_v54 }
 0xe37   :  { %6060 = vrsqrt.f32 %v2489_v4 }
 0xe38   :  { %v7053_v48 = vadd.f32 %v4968_v22, %v2507_v49 }
 0xe3a   :  { %5639 = vmatprep.mubr.msk.f32.mxu1 %vm48_vm0, %v7053_v48 }
 0xe3b   :  { %5640 = vmatmul.mubr.msk.f32.vlgmr.msra.gmra.mxu1 %vm48_vm0, %v7055_v0 }
 0xe3d   :  { %v6055_v35 = vpop.eup %6054 }
 0xe3e   :  { %v2500_v58 = vmul.f32 %v6055_v35, %v7031_v16 }
 0xe3f   :  { %v6057_v45 = vpop.eup %6056 }
 0xe40   :  { %v2499_v44 = vmul.f32 %v6057_v45, %v7033_v3  ;;  %v2510_v41 = vmul.f32 %v4967_v7, %v2500_v58 }
 0xe42   :  { %v6059_v30 = vpop.eup %6058  ;;  %v2509_v19 = vmul.f32 %v4967_v7, %v2499_v44  ;;  %v7066_v9 = vadd.f32 %v4968_v22, %v2510_v41 }
 0xe43   :  { %v2502_v6 = vmul.f32 %v6059_v30, %v7040_v40 }
 0xe44   :  { %v6061_v47 = vpop.eup %6060  ;;  %v7064_v1 = vadd.f32 %v4968_v22, %v2509_v19 }
 0xe45   :  { %v2501_v29 = vmul.f32 %v6061_v47, %v7043_v37  ;;  %v2512_v24 = vmul.f32 %v4967_v7, %v2502_v6 }
 0xe46   :  { %5642 = vmatprep.mubr.msk.f32.mxu1 %vm48_vm0, %v7064_v1 }
 0xe47   :  { %5643 = vmatmul.mubr.msk.f32.gmra.mxu1 %vm48_vm0, %v7066_v9  ;;  %v2511_v16 = vmul.f32 %v4967_v7, %v2501_v29  ;;  %v7075_v26 = vadd.f32 %v4968_v22, %v2512_v24 }
 0xe49   :  { %v7073_v3 = vadd.f32 %v4968_v22, %v2511_v16 }
 0xe4b   :  { %5645 = vmatprep.mubr.msk.f32.mxu1 %vm48_vm0, %v7073_v3 }
 0xe4c   :  { %5646 = vmatmul.mubr.msk.f32.gmra.mxu1 %vm48_vm0, %v7075_v26 }
 0xefb   :  { %v5641_v38 = vpop.f32.mrf.mxu1 }
 0xefc   :  { %v7098_v53 = vadd.f32 %v5641_v38, %v4969_v17 }
 0xefd   :  { %v2639_v40 = vpop.f32.mrf.mxu1 }
 0xefe   :  { %v7081_v31 = vadd.f32 %v4969_v17, %v2639_v40  ;;  %v7141_v27 = vmul.f32 0.35355338, %v7098_v53 }
 0xf00   :  { %v7084_v42 = vmul.f32 0.35355338, %v7081_v31 }
 0xf02   :  { %5660 = vmatprep.mubr.msk.f32.mxu1 %vm364_vm1, %v7084_v42 }
 0xf07   :  { %v5644_v37 = vpop.f32.mrf.mxu1 }
 0xf08   :  { %v7094_v63 = vadd.f32 %v5644_v37, %v4969_v17 }
 0xf09   :  { %v2649_v34 = vpop.f32.mrf.mxu1 }
 0xf0a   :  { %v7102_v32 = vadd.f32 %v4969_v17, %v2649_v34  ;;  %v7151_v5 = vmul.f32 0.35355338, %v7094_v63 }
 0xf0c   :  { %v5647_v2 = vpop.f32.mrf.mxu1  ;;  %v7144_v10 = vmul.f32 0.35355338, %v7102_v32 }
 0xf0d   :  { %v7088_v12 = vadd.f32 %v5647_v2, %v4969_v17 }
 0xf0e   :  { %v2659_v18 = vpop.f32.mrf.mxu1 }
 0xf0f   :  { %v7090_v61 = vadd.f32 %v4969_v17, %v2659_v18  ;;  %2690 = vrot.lane.b32.xlu1 %v7088_v12, %s6243_s0  ;;  %v7161_v23 = vmul.f32 0.35355338, %v7088_v12 }
 0xf11   :  { %2688 = vrot.lane.b32.xlu0 %v7090_v61, %s6243_s0  ;;  %v7154_v50 = vmul.f32 0.35355338, %v7090_v61 }
 0xf13   :  { %2686 = vrot.lane.b32.xlu1 %v7094_v63, %s6243_s0 }
 0xf15   :  { %2682 = vrot.lane.b32.xlu0 %v7098_v53, %s6243_s0 }
 0xf17   :  { %2684 = vrot.lane.b32.xlu1 %v7102_v32, %s6243_s0 }
 0xf19   :  { %3036 = vrot.lane.b32.xlu0 %v7088_v12, %s6245_s28 }
 0xf1b   :  { %2680 = vrot.lane.b32.xlu1 %v7081_v31, %s6243_s0 }
 0xf1d   :  { %2885 = vrot.lane.b32.xlu0 %v7090_v61, %s6244_s27 }
 0xf1f   :  { %2887 = vrot.lane.b32.xlu1 %v7088_v12, %s6244_s27 }
 0xf21   :  { %3032 = vrot.lane.b32.xlu0 %v7094_v63, %s6245_s28 }
 0xf23   :  { %2883 = vrot.lane.b32.xlu1 %v7094_v63, %s6244_s27 }
 0xf27   :  { %2881 = vrot.lane.b32.xlu1 %v7102_v32, %s6244_s27 }
 0xf2b   :  { %2879 = vrot.lane.b32.xlu1 %v7098_v53, %s6244_s27 }
 0xf2f   :  { %2877 = vrot.lane.b32.xlu1 %v7081_v31, %s6244_s27 }
 0xf81   :  { %v2691_v52 = vpop.permute.xlu1 %2690 }
 0xf82   :  { %5648 = vmatprep.subr.msk.mxu1 %vm364_vm1, %v2691_v52 }
 0xf83   :  { %5649 = vmatpush3.xpose.msk.msra.mxu1 %vm364_vm1, %v2691_v52  ;;  %v2689_v36 = vpop.permute.xlu0 %2688 }
 0xf84   :  { %5650 = vmatprep.subr.msk.mxu1 %vm364_vm1, %v2689_v36 }
 0xf85   :  { %v2687_v14 = vpop.permute.xlu1 %2686 }
 0xf87   :  { %5651 = vmatpush3.xpose.msk.msra.mxu1 %vm364_vm1, %v2689_v36  ;;  %v2683_v62 = vpop.permute.xlu0 %2682 }
 0xf88   :  { %5652 = vmatprep.subr.msk.mxu1 %vm364_vm1, %v2687_v14 }
 0xf89   :  { %v2685_v43 = vpop.permute.xlu1 %2684 }
 0xf8b   :  { %5653 = vmatpush3.xpose.msk.msra.mxu1 %vm364_vm1, %v2687_v14  ;;  %v7133_v15 = vpop.permute.xlu0 %3036 }
 0xf8c   :  { %5654 = vmatprep.subr.msk.mxu1 %vm364_vm1, %v2685_v43 }
 0xf8d   :  { %v2681_v51 = vpop.permute.xlu1 %2680 }
 0xf8f   :  { %5655 = vmatpush3.xpose.msk.msra.mxu1 %vm364_vm1, %v2685_v43  ;;  %v2886_v59 = vpop.permute.xlu0 %2885 }
 0xf90   :  { %5656 = vmatprep.subr.msk.mxu1 %vm364_vm1, %v2683_v62 }
 0xf91   :  { %v2888_v25 = vpop.permute.xlu1 %2887 }
 0xf92   :  { %5669 = vmatprep.subr.mxu0 %v2888_v25 }
 0xf93   :  { %5657 = vmatpush3.xpose.msk.msra.mxu1 %vm364_vm1, %v2683_v62  ;;  %5670 = vmatpush3.msra.mxu0 %v2888_v25  ;;  %v3033_v24 = vpop.permute.xlu0 %3032 }
 0xf94   :  { %5658 = vmatprep.subr.msk.mxu1 %vm364_vm1, %v2681_v51  ;;  %5671 = vmatprep.subr.mxu0 %v2886_v59 }
 0xf95   :  { %v2884_v20 = vpop.permute.xlu1 %2883  ;;  %5672 = vmatpush3.msra.mxu0 %v2886_v59 }
 0xf96   :  { %5673 = vmatprep.subr.mxu0 %v2884_v20 }
 0xf97   :  { %5659 = vmatpush3.xpose.msk.msra.mxu1 %vm364_vm1, %v2681_v51  ;;  %5674 = vmatpush3.msra.mxu0 %v2884_v20 }
 0xf99   :  { %v2882_v11 = vpop.permute.xlu1 %2881 }
 0xf9a   :  { %5661 = vmatmul.mubr.msk.f32.vlgmr.msra.gmra.mxu1 %vm364_vm1, %v7141_v27  ;;  %5675 = vmatprep.subr.mxu0 %v2882_v11 }
 0xf9b   :  { %5663 = vmatprep.mubr.msk.f32.mxu1 %vm364_vm1, %v7144_v10  ;;  %5676 = vmatpush3.msra.mxu0 %v2882_v11 }
 0xf9d   :  { %v2880_v56 = vpop.permute.xlu1 %2879 }
 0xf9e   :  { %5664 = vmatmul.mubr.msk.f32.gmra.mxu1 %vm364_vm1, %v7151_v5  ;;  %5677 = vmatprep.subr.mxu0 %v2880_v56 }
 0xf9f   :  { %5666 = vmatprep.mubr.msk.f32.mxu1 %vm364_vm1, %v7154_v50  ;;  %5678 = vmatpush3.msra.mxu0 %v2880_v56 }
 0xfa1   :  { %v2878_v7 = vpop.permute.xlu1 %2877 }
 0xfa2   :  { %5667 = vmatmul.mubr.msk.f32.gmra.mxu1 %vm364_vm1, %v7161_v23  ;;  %5679 = vmatprep.subr.mxu0 %v2878_v7 }
 0xfa3   :  { %5680 = vmatpush3.msra.mxu0 %v2878_v7 }
 0xfa4   :  { %5690 = vmatprep.subr.msk.mxu0 %vm364_vm1, %v7133_v15 }
0x105a   :  { %v5662_v39 = vpop.f32.mrf.mxu1 }
0x105b   :  { %v2794_v13 = vadd.f32 %v5662_v39, %v6413_v21 }
0x105c   :  { %v2788_v57 = vpop.f32.mrf.mxu1 }
0x105d   :  { %v2789_v8 = vadd.f32 %v2788_v57, %v6415_v28  ;;  %v2820_v4 = vsel %vm490_vm5, %v2794_v13, -inf }
0x105e   :  { %2821 = vmax.xlane.f32.xlu1 %v2820_v4  ;;  %v5665_v54 = vpop.f32.mrf.mxu1 }
0x105f   :  { %v2804_v22 = vadd.f32 %v5665_v54, %v6418_v33  ;;  %v2817_v49 = vsel %vm490_vm5, %v2789_v8, -inf }
0x1060   :  { %v2798_v35 = vpop.f32.mrf.mxu1  ;;  %2818 = vmax.xlane.f32.xlu0 %v2817_v49 }
0x1061   :  { %v2799_v58 = vadd.f32 %v2798_v35, %v6424_v46  ;;  %v2826_v45 = vsel %vm490_vm5, %v2804_v22, -inf }
0x1062   :  { %v5668_v44 = vpop.f32.mrf.mxu1 }
0x1063   :  { %v2814_v41 = vadd.f32 %v5668_v44, %v6428_v55  ;;  %v2823_v30 = vsel %vm490_vm5, %v2799_v58, -inf }
0x1064   :  { %2827 = vmax.xlane.f32.xlu0 %v2826_v45  ;;  %v2808_v19 = vpop.f32.mrf.mxu1 }
0x1065   :  { %v2809_v6 = vadd.f32 %v2808_v19, %v6432_v60  ;;  %v2832_v47 = vsel %vm490_vm5, %v2814_v41, -inf }
0x1067   :  { %v2829_v29 = vsel %vm490_vm5, %v2809_v6, -inf }
0x1068   :  { %2824 = vmax.xlane.f32.xlu0 %v2823_v30 }
0x106c   :  { %2833 = vmax.xlane.f32.xlu0 %v2832_v47 }
0x106f   :  { %3034 = vrot.lane.b32.xlu1 %v7090_v61, %s6245_s28 }
0x1070   :  { %2830 = vmax.xlane.f32.xlu0 %v2829_v29 }
0x1073   :  { %3030 = vrot.lane.b32.xlu1 %v7102_v32, %s6245_s28 }
0x1077   :  { %3026 = vrot.lane.b32.xlu1 %v7081_v31, %s6245_s28 }
0x107b   :  { %3016 = vrot.lane.b32.xlu1 %v7141_v27, %s6247_s29 }
0x107f   :  { %3020 = vrot.lane.b32.xlu1 %v7151_v5, %s6247_s29 }
0x1083   :  { %3024 = vrot.lane.b32.xlu1 %v7161_v23, %s6247_s29 }
0x1086   :  { %3028 = vrot.lane.b32.xlu0 %v7098_v53, %s6245_s28 }
0x1087   :  { %3227 = vrot.lane.b32.xlu1 %v7088_v12, %s6248_s30 }
0x108a   :  { %3014 = vrot.lane.b32.xlu0 %v7084_v42, %s6247_s29 }
0x108b   :  { %3223 = vrot.lane.b32.xlu1 %v7094_v63, %s6248_s30 }
0x108e   :  { %3018 = vrot.lane.b32.xlu0 %v7144_v10, %s6247_s29 }
0x108f   :  { %3221 = vrot.lane.b32.xlu1 %v7102_v32, %s6248_s30 }
0x1092   :  { %3022 = vrot.lane.b32.xlu0 %v7154_v50, %s6247_s29 }
0x1093   :  { %3219 = vrot.lane.b32.xlu1 %v7098_v53, %s6248_s30 }
0x1096   :  { %3225 = vrot.lane.b32.xlu0 %v7090_v61, %s6248_s30 }
0x1097   :  { %3217 = vrot.lane.b32.xlu1 %v7081_v31, %s6248_s30 }
0x109a   :  { %3376 = vrot.lane.b32.xlu0 %v7088_v12, %s6249_s3 }
0x109e   :  { %3372 = vrot.lane.b32.xlu0 %v7094_v63, %s6249_s3 }
0x10e7   :  { %v2822_v16 = vpop.xlane.xlu1 %2821 }
0x10e8   :  { %v2836_v38 = vsub.f32 %v2794_v13, %v2822_v16 }
0x10e9   :  { %v2819_v17 = vpop.xlane.xlu0 %2818 }
0x10ea   :  { %v2835_v40 = vsub.f32 %v2789_v8, %v2819_v17  ;;  %v2843_v37 = vmul.f32 1.442695, %v2836_v38 }
0x10eb   :  { %v3035_v34 = vpop.permute.xlu1 %3034 }
0x10ec   :  { %v2841_v2 = vmul.f32 1.442695, %v2835_v40 }
0x10ed   :  { %v2828_v18 = vpop.xlane.xlu0 %2827 }
0x10ee   :  { %6062 = vpow2.f32 %v2841_v2  ;;  %v2838_v52 = vsub.f32 %v2804_v22, %v2828_v18 }
0x10ef   :  { %6064 = vpow2.f32 %v2843_v37  ;;  %v3031_v36 = vpop.permute.xlu1 %3030 }
0x10f0   :  { %v2847_v43 = vmul.f32 1.442695, %v2838_v52 }
0x10f1   :  { %v2825_v14 = vpop.xlane.xlu0 %2824 }
0x10f2   :  { %v2837_v62 = vsub.f32 %v2799_v58, %v2825_v14 }
0x10f3   :  { %v3027_v51 = vpop.permute.xlu1 %3026 }
0x10f4   :  { %v2845_v25 = vmul.f32 1.442695, %v2837_v62 }
0x10f5   :  { %v2834_v59 = vpop.xlane.xlu0 %2833 }
0x10f6   :  { %6066 = vpow2.f32 %v2845_v25  ;;  %v2840_v20 = vsub.f32 %v2814_v41, %v2834_v59 }
0x10f7   :  { %6068 = vpow2.f32 %v2847_v43  ;;  %v3017_v11 = vpop.permute.xlu1 %3016 }
0x10f8   :  { %v2851_v13 = vmul.f32 1.442695, %v2840_v20 }
0x10f9   :  { %v2831_v56 = vpop.xlane.xlu0 %2830 }
0x10fa   :  { %v2839_v7 = vsub.f32 %v2809_v6, %v2831_v56 }
0x10fb   :  { %v7215_v39 = vpop.eup %6062  ;;  %v3021_v57 = vpop.permute.xlu1 %3020 }
0x10fc   :  { %v7217_v8 = vpop.eup %6064  ;;  %v2849_v4 = vmul.f32 1.442695, %v2839_v7  ;;  %5681 = vmatprep.mubr.msk.f32.mxu0 %vm490_vm5, %v7215_v39 }
0x10fd   :  { %5682 = vmatmul.mubr.msk.f32.vlgmr.msra.gmra.mxu0 %vm490_vm5, %v7217_v8  ;;  %v3029_v54 = vpop.permute.xlu0 %3028 }
0x10fe   :  { %6070 = vpow2.f32 %v2849_v4  ;;  %5691 = vmatpush3.xpose.msk.msra.mxu0 %vm364_vm1, %v7133_v15 }
0x10ff   :  { %6072 = vpow2.f32 %v2851_v13  ;;  %5692 = vmatprep.subr.msk.mxu0 %vm364_vm1, %v3035_v34  ;;  %v3025_v22 = vpop.permute.xlu1 %3024 }
0x1101   :  { %v3015_v49 = vpop.permute.xlu0 %3014 }
0x1102   :  { %5693 = vmatpush3.xpose.msk.msra.mxu0 %vm364_vm1, %v3035_v34 }
0x1103   :  { %v7227_v35 = vpop.eup %6066  ;;  %5694 = vmatprep.subr.msk.mxu0 %vm364_vm1, %v3033_v24  ;;  %v3228_v58 = vpop.permute.xlu1 %3227 }
0x1104   :  { %v7230_v45 = vpop.eup %6068  ;;  %5684 = vmatprep.mubr.msk.f32.mxu0 %vm490_vm5, %v7227_v35  ;;  %5711 = vmatprep.subr.mxu1 %v3228_v58 }
0x1105   :  { %5685 = vmatmul.mubr.msk.f32.gmra.mxu0 %vm490_vm5, %v7230_v45  ;;  %5712 = vmatpush3.msra.mxu1 %v3228_v58  ;;  %v3019_v15 = vpop.permute.xlu0 %3018 }
0x1106   :  { %5695 = vmatpush3.xpose.msk.msra.mxu0 %vm364_vm1, %v3033_v24 }
0x1107   :  { %5696 = vmatprep.subr.msk.mxu0 %vm364_vm1, %v3031_v36  ;;  %v3224_v44 = vpop.permute.xlu1 %3223 }
0x1109   :  { %v3023_v41 = vpop.permute.xlu0 %3022 }
0x110a   :  { %5697 = vmatpush3.xpose.msk.msra.mxu0 %vm364_vm1, %v3031_v36 }
0x110b   :  { %v7239_v30 = vpop.eup %6070  ;;  %5698 = vmatprep.subr.msk.mxu0 %vm364_vm1, %v3029_v54  ;;  %v3222_v19 = vpop.permute.xlu1 %3221 }
0x110c   :  { %v7242_v6 = vpop.eup %6072  ;;  %5687 = vmatprep.mubr.msk.f32.mxu0 %vm490_vm5, %v7239_v30 }
0x110d   :  { %5688 = vmatmul.mubr.msk.f32.gmra.mxu0 %vm490_vm5, %v7242_v6  ;;  %v3226_v47 = vpop.permute.xlu0 %3225 }
0x110e   :  { %5699 = vmatpush3.xpose.msk.msra.mxu0 %vm364_vm1, %v3029_v54  ;;  %5702 = vmatprep.mubr.msk.f32.mxu0 %vm364_vm1, %v3015_v49 }
0x110f   :  { %5700 = vmatprep.subr.msk.mxu0 %vm364_vm1, %v3027_v51  ;;  %5713 = vmatprep.subr.mxu1 %v3226_v47  ;;  %v3220_v29 = vpop.permute.xlu1 %3219 }
0x1110   :  { %5714 = vmatpush3.msra.mxu1 %v3226_v47 }
0x1111   :  { %5715 = vmatprep.subr.mxu1 %v3224_v44  ;;  %v7254_v16 = vpop.permute.xlu0 %3376 }
0x1112   :  { %5701 = vmatpush3.xpose.msk.msra.mxu0 %vm364_vm1, %v3027_v51  ;;  %5716 = vmatpush3.msra.mxu1 %v3224_v44 }
0x1113   :  { %5717 = vmatprep.subr.mxu1 %v3222_v19  ;;  %v3218_v24 = vpop.permute.xlu1 %3217 }
0x1114   :  { %5718 = vmatpush3.msra.mxu1 %v3222_v19 }
0x1115   :  { %5703 = vmatmul.mubr.msk.f32.vlgmr.msra.gmra.mxu0 %vm364_vm1, %v3017_v11  ;;  %5719 = vmatprep.subr.mxu1 %v3220_v29  ;;  %v3373_v49 = vpop.permute.xlu0 %3372 }
0x1116   :  { %5705 = vmatprep.mubr.msk.f32.mxu0 %vm364_vm1, %v3019_v15  ;;  %5720 = vmatpush3.msra.mxu1 %v3220_v29 }
0x1117   :  { %5721 = vmatprep.subr.mxu1 %v3218_v24 }
0x1118   :  { %5722 = vmatpush3.msra.mxu1 %v3218_v24 }
0x1119   :  { %5706 = vmatmul.mubr.msk.f32.gmra.mxu0 %vm364_vm1, %v3021_v57  ;;  %5732 = vmatprep.subr.msk.mxu1 %vm364_vm1, %v7254_v16 }
0x111a   :  { %5708 = vmatprep.mubr.msk.f32.mxu0 %vm364_vm1, %v3023_v41 }
0x111d   :  { %5709 = vmatmul.mubr.msk.f32.gmra.mxu0 %vm364_vm1, %v3025_v22 }
0x11bd   :  { %v7261_v38 = vpop.f32.mrf.mxu0 }
0x11bf   :  { %v7263_v17 = vpop.f32.mrf.mxu0 }
0x11c5   :  { %v7265_v40 = vpop.f32.mrf.mxu0 }
0x11c7   :  { %v7267_v37 = vpop.f32.mrf.mxu0 }
0x11cd   :  { %v7269_v34 = vpop.f32.mrf.mxu0 }
0x11cf   :  { %v7271_v2 = vpop.f32.mrf.mxu0 }
0x11d5   :  { %v5704_v18 = vpop.f32.mrf.mxu0 }
0x11d6   :  { %v3134_v52 = vadd.f32 %v5704_v18, %v6413_v21 }
0x11d7   :  { %v3128_v36 = vpop.f32.mrf.mxu0 }
0x11d8   :  { %v3129_v14 = vadd.f32 %v3128_v36, %v6415_v28  ;;  %v3160_v62 = vsel %vm490_vm5, %v3134_v52, -inf }
0x11d9   :  { %3161 = vmax.xlane.f32.xlu1 %v3160_v62  ;;  %v5707_v43 = vpop.f32.mrf.mxu0 }
0x11da   :  { %v3144_v51 = vadd.f32 %v5707_v43, %v6418_v33  ;;  %v3157_v25 = vsel %vm490_vm5, %v3129_v14, -inf }
0x11db   :  { %3158 = vmax.xlane.f32.xlu0 %v3157_v25  ;;  %v3138_v59 = vpop.f32.mrf.mxu0 }
0x11dc   :  { %v3139_v20 = vadd.f32 %v3138_v59, %v6424_v46  ;;  %v3166_v11 = vsel %vm490_vm5, %v3144_v51, -inf }
0x11dd   :  { %v5710_v56 = vpop.f32.mrf.mxu0 }
0x11de   :  { %v3154_v7 = vadd.f32 %v5710_v56, %v6428_v55  ;;  %v3163_v13 = vsel %vm490_vm5, %v3139_v20, -inf }
0x11df   :  { %3167 = vmax.xlane.f32.xlu0 %v3166_v11  ;;  %v3148_v57 = vpop.f32.mrf.mxu0 }
0x11e0   :  { %v3149_v4 = vadd.f32 %v3148_v57, %v6432_v60  ;;  %v3172_v54 = vsel %vm490_vm5, %v3154_v7, -inf }
0x11e2   :  { %v3169_v22 = vsel %vm490_vm5, %v3149_v4, -inf }
0x11e3   :  { %3164 = vmax.xlane.f32.xlu0 %v3163_v13 }
0x11e7   :  { %3173 = vmax.xlane.f32.xlu0 %v3172_v54 }
0x11ea   :  { %3374 = vrot.lane.b32.xlu1 %v7090_v61, %s6249_s3 }
0x11eb   :  { %3170 = vmax.xlane.f32.xlu0 %v3169_v22 }
0x11ee   :  { %3370 = vrot.lane.b32.xlu1 %v7102_v32, %s6249_s3 }
0x11f2   :  { %3366 = vrot.lane.b32.xlu1 %v7081_v31, %s6249_s3 }
0x11f6   :  { %3356 = vrot.lane.b32.xlu1 %v7141_v27, %s6250_s4 }
0x11fa   :  { %3360 = vrot.lane.b32.xlu1 %v7151_v5, %s6250_s4 }
0x11fe   :  { %3364 = vrot.lane.b32.xlu1 %v7161_v23, %s6250_s4 }
0x1201   :  { %3368 = vrot.lane.b32.xlu0 %v7098_v53, %s6249_s3 }
0x1202   :  { %3567 = vrot.lane.b32.xlu1 %v7088_v12, %s6251_s5 }
0x1205   :  { %3354 = vrot.lane.b32.xlu0 %v7084_v42, %s6250_s4 }
0x1206   :  { %3563 = vrot.lane.b32.xlu1 %v7094_v63, %s6251_s5 }
0x1209   :  { %3358 = vrot.lane.b32.xlu0 %v7144_v10, %s6250_s4 }
0x120a   :  { %3561 = vrot.lane.b32.xlu1 %v7102_v32, %s6251_s5 }
0x120d   :  { %3362 = vrot.lane.b32.xlu0 %v7154_v50, %s6250_s4 }
0x120e   :  { %3559 = vrot.lane.b32.xlu1 %v7098_v53, %s6251_s5 }
0x1211   :  { %3565 = vrot.lane.b32.xlu0 %v7090_v61, %s6251_s5 }
0x1212   :  { %3557 = vrot.lane.b32.xlu1 %v7081_v31, %s6251_s5 }
0x1215   :  { %3716 = vrot.lane.b32.xlu0 %v7088_v12, %s6252_s6 }
0x1219   :  { %3712 = vrot.lane.b32.xlu0 %v7094_v63, %s6252_s6 }
0x1262   :  { %v3162_v58 = vpop.xlane.xlu1 %3161 }
0x1263   :  { %v3176_v15 = vsub.f32 %v3134_v52, %v3162_v58 }
0x1264   :  { %v3159_v44 = vpop.xlane.xlu0 %3158 }
0x1265   :  { %v3175_v41 = vsub.f32 %v3129_v14, %v3159_v44  ;;  %v3183_v19 = vmul.f32 1.442695, %v3176_v15 }
0x1266   :  { %v3375_v47 = vpop.permute.xlu1 %3374 }
0x1267   :  { %v3181_v29 = vmul.f32 1.442695, %v3175_v41 }
0x1268   :  { %v3168_v24 = vpop.xlane.xlu0 %3167 }
0x1269   :  { %6074 = vpow2.f32 %v3181_v29  ;;  %v3178_v18 = vsub.f32 %v3144_v51, %v3168_v24 }
0x126a   :  { %6076 = vpow2.f32 %v3183_v19  ;;  %v3371_v36 = vpop.permute.xlu1 %3370 }
0x126b   :  { %v3187_v25 = vmul.f32 1.442695, %v3178_v18 }
0x126c   :  { %v3165_v62 = vpop.xlane.xlu0 %3164 }
0x126d   :  { %v3177_v43 = vsub.f32 %v3139_v20, %v3165_v62 }
0x126e   :  { %v3367_v59 = vpop.permute.xlu1 %3366 }
0x126f   :  { %v3185_v11 = vmul.f32 1.442695, %v3177_v43 }
0x1270   :  { %v3174_v56 = vpop.xlane.xlu0 %3173 }
0x1271   :  { %6078 = vpow2.f32 %v3185_v11  ;;  %v3180_v13 = vsub.f32 %v3154_v7, %v3174_v56 }
0x1272   :  { %6080 = vpow2.f32 %v3187_v25  ;;  %v3357_v52 = vpop.permute.xlu1 %3356 }
0x1273   :  { %v3191_v22 = vmul.f32 1.442695, %v3180_v13 }
0x1274   :  { %v3171_v57 = vpop.xlane.xlu0 %3170 }
0x1275   :  { %v3179_v14 = vsub.f32 %v3149_v4, %v3171_v57 }
0x1276   :  { %v7321_v54 = vpop.eup %6074  ;;  %v3361_v58 = vpop.permute.xlu1 %3360 }
0x1277   :  { %v7323_v15 = vpop.eup %6076  ;;  %v3189_v51 = vmul.f32 1.442695, %v3179_v14  ;;  %5723 = vmatprep.mubr.msk.f32.mxu1 %vm490_vm5, %v7321_v54 }
0x1278   :  { %5724 = vmatmul.mubr.msk.f32.vlgmr.msra.gmra.mxu1 %vm490_vm5, %v7323_v15  ;;  %v3369_v20 = vpop.permute.xlu0 %3368 }
0x1279   :  { %6082 = vpow2.f32 %v3189_v51  ;;  %5733 = vmatpush3.xpose.msk.msra.mxu1 %vm364_vm1, %v7254_v16 }
0x127a   :  { %6084 = vpow2.f32 %v3191_v22  ;;  %5734 = vmatprep.subr.msk.mxu1 %vm364_vm1, %v3375_v47  ;;  %v3365_v7 = vpop.permute.xlu1 %3364 }
0x127c   :  { %v3355_v4 = vpop.permute.xlu0 %3354 }
0x127d   :  { %5735 = vmatpush3.xpose.msk.msra.mxu1 %vm364_vm1, %v3375_v47 }
0x127e   :  { %v7333_v44 = vpop.eup %6078  ;;  %5736 = vmatprep.subr.msk.mxu1 %vm364_vm1, %v3373_v49  ;;  %v3568_v41 = vpop.permute.xlu1 %3567 }
0x127f   :  { %v7336_v19 = vpop.eup %6080  ;;  %5726 = vmatprep.mubr.msk.f32.mxu1 %vm490_vm5, %v7333_v44  ;;  %5753 = vmatprep.subr.mxu0 %v3568_v41 }
0x1280   :  { %5727 = vmatmul.mubr.msk.f32.gmra.mxu1 %vm490_vm5, %v7336_v19  ;;  %5754 = vmatpush3.msra.mxu0 %v3568_v41  ;;  %v3359_v16 = vpop.permute.xlu0 %3358 }
0x1281   :  { %5737 = vmatpush3.xpose.msk.msra.mxu1 %vm364_vm1, %v3373_v49 }
0x1282   :  { %5738 = vmatprep.subr.msk.mxu1 %vm364_vm1, %v3371_v36  ;;  %v3564_v47 = vpop.permute.xlu1 %3563 }
0x1284   :  { %v3363_v29 = vpop.permute.xlu0 %3362 }
0x1285   :  { %5739 = vmatpush3.xpose.msk.msra.mxu1 %vm364_vm1, %v3371_v36 }
0x1286   :  { %v7345_v24 = vpop.eup %6082  ;;  %5740 = vmatprep.subr.msk.mxu1 %vm364_vm1, %v3369_v20  ;;  %v3562_v18 = vpop.permute.xlu1 %3561 }
0x1287   :  { %v7348_v62 = vpop.eup %6084  ;;  %5729 = vmatprep.mubr.msk.f32.mxu1 %vm490_vm5, %v7345_v24 }
0x1288   :  { %5730 = vmatmul.mubr.msk.f32.gmra.mxu1 %vm490_vm5, %v7348_v62  ;;  %v3566_v49 = vpop.permute.xlu0 %3565 }
0x1289   :  { %5741 = vmatpush3.xpose.msk.msra.mxu1 %vm364_vm1, %v3369_v20  ;;  %5744 = vmatprep.mubr.msk.f32.mxu1 %vm364_vm1, %v3355_v4 }
0x128a   :  { %5742 = vmatprep.subr.msk.mxu1 %vm364_vm1, %v3367_v59  ;;  %5755 = vmatprep.subr.mxu0 %v3566_v49  ;;  %v3560_v36 = vpop.permute.xlu1 %3559 }
0x128b   :  { %5756 = vmatpush3.msra.mxu0 %v3566_v49 }
0x128c   :  { %5757 = vmatprep.subr.mxu0 %v3564_v47  ;;  %v7360_v25 = vpop.permute.xlu0 %3716 }
0x128d   :  { %5743 = vmatpush3.xpose.msk.msra.mxu1 %vm364_vm1, %v3367_v59  ;;  %5758 = vmatpush3.msra.mxu0 %v3564_v47 }
0x128e   :  { %5759 = vmatprep.subr.mxu0 %v3562_v18  ;;  %v3558_v43 = vpop.permute.xlu1 %3557 }
0x128f   :  { %5760 = vmatpush3.msra.mxu0 %v3562_v18 }
0x1290   :  { %5745 = vmatmul.mubr.msk.f32.vlgmr.msra.gmra.mxu1 %vm364_vm1, %v3357_v52  ;;  %5761 = vmatprep.subr.mxu0 %v3560_v36 }
0x1291   :  { %5747 = vmatprep.mubr.msk.f32.mxu1 %vm364_vm1, %v3359_v16  ;;  %5762 = vmatpush3.msra.mxu0 %v3560_v36 }
0x1292   :  { %5763 = vmatprep.subr.mxu0 %v3558_v43 }
0x1293   :  { %5764 = vmatpush3.msra.mxu0 %v3558_v43 }
0x1294   :  { %5748 = vmatmul.mubr.msk.f32.gmra.mxu1 %vm364_vm1, %v3361_v58  ;;  %5774 = vmatprep.subr.msk.mxu0 %vm364_vm1, %v7360_v25 }
0x1295   :  { %5750 = vmatprep.mubr.msk.f32.mxu1 %vm364_vm1, %v3363_v29 }
0x1298   :  { %5751 = vmatmul.mubr.msk.f32.gmra.mxu1 %vm364_vm1, %v3365_v7 }
0x1338   :  { %v7367_v59 = vpop.f32.mrf.mxu1 }
0x133a   :  { %v7369_v11 = vpop.f32.mrf.mxu1 }
0x1340   :  { %v7371_v56 = vpop.f32.mrf.mxu1 }
0x1342   :  { %v7373_v13 = vpop.f32.mrf.mxu1 }
0x1348   :  { %v7375_v52 = vpop.f32.mrf.mxu1 }
0x134a   :  { %v7377_v57 = vpop.f32.mrf.mxu1 }
0x1350   :  { %v5746_v14 = vpop.f32.mrf.mxu1 }
0x1351   :  { %v3474_v22 = vadd.f32 %v5746_v14, %v6413_v21 }
0x1352   :  { %v3468_v58 = vpop.f32.mrf.mxu1 }
0x1353   :  { %v3469_v51 = vadd.f32 %v3468_v58, %v6415_v28  ;;  %v3500_v20 = vsel %vm490_vm5, %v3474_v22, -inf }
0x1354   :  { %3501 = vmax.xlane.f32.xlu1 %v3500_v20  ;;  %v5749_v7 = vpop.f32.mrf.mxu1 }
0x1355   :  { %v3484_v4 = vadd.f32 %v5749_v7, %v6418_v33  ;;  %v3497_v41 = vsel %vm490_vm5, %v3469_v51, -inf }
0x1356   :  { %3498 = vmax.xlane.f32.xlu0 %v3497_v41  ;;  %v3478_v16 = vpop.f32.mrf.mxu1 }
0x1357   :  { %v3479_v47 = vadd.f32 %v3478_v16, %v6424_v46  ;;  %v3506_v29 = vsel %vm490_vm5, %v3484_v4, -inf }
0x1358   :  { %v5752_v18 = vpop.f32.mrf.mxu1 }
0x1359   :  { %v3494_v49 = vadd.f32 %v5752_v18, %v6428_v55  ;;  %v3503_v36 = vsel %vm490_vm5, %v3479_v47, -inf }
0x135a   :  { %3507 = vmax.xlane.f32.xlu0 %v3506_v29  ;;  %v3488_v43 = vpop.f32.mrf.mxu1 }
0x135b   :  { %v3489_v14 = vadd.f32 %v3488_v43, %v6432_v60  ;;  %v3512_v58 = vsel %vm490_vm5, %v3494_v49, -inf }
0x135d   :  { %v3509_v20 = vsel %vm490_vm5, %v3489_v14, -inf }
0x135e   :  { %3504 = vmax.xlane.f32.xlu0 %v3503_v36 }
0x1362   :  { %3513 = vmax.xlane.f32.xlu0 %v3512_v58 }
0x1365   :  { %3714 = vrot.lane.b32.xlu1 %v7090_v61, %s6252_s6 }
0x1366   :  { %3510 = vmax.xlane.f32.xlu0 %v3509_v20 }
0x1369   :  { %3710 = vrot.lane.b32.xlu1 %v7102_v32, %s6252_s6 }
0x136d   :  { %3706 = vrot.lane.b32.xlu1 %v7081_v31, %s6252_s6 }
0x1371   :  { %3696 = vrot.lane.b32.xlu1 %v7141_v27, %s6253_s7  ;;  %v3713_v27 = vpop.permute.xlu0 %3712 }
0x1375   :  { %3700 = vrot.lane.b32.xlu1 %v7151_v5, %s6253_s7 }
0x1379   :  { %3704 = vrot.lane.b32.xlu1 %v7161_v23, %s6253_s7 }
0x137c   :  { %3708 = vrot.lane.b32.xlu0 %v7098_v53, %s6252_s6 }
0x137d   :  { %3905 = vrot.lane.b32.xlu1 %v7090_v61, %s6254_s8 }
0x1380   :  { %3694 = vrot.lane.b32.xlu0 %v7084_v42, %s6253_s7 }
0x1381   :  { %3901 = vrot.lane.b32.xlu1 %v7102_v32, %s6254_s8 }
0x1384   :  { %3698 = vrot.lane.b32.xlu0 %v7144_v10, %s6253_s7 }
0x1388   :  { %3702 = vrot.lane.b32.xlu0 %v7154_v50, %s6253_s7 }
0x138c   :  { %3907 = vrot.lane.b32.xlu0 %v7088_v12, %s6254_s8 }
0x1390   :  { %3903 = vrot.lane.b32.xlu0 %v7094_v63, %s6254_s8 }
0x13dd   :  { %v3502_v61 = vpop.xlane.xlu1 %3501 }
0x13de   :  { %v3516_v5 = vsub.f32 %v3474_v22, %v3502_v61 }
0x13df   :  { %v3499_v23 = vpop.xlane.xlu0 %3498 }
0x13e0   :  { %v3515_v42 = vsub.f32 %v3469_v51, %v3499_v23  ;;  %v3523_v7 = vmul.f32 1.442695, %v3516_v5 }
0x13e1   :  { %v3715_v41 = vpop.permute.xlu1 %3714 }
0x13e2   :  { %v3521_v32 = vmul.f32 1.442695, %v3515_v42 }
0x13e3   :  { %v3508_v16 = vpop.xlane.xlu0 %3507 }
0x13e4   :  { %6086 = vpow2.f32 %v3521_v32  ;;  %v3518_v10 = vsub.f32 %v3484_v4, %v3508_v16 }
0x13e5   :  { %6088 = vpow2.f32 %v3523_v7  ;;  %v3711_v29 = vpop.permute.xlu1 %3710 }
0x13e6   :  { %v3527_v36 = vmul.f32 1.442695, %v3518_v10 }
0x13e7   :  { %v3505_v50 = vpop.xlane.xlu0 %3504 }
0x13e8   :  { %v3517_v18 = vsub.f32 %v3479_v47, %v3505_v50 }
0x13e9   :  { %v3707_v63 = vpop.permute.xlu1 %3706 }
0x13ea   :  { %v3525_v12 = vmul.f32 1.442695, %v3517_v18 }
0x13eb   :  { %v3514_v43 = vpop.xlane.xlu0 %3513 }
0x13ec   :  { %6090 = vpow2.f32 %v3525_v12  ;;  %v3520_v58 = vsub.f32 %v3494_v49, %v3514_v43 }
0x13ed   :  { %6092 = vpow2.f32 %v3527_v36  ;;  %v3697_v23 = vpop.permute.xlu1 %3696 }
0x13ee   :  { %v3531_v61 = vmul.f32 1.442695, %v3520_v58 }
0x13ef   :  { %v3511_v22 = vpop.xlane.xlu0 %3510 }
0x13f0   :  { %v3519_v20 = vsub.f32 %v3489_v14, %v3511_v22 }
0x13f1   :  { %v7419_v51 = vpop.eup %6086  ;;  %v3701_v49 = vpop.permute.xlu1 %3700 }
0x13f2   :  { %v7421_v5 = vpop.eup %6088  ;;  %v3529_v42 = vmul.f32 1.442695, %v3519_v20  ;;  %5765 = vmatprep.mubr.msk.f32.mxu0 %vm490_vm5, %v7419_v51 }
0x13f3   :  { %5766 = vmatmul.mubr.msk.f32.vlgmr.msra.gmra.mxu0 %vm490_vm5, %v7421_v5  ;;  %v3709_v4 = vpop.permute.xlu0 %3708 }
0x13f4   :  { %6094 = vpow2.f32 %v3529_v42  ;;  %5775 = vmatpush3.xpose.msk.msra.mxu0 %vm364_vm1, %v7360_v25 }
0x13f5   :  { %6096 = vpow2.f32 %v3531_v61  ;;  %5776 = vmatprep.subr.msk.mxu0 %vm364_vm1, %v3715_v41  ;;  %v3705_v32 = vpop.permute.xlu1 %3704 }
0x13f7   :  { %v3695_v47 = vpop.permute.xlu0 %3694 }
0x13f8   :  { %5777 = vmatpush3.xpose.msk.msra.mxu0 %vm364_vm1, %v3715_v41 }
0x13f9   :  { %v7431_v14 = vpop.eup %6090  ;;  %5778 = vmatprep.subr.msk.mxu0 %vm364_vm1, %v3713_v27 }
0x13fa   :  { %v7434_v7 = vpop.eup %6092  ;;  %5768 = vmatprep.mubr.msk.f32.mxu0 %vm490_vm5, %v7431_v14 }
0x13fb   :  { %5769 = vmatmul.mubr.msk.f32.gmra.mxu0 %vm490_vm5, %v7434_v7  ;;  %v3699_v25 = vpop.permute.xlu0 %3698 }
0x13fc   :  { %5779 = vmatpush3.xpose.msk.msra.mxu0 %vm364_vm1, %v3713_v27  ;;  %v3906_v27 = vpop.permute.xlu1 %3905 }
0x13fd   :  { %5780 = vmatprep.subr.msk.mxu0 %vm364_vm1, %v3711_v29 }
0x13ff   :  { %v3703_v16 = vpop.permute.xlu0 %3702 }
0x1400   :  { %5781 = vmatpush3.xpose.msk.msra.mxu0 %vm364_vm1, %v3711_v29  ;;  %v3902_v18 = vpop.permute.xlu1 %3901 }
0x1401   :  { %v7443_v41 = vpop.eup %6094  ;;  %5782 = vmatprep.subr.msk.mxu0 %vm364_vm1, %v3709_v4 }
0x1402   :  { %v7446_v10 = vpop.eup %6096  ;;  %5771 = vmatprep.mubr.msk.f32.mxu0 %vm490_vm5, %v7443_v41 }
0x1403   :  { %5772 = vmatmul.mubr.msk.f32.gmra.mxu0 %vm490_vm5, %v7446_v10  ;;  %v3908_v50 = vpop.permute.xlu0 %3907 }
0x1404   :  { %5783 = vmatpush3.xpose.msk.msra.mxu0 %vm364_vm1, %v3709_v4  ;;  %5786 = vmatprep.mubr.msk.f32.mxu0 %vm364_vm1, %v3695_v47 }
0x1405   :  { %5784 = vmatprep.subr.msk.mxu0 %vm364_vm1, %v3707_v63  ;;  %5795 = vmatprep.subr.mxu1 %v3908_v50 }
0x1406   :  { %5796 = vmatpush3.msra.mxu1 %v3908_v50 }
0x1407   :  { %5797 = vmatprep.subr.mxu1 %v3906_v27  ;;  %v3904_v29 = vpop.permute.xlu0 %3903 }
0x1408   :  { %5785 = vmatpush3.xpose.msk.msra.mxu0 %vm364_vm1, %v3707_v63  ;;  %5798 = vmatpush3.msra.mxu1 %v3906_v27 }
0x1409   :  { %5799 = vmatprep.subr.mxu1 %v3904_v29 }
0x140a   :  { %5800 = vmatpush3.msra.mxu1 %v3904_v29 }
0x140b   :  { %5787 = vmatmul.mubr.msk.f32.vlgmr.msra.gmra.mxu0 %vm364_vm1, %v3697_v23  ;;  %5801 = vmatprep.subr.mxu1 %v3902_v18 }
0x140c   :  { %5789 = vmatprep.mubr.msk.f32.mxu0 %vm364_vm1, %v3699_v25  ;;  %5802 = vmatpush3.msra.mxu1 %v3902_v18  ;;  %v3536_v25 = vsel %vm490_vm5, %v7421_v5, 0.0 }
0x140f   :  { %5790 = vmatmul.mubr.msk.f32.gmra.mxu0 %vm364_vm1, %v3701_v49  ;;  %v3196_v49 = vsel %vm490_vm5, %v7323_v15, 0.0 }
0x1410   :  { %5792 = vmatprep.mubr.msk.f32.mxu0 %vm364_vm1, %v3703_v16 }
0x1413   :  { %5793 = vmatmul.mubr.msk.f32.gmra.mxu0 %vm364_vm1, %v3705_v32 }
0x14b3   :  { %v7461_v36 = vpop.f32.mrf.mxu0 }
0x14b5   :  { %v7463_v12 = vpop.f32.mrf.mxu0 }
0x14bb   :  { %v7465_v43 = vpop.f32.mrf.mxu0 }
0x14bd   :  { %v7467_v63 = vpop.f32.mrf.mxu0 }
0x14c3   :  { %v7469_v58 = vpop.f32.mrf.mxu0 }
0x14c5   :  { %v7471_v22 = vpop.f32.mrf.mxu0 }
0x14cb   :  { %v5788_v20 = vpop.f32.mrf.mxu0 }
0x14cc   :  { %v3814_v61 = vadd.f32 %v5788_v20, %v6413_v21  ;;  %v3193_v21 = vsel %vm490_vm5, %v7321_v54, 0.0 }
0x14cd   :  { %v3808_v23 = vpop.f32.mrf.mxu0 }
0x14ce   :  { %v3809_v42 = vadd.f32 %v3808_v23, %v6415_v28  ;;  %v3840_v4 = vsel %vm490_vm5, %v3814_v61, -inf  ;;  %v3533_v28 = vsel %vm490_vm5, %v7419_v51, 0.0 }
0x14cf   :  { %3841 = vmax.xlane.f32.xlu1 %v3840_v4  ;;  %v5791_v29 = vpop.f32.mrf.mxu0 }
0x14d0   :  { %v3837_v47 = vsel %vm490_vm5, %v3809_v42, -inf  ;;  %v3824_v5 = vadd.f32 %v5791_v29, %v6418_v33 }
0x14d1   :  { %3838 = vmax.xlane.f32.xlu0 %v3837_v47  ;;  %v3818_v51 = vpop.f32.mrf.mxu0 }
0x14d3   :  { %v5794_v20 = vpop.f32.mrf.mxu0 }
0x14d5   :  { %v3828_v47 = vpop.f32.mrf.mxu0 }
0x14d6   :  { %v3829_v33 = vadd.f32 %v3828_v47, %v6432_v60 }
0x14e0   :  { %3897 = vrot.lane.b32.xlu1 %v7081_v31, %s6254_s8 }
0x14e7   :  { %3899 = vrot.lane.b32.xlu0 %v7098_v53, %s6254_s8 }
0x1504   :  { %3197 = vadd.xlane.f32.xlu1 %v3196_v49  ;;  %v3834_v49 = vadd.f32 %v5794_v20, %v6428_v55  ;;  %v2853_v55 = vsel %vm490_vm5, %v7215_v39, 0.0  ;;  %v2530_v20 = vld [vmem:[#allocation2 + $0x190] sm:$0xff] }
0x1506   :  { %3194 = vadd.xlane.f32.xlu0 %v3193_v21  ;;  %v3846_v21 = vsel %vm490_vm5, %v3824_v5, -inf }
0x150a   :  { %3534 = vadd.xlane.f32.xlu0 %v3533_v28 }
0x150e   :  { %3537 = vadd.xlane.f32.xlu0 %v3536_v25  ;;  %v3849_v25 = vsel %vm490_vm5, %v3829_v33, -inf }
0x1558   :  { %v3842_v31 = vpop.xlane.xlu1 %3841 }
0x1559   :  { %v3856_v32 = vsub.f32 %v3814_v61, %v3842_v31  ;;  %v2856_v31 = vsel %vm490_vm5, %v7217_v8, 0.0 }
0x155a   :  { %v3839_v16 = vpop.xlane.xlu0 %3838 }
0x155b   :  { %v3863_v53 = vmul.f32 1.442695, %v3856_v32  ;;  %v3855_v50 = vsub.f32 %v3809_v42, %v3839_v16  ;;  %v3819_v42 = vadd.f32 %v3818_v51, %v6424_v46  ;;  %v3852_v46 = vsel %vm490_vm5, %v3834_v49, -inf }
0x155c   :  { %v3898_v54 = vpop.permute.xlu1 %3897 }
0x155d   :  { %6098 = vpow2.f32 %v3863_v53  ;;  %v3861_v15 = vmul.f32 1.442695, %v3855_v50  ;;  %v3843_v28 = vsel %vm490_vm5, %v3819_v42, -inf }
0x155e   :  { %v3900_v27 = vpop.permute.xlu0 %3899 }
0x155f   :  { %6100 = vpow2.f32 %v3861_v15  ;;  %5803 = vmatprep.subr.mxu1 %v3900_v27 }
0x1560   :  { %5804 = vmatpush3.msra.mxu1 %v3900_v27 }
0x1561   :  { %5805 = vmatprep.subr.mxu1 %v3898_v54 }
0x1562   :  { %5806 = vmatpush3.msra.mxu1 %v3898_v54 }
0x156a   :  { %v6099_v18 = vpop.eup %6098 }
0x156b   :  { %v3876_v61 = vsel %vm490_vm5, %v6099_v18, 0.0 }
0x156c   :  { %v6101_v23 = vpop.eup %6100  ;;  %3877 = vadd.xlane.f32.xlu0 %v3876_v61 }
0x156d   :  { %5807 = vmatprep.mubr.msk.f32.mxu1 %vm490_vm5, %v6101_v23  ;;  %v3873_v4 = vsel %vm490_vm5, %v6101_v23, 0.0 }
0x156e   :  { %3874 = vadd.xlane.f32.xlu1 %v3873_v4  ;;  %5808 = vmatmul.mubr.msk.f32.vlgmr.msra.gmra.mxu1 %vm490_vm5, %v6099_v18  ;;  %v2531_v18 = vld [vmem:[#allocation2 + $0x198] sm:$0xff] }
0x156f   :  { %5816 = vmatprep.subr.mxu1 %v2531_v18 }
0x1570   :  { %3847 = vmax.xlane.f32.xlu0 %v3846_v21  ;;  %5817 = vmatpush3.msra.mxu1 %v2531_v18  ;;  %v3542_v18 = vsel %vm490_vm5, %v7434_v7, 0.0 }
0x1571   :  { %5818 = vmatprep.subr.mxu1 %v2530_v20 }
0x1572   :  { %3844 = vmax.xlane.f32.xlu1 %v3843_v28  ;;  %5819 = vmatpush3.msra.mxu1 %v2530_v20  ;;  %v3205_v20 = vsel %vm490_vm5, %v7345_v24, 0.0 }
0x1574   :  { %3853 = vmax.xlane.f32.xlu0 %v3852_v46 }
0x1576   :  { %3850 = vmax.xlane.f32.xlu1 %v3849_v25 }
0x1578   :  { %2857 = vadd.xlane.f32.xlu0 %v2856_v31 }
0x157a   :  { %2854 = vadd.xlane.f32.xlu1 %v2853_v55 }
0x158d   :  { %v3198_v32 = vpop.xlane.xlu1 %3197 }
0x158e   :  { %6102 = vrcp.f32 %v3198_v32 }
0x158f   :  { %v3195_v60 = vpop.xlane.xlu0 %3194 }
0x1590   :  { %6104 = vrcp.f32 %v3195_v60 }
0x1593   :  { %v3535_v16 = vpop.xlane.xlu0 %3534 }
0x1594   :  { %6106 = vrcp.f32 %v3535_v16 }
0x1597   :  { %v3538_v53 = vpop.xlane.xlu0 %3537 }
0x1598   :  { %6108 = vrcp.f32 %v3538_v53 }
0x159b   :  { %v6103_v50 = vpop.eup %6102 }
0x159c   :  { %v3349_v15 = vmul.f32 %v6103_v50, %v7367_v59  ;;  %v2529_v59 = vld [vmem:[#allocation2 + $0x188] sm:$0xff] }
0x159d   :  { %v6105_v27 = vpop.eup %6104  ;;  %5820 = vmatprep.subr.mxu1 %v2529_v59 }
0x159e   :  { %4042 = vrot.lane.b32.xlu0 %v3349_v15, %s6242_s13  ;;  %v3348_v8 = vmul.f32 %v6105_v27, %v7369_v11  ;;  %5821 = vmatpush3.msra.mxu1 %v2529_v59 }
0x15a0   :  { %4040 = vrot.lane.b32.xlu1 %v3348_v8, %s6242_s13 }
0x15a1   :  { %v6107_v39 = vpop.eup %6106 }
0x15a2   :  { %v3688_v54 = vmul.f32 %v6107_v39, %v7463_v12  ;;  %v3199_v39 = vsel %vm490_vm5, %v7333_v44, 0.0 }
0x15a4   :  { %4064 = vrot.lane.b32.xlu1 %v3688_v54, %s6255_s9  ;;  %v3539_v54 = vsel %vm490_vm5, %v7431_v14, 0.0 }
0x15a5   :  { %v6109_v29 = vpop.eup %6108 }
0x15a6   :  { %v3689_v51 = vmul.f32 %v6109_v29, %v7461_v36  ;;  %v3202_v29 = vsel %vm490_vm5, %v7336_v19, 0.0 }
0x15a8   :  { %4066 = vrot.lane.b32.xlu1 %v3689_v51, %s6255_s9 }
0x15f5   :  { %v3878_v11 = vpop.xlane.xlu0 %3877 }
0x15f7   :  { %v3875_v61 = vpop.xlane.xlu1 %3874 }
0x15f9   :  { %v3848_v23 = vpop.xlane.xlu0 %3847 }
0x15fa   :  { %v3858_v12 = vsub.f32 %v3824_v5, %v3848_v23 }
0x15fb   :  { %v3845_v4 = vpop.xlane.xlu1 %3844 }
0x15fc   :  { %v3857_v47 = vsub.f32 %v3819_v42, %v3845_v4  ;;  %v3867_v21 = vmul.f32 1.442695, %v3858_v12 }
0x15fd   :  { %v3854_v28 = vpop.xlane.xlu0 %3853 }
0x15fe   :  { %v3865_v36 = vmul.f32 1.442695, %v3857_v47  ;;  %v3860_v46 = vsub.f32 %v3834_v49, %v3854_v28  ;;  %v2528_v49 = vld [vmem:[#allocation2 + $0x180] sm:$0xff] }
0x15ff   :  { %v3851_v25 = vpop.xlane.xlu1 %3850  ;;  %5822 = vmatprep.subr.mxu1 %v2528_v49 }
0x1600   :  { %6110 = vpow2.f32 %v3865_v36  ;;  %v3859_v31 = vsub.f32 %v3829_v33, %v3851_v25  ;;  %v3871_v55 = vmul.f32 1.442695, %v3860_v46  ;;  %5823 = vmatpush3.msra.mxu1 %v2528_v49 }
0x1601   :  { %6112 = vpow2.f32 %v3867_v21  ;;  %v2858_v59 = vpop.xlane.xlu0 %2857 }
0x1602   :  { %v3869_v32 = vmul.f32 1.442695, %v3859_v31 }
0x1603   :  { %v2855_v14 = vpop.xlane.xlu1 %2854 }
0x1604   :  { %6114 = vpow2.f32 %v3869_v32 }
0x1605   :  { %6116 = vpow2.f32 %v3871_v55 }
0x1606   :  { %6118 = vrcp.f32 %v3878_v11 }
0x1607   :  { %6120 = vrcp.f32 %v3875_v61 }
0x1608   :  { %6122 = vrcp.f32 %v2855_v14 }
0x1609   :  { %6124 = vrcp.f32 %v2858_v59 }
0x160d   :  { %v6111_v60 = vpop.eup %6110 }
0x160e   :  { %v6113_v16 = vpop.eup %6112  ;;  %5810 = vmatprep.mubr.msk.f32.mxu1 %vm490_vm5, %v6111_v60  ;;  %v3879_v51 = vsel %vm490_vm5, %v6111_v60, 0.0 }
0x160f   :  { %5811 = vmatmul.mubr.msk.f32.gmra.mxu1 %vm490_vm5, %v6113_v16  ;;  %v3882_v44 = vsel %vm490_vm5, %v6113_v16, 0.0  ;;  %v7551_v16 = vld [vmem:[#allocation2 + $0x1a0] ss:$0 sm:$0xff] }
0x1610   :  { %v4043_v47 = vpop.permute.xlu0 %4042 }
0x1611   :  { %v7515_v5 = vpop.eup %6114 }
0x1612   :  { %v7517_v42 = vpop.eup %6116  ;;  %5813 = vmatprep.mubr.msk.f32.mxu1 %vm490_vm5, %v7515_v5  ;;  %v4041_v19 = vpop.permute.xlu1 %4040 }
0x1613   :  { %5814 = vmatmul.mubr.msk.f32.gmra.mxu1 %vm490_vm5, %v7517_v42  ;;  %v6119_v33 = vpop.eup %6118 }
0x1614   :  { %v6121_v15 = vpop.eup %6120 }
0x1615   :  { %v6123_v61 = vpop.eup %6122 }
0x1616   :  { %v4065_v11 = vpop.permute.xlu1 %4064  ;;  %v6125_v23 = vpop.eup %6124  ;;  %v3008_v12 = vmul.f32 %v6123_v61, %v7263_v17 }
0x1617   :  { %v3009_v7 = vmul.f32 %v6125_v23, %v7261_v38 }
0x1618   :  { %v4106_v24 = vsel %vm364_vm1, %v3008_v12, %v4041_v19 }
0x1619   :  { %v4107_v28 = vsel %vm364_vm1, %v3009_v7, %v4043_v47  ;;  %v4112_v36 = vsel %vm1786_vm9, %v4106_v24, %v4065_v11 }
0x161a   :  { %v4067_v4 = vpop.permute.xlu1 %4066 }
0x161b   :  { %v4113_v25 = vsel %vm1786_vm9, %v4107_v28, %v4067_v4 }
0x162e   :  { %v5809_v53 = vpop.f32.mrf.mxu1 }
0x162f   :  { %v4029_v50 = vmul.f32 %v6119_v33, %v5809_v53 }
0x1630   :  { %v3999_v27 = vpop.f32.mrf.mxu1 }
0x1631   :  { %v4028_v8 = vmul.f32 %v6121_v15, %v3999_v27  ;;  %4090 = vrot.lane.b32.xlu1 %v4029_v50, %s6256_s10 }
0x1633   :  { %4088 = vrot.lane.b32.xlu0 %v4028_v8, %s6256_s10 }
0x1652   :  { %3200 = vadd.xlane.f32.xlu0 %v3199_v39 }
0x1655   :  { %3540 = vadd.xlane.f32.xlu1 %v3539_v54  ;;  %v3545_v54 = vsel %vm490_vm5, %v7443_v41, 0.0  ;;  %v3888_v41 = vsel %vm490_vm5, %v7517_v42, 0.0 }
0x1656   :  { %3203 = vadd.xlane.f32.xlu0 %v3202_v29 }
0x1659   :  { %3880 = vadd.xlane.f32.xlu1 %v3879_v51  ;;  %v3548_v51 = vsel %vm490_vm5, %v7446_v10, 0.0 }
0x165a   :  { %3543 = vadd.xlane.f32.xlu0 %v3542_v18  ;;  %v2859_v18 = vsel %vm490_vm5, %v7227_v35, 0.0  ;;  %v2868_v35 = vsel %vm490_vm5, %v7242_v6, 0.0 }
0x165d   :  { %3206 = vadd.xlane.f32.xlu1 %v3205_v20 }
0x165e   :  { %3883 = vadd.xlane.f32.xlu0 %v3882_v44 }
0x16a3   :  { %v4091_v21 = vpop.permute.xlu1 %4090 }
0x16a4   :  { %v4119_v55 = vsel %vm1793_vm10, %v4113_v25, %v4091_v21 }
0x16a5   :  { %v4089_v46 = vpop.permute.xlu0 %4088 }
0x16a6   :  { %v4118_v31 = vsel %vm1793_vm10, %v4112_v36, %v4089_v46 }
0x16a7   :  { %5824 = vmatprep.mubr.msk.f32.mxu1 %vm48_vm0, %v4118_v31 }
0x16a8   :  { %5825 = vmatmul.mubr.msk.f32.vlgmr.msra.gmra.mxu1 %vm48_vm0, %v4119_v55 }
0x16cf   :  { %v5812_v38 = vpop.f32.mrf.mxu1 }
0x16d1   :  { %v4009_v17 = vpop.f32.mrf.mxu1 }
0x16d3   :  { %v7547_v32 = vpop.f32.mrf.mxu1 }
0x16d5   :  { %v7549_v60 = vpop.f32.mrf.mxu1 }
0x16db   :  { %v3201_v29 = vpop.xlane.xlu0 %3200 }
0x16dc   :  { %6126 = vrcp.f32 %v3201_v29 }
0x16de   :  { %v3541_v44 = vpop.xlane.xlu1 %3540 }
0x16df   :  { %v3204_v20 = vpop.xlane.xlu0 %3203  ;;  %6128 = vrcp.f32 %v3541_v44 }
0x16e2   :  { %v3881_v42 = vpop.xlane.xlu1 %3880 }
0x16e3   :  { %v3544_v10 = vpop.xlane.xlu0 %3543 }
0x16e4   :  { %6130 = vrcp.f32 %v3544_v10 }
0x16e5   :  { %6132 = vrcp.f32 %v3204_v20 }
0x16e7   :  { %v3884_v14 = vpop.xlane.xlu0 %3883 }
0x16e8   :  { %6134 = vrcp.f32 %v3884_v14 }
0x16e9   :  { %v6127_v59 = vpop.eup %6126  ;;  %6136 = vrcp.f32 %v3881_v42 }
0x16ea   :  { %v3350_v19 = vmul.f32 %v6127_v59, %v7373_v13 }
0x16ec   :  { %v6129_v11 = vpop.eup %6128 }
0x16f1   :  { %v6131_v61 = vpop.eup %6130 }
0x16f2   :  { %v6133_v6 = vpop.eup %6132  ;;  %v3691_v23 = vmul.f32 %v6131_v61, %v7465_v43 }
0x16f3   :  { %v3351_v4 = vmul.f32 %v6133_v6, %v7371_v56  ;;  %v2538_v6 = vld [vmem:[#allocation2 + $0x1d0] sm:$0xff] }
0x16f4   :  { %5833 = vmatprep.subr.mxu0 %v2538_v6 }
0x16f5   :  { %v6135_v12 = vpop.eup %6134  ;;  %5834 = vmatpush3.msra.mxu0 %v2538_v6 }
0x16f6   :  { %v6137_v7 = vpop.eup %6136  ;;  %v4031_v47 = vmul.f32 %v6135_v12, %v5812_v38  ;;  %v2535_v12 = vld [vmem:[#allocation2 + $0x1b8] sm:$0xff] }
0x16f7   :  { %v4030_v13 = vmul.f32 %v6137_v7, %v4009_v17 }
0x1768   :  { %v5826_v49 = vpop.f32.mrf.mxu1 }
0x1769   :  { %v4218_v33 = vadd.f32 %v5826_v49, %v7551_v16 }
0x176a   :  { %v4212_v53 = vpop.f32.mrf.mxu1 }
0x176b   :  { %v7555_v50 = vadd.f32 %v4218_v33, %v7055_v0  ;;  %v4213_v15 = vadd.f32 %v7551_v16, %v4212_v53  ;;  %v3208_v0 = vsel %vm490_vm5, %v7348_v62, 0.0  ;;  %v2865_v62 = vsel %vm490_vm5, %v7239_v30, 0.0  ;;  %v3207_v30 = vpop.xlane.xlu1 %3206 }
0x176c   :  { %6138 = vrcp.f32 %v3207_v30 }
0x176d   :  { %v7559_v27 = vadd.f32 %v4213_v15, %v7053_v48  ;;  %v4250_v8 = vsel %vm48_vm0, %v7555_v50, 0.0  ;;  %v3885_v48 = vsel %vm490_vm5, %v7515_v5, 0.0  ;;  %v2862_v5 = vsel %vm490_vm5, %v7230_v45, 0.0 }
0x176e   :  { %4251 = vadd.xlane.f32.xlu1 %v4250_v8  ;;  %v3690_v45 = vmul.f32 %v6129_v11, %v7467_v63 }
0x176f   :  { %v4247_v39 = vsel %vm48_vm0, %v7559_v27, 0.0 }
0x1770   :  { %4248 = vadd.xlane.f32.xlu0 %v4247_v39 }
0x1772   :  { %3546 = vadd.xlane.f32.xlu1 %v3545_v54 }
0x1774   :  { %3209 = vadd.xlane.f32.xlu0 %v3208_v0 }
0x1776   :  { %3886 = vadd.xlane.f32.xlu1 %v3885_v48 }
0x1778   :  { %3549 = vadd.xlane.f32.xlu0 %v3548_v51 }
0x1779   :  { %v6139_v24 = vpop.eup %6138 }
0x177a   :  { %2860 = vadd.xlane.f32.xlu1 %v2859_v18  ;;  %v3352_v63 = vmul.f32 %v6139_v24, %v7377_v57 }
0x177c   :  { %3889 = vadd.xlane.f32.xlu0 %v3888_v41 }
0x177e   :  { %2866 = vadd.xlane.f32.xlu1 %v2865_v62 }
0x1780   :  { %2863 = vadd.xlane.f32.xlu0 %v2862_v5 }
0x1784   :  { %2869 = vadd.xlane.f32.xlu0 %v2868_v35 }
0x178f   :  { %4044 = vrot.lane.b32.xlu1 %v3350_v19, %s6242_s13 }
0x1793   :  { %4068 = vrot.lane.b32.xlu1 %v3690_v45, %s6255_s9 }
0x1797   :  { %4070 = vrot.lane.b32.xlu1 %v3691_v23, %s6255_s9  ;;  %v2537_v23 = vld [vmem:[#allocation2 + $0x1c8] sm:$0xff] }
0x1798   :  { %5835 = vmatprep.subr.mxu0 %v2537_v23 }
0x1799   :  { %5836 = vmatpush3.msra.mxu0 %v2537_v23 }
0x179a   :  { %4046 = vrot.lane.b32.xlu0 %v3351_v4, %s6242_s13 }
0x179b   :  { %4094 = vrot.lane.b32.xlu1 %v4031_v47, %s6256_s10 }
0x179e   :  { %4092 = vrot.lane.b32.xlu0 %v4030_v13, %s6256_s10 }
0x17a2   :  { %4048 = vrot.lane.b32.xlu0 %v3352_v63, %s6242_s13 }
0x17f7   :  { %v4252_v43 = vpop.xlane.xlu1 %4251 }
0x17f8   :  { %v4266_v21 = vmul.f32 0.03125, %v4252_v43 }
0x17f9   :  { %v4249_v28 = vpop.xlane.xlu0 %4248 }
0x17fa   :  { %v7596_v36 = vsub.f32 %v7555_v50, %v4266_v21  ;;  %v4265_v59 = vmul.f32 0.03125, %v4249_v28 }
0x17fb   :  { %v3547_v56 = vpop.xlane.xlu1 %3546 }
0x17fc   :  { %v4278_v46 = vmul.f32 %v7596_v36, %v7596_v36  ;;  %v4271_v30 = vsub.f32 %v7559_v27, %v4265_v59  ;;  %v2536_v27 = vld [vmem:[#allocation2 + $0x1c0] sm:$0xff] }
0x17fd   :  { %v3210_v25 = vpop.xlane.xlu0 %3209  ;;  %5837 = vmatprep.subr.mxu0 %v2536_v27 }
0x17fe   :  { %6140 = vrcp.f32 %v3210_v25  ;;  %v4286_v31 = vsel %vm48_vm0, %v4278_v46, 0.0  ;;  %v4277_v19 = vmul.f32 %v4271_v30, %v4271_v30  ;;  %5838 = vmatpush3.msra.mxu0 %v2536_v27 }
0x17ff   :  { %v3887_v55 = vpop.xlane.xlu1 %3886  ;;  %4287 = vadd.xlane.f32.xlu0 %v4286_v31  ;;  %6142 = vrcp.f32 %v3547_v56  ;;  %5839 = vmatprep.subr.mxu0 %v2535_v12 }
0x1800   :  { %5840 = vmatpush3.msra.mxu0 %v2535_v12 }
0x1801   :  { %v3550_v38 = vpop.xlane.xlu0 %3549 }
0x1803   :  { %v2861_v57 = vpop.xlane.xlu1 %2860 }
0x1804   :  { %6144 = vrcp.f32 %v2861_v57 }
0x1805   :  { %v3890_v17 = vpop.xlane.xlu0 %3889  ;;  %6146 = vrcp.f32 %v3887_v55 }
0x1807   :  { %v2867_v49 = vpop.xlane.xlu1 %2866 }
0x1809   :  { %v2864_v33 = vpop.xlane.xlu0 %2863 }
0x180a   :  { %6148 = vrcp.f32 %v2864_v33 }
0x180b   :  { %v6141_v53 = vpop.eup %6140  ;;  %v4045_v50 = vpop.permute.xlu1 %4044  ;;  %6150 = vrcp.f32 %v3550_v38 }
0x180c   :  { %v3353_v15 = vmul.f32 %v6141_v53, %v7375_v52  ;;  %v6143_v54 = vpop.eup %6142  ;;  %6152 = vrcp.f32 %v3890_v17 }
0x180d   :  { %v2870_v8 = vpop.xlane.xlu0 %2869  ;;  %v3692_v51 = vmul.f32 %v6143_v54, %v7471_v22  ;;  %6154 = vrcp.f32 %v2867_v49 }
0x180e   :  { %4050 = vrot.lane.b32.xlu1 %v3353_v15, %s6242_s13  ;;  %6156 = vrcp.f32 %v2870_v8  ;;  %v7634_v15 = vld [vmem:[#allocation2 + $0x1a8] ss:$0 sm:$0xff]  ;;  %s6216_s13 = scalar_lea.vmem %s4851_s12, 32 }
0x180f   :  { %v4069_v39 = vpop.permute.xlu1 %4068  ;;  %p6217_p5 = scmp.ne.s32.totalorder %s4851_s12, %s6216_s13  ;;  %p6222_p7 = scmp.lt.s32.totalorder %s6216_s13, %s6216_s13 }
0x1811   :  { %v6145_v0 = vpop.eup %6144  ;;  %v4047_v29 = vpop.permute.xlu0 %4046  ;;  %p6223_p8 = por %p6222_p7, %p6221_p6 }
0x1812   :  { %v3010_v48 = vmul.f32 %v6145_v0, %v7267_v37  ;;  %v6147_v18 = vpop.eup %6146 }
0x1813   :  { %v4071_v62 = vpop.permute.xlu1 %4070  ;;  %v4032_v10 = vmul.f32 %v6147_v18, %v7549_v60  ;;  %v4283_v60 = vsel %vm48_vm0, %v4277_v19, 0.0  ;;  %p6224_p9 = pnand %p6223_p8, %p6217_p5 }
0x1814   :  { %v4108_v20 = vsel %vm364_vm1, %v3010_v48, %v4045_v50 }
0x1815   :  { %v4114_v41 = vsel %vm1786_vm9, %v4108_v20, %v4069_v39  ;;  %4072 = vrot.lane.b32.xlu0 %v3692_v51, %s6255_s9  ;;  %v4093_v52 = vpop.permute.xlu0 %4092 }
0x1816   :  { %v4120_v44 = vsel %vm1793_vm10, %v4114_v41, %v4093_v52 }
0x1817   :  { %v6149_v5 = vpop.eup %6148  ;;  %5827 = vmatprep.mubr.msk.f32.mxu1 %vm48_vm0, %v4120_v44  ;;  %v4095_v14 = vpop.permute.xlu1 %4094 }
0x1818   :  { %v3011_v37 = vmul.f32 %v6149_v5, %v7265_v40  ;;  %v6151_v40 = vpop.eup %6150  ;;  %v2547_v5 = vld [vmem:[#allocation2 + $0x218] sm:$0xff] }
0x1819   :  { %4096 = vrot.lane.b32.xlu0 %v4032_v10, %s6256_s10  ;;  %v3693_v11 = vmul.f32 %v6151_v40, %v7469_v58  ;;  %v6153_v45 = vpop.eup %6152  ;;  %v4049_v58 = vpop.permute.xlu0 %4048  ;;  %5850 = vmatprep.subr.mxu1 %v2547_v5  ;;  %v2546_v10 = vld [vmem:[#allocation2 + $0x210] sm:$0xff] }
0x181a   :  { %v4109_v22 = vsel %vm364_vm1, %v3011_v37, %v4047_v29  ;;  %v4033_v61 = vmul.f32 %v6153_v45, %v7547_v32  ;;  %v6155_v7 = vpop.eup %6154  ;;  %5851 = vmatpush3.msra.mxu1 %v2547_v5  ;;  %v2545_v37 = vld [vmem:[#allocation2 + $0x208] sm:$0xff] }
0x181b   :  { %v4115_v35 = vsel %vm1786_vm9, %v4109_v22, %v4071_v62  ;;  %v3012_v32 = vmul.f32 %v6155_v7, %v7271_v2  ;;  %v6157_v31 = vpop.eup %6156  ;;  %5852 = vmatprep.subr.mxu1 %v2546_v10  ;;  %v2543_v22 = vld [vmem:[#allocation2 + $0x1f8] sm:$0xff] }
0x181c   :  { %v4121_v42 = vsel %vm1793_vm10, %v4115_v35, %v4095_v14  ;;  %v3013_v2 = vmul.f32 %v6157_v31, %v7269_v34  ;;  %v7637_v34 = vld [vmem:[#allocation2 + $0x1b0] ss:$0 sm:$0xff]  ;;  %5853 = vmatpush3.msra.mxu1 %v2546_v10  ;;  %v2541_v35 = vld [vmem:[#allocation2 + $0x1e8] sm:$0xff]  ;;  %v2540_v14 = vld [vmem:[#allocation2 + $0x1e0] sm:$0xff] }
0x181d   :  { %5828 = vmatmul.mubr.msk.f32.gmra.mxu1 %vm48_vm0, %v4121_v42  ;;  %v4110_v13 = vsel %vm364_vm1, %v3012_v32, %v4049_v58  ;;  %5854 = vmatprep.subr.mxu1 %v2545_v37 }
0x181e   :  { %5855 = vmatpush3.msra.mxu1 %v2545_v37 }
0x1832   :  { %4284 = vadd.xlane.f32.xlu1 %v4283_v60 }
0x1843   :  { %4074 = vrot.lane.b32.xlu1 %v3693_v11, %s6255_s9 }
0x1847   :  { %4098 = vrot.lane.b32.xlu1 %v4033_v61, %s6256_s10 }
0x1880   :  { %v4051_v28 = vpop.permute.xlu1 %4050 }
0x1881   :  { %v4111_v57 = vsel %vm364_vm1, %v3013_v2, %v4051_v28 }
0x1888   :  { %v4288_v4 = vpop.xlane.xlu0 %4287 }
0x1889   :  { %v4302_v21 = vmul.f32 0.03125, %v4288_v4 }
0x188b   :  { %v4308_v56 = vadd.f32 1e-05, %v4302_v21 }
0x188c   :  { %v4073_v47 = vpop.permute.xlu0 %4072 }
0x188d   :  { %v4116_v24 = vsel %vm1786_vm9, %v4110_v13, %v4073_v47  ;;  %6158 = vrsqrt.f32 %v4308_v56 }
0x1890   :  { %v4097_v63 = vpop.permute.xlu0 %4096 }
0x1891   :  { %v4122_v43 = vsel %vm1793_vm10, %v4116_v24, %v4097_v63 }
0x1892   :  { %5830 = vmatprep.mubr.msk.f32.mxu1 %vm48_vm0, %v4122_v43 }
0x189a   :  { %v6159_v53 = vpop.eup %6158 }
0x189b   :  { %v4320_v50 = vmul.f32 %v6159_v53, %v7596_v36 }
0x189d   :  { %v4330_v54 = vmul.f32 %v7634_v15, %v4320_v50 }
0x189f   :  { %v4340_v48 = vadd.f32 %v7637_v34, %v4330_v54 }
0x18bb   :  { %v4285_v46 = vpop.xlane.xlu1 %4284 }
0x18bc   :  { %v4301_v25 = vmul.f32 0.03125, %v4285_v46 }
0x18be   :  { %v4307_v55 = vadd.f32 1e-05, %v4301_v25 }
0x18bf   :  { %v4075_v38 = vpop.permute.xlu1 %4074 }
0x18c0   :  { %6160 = vrsqrt.f32 %v4307_v55  ;;  %v4117_v17 = vsel %vm1786_vm9, %v4111_v57, %v4075_v38 }
0x18c3   :  { %v4099_v49 = vpop.permute.xlu1 %4098 }
0x18c4   :  { %v4123_v33 = vsel %vm1793_vm10, %v4117_v17, %v4099_v49  ;;  %vm4842_vm10 = vcmask 9216  }
0x18c5   :  { %5831 = vmatmul.mubr.msk.f32.gmra.mxu1 %vm48_vm0, %v4123_v33 }
0x18cd   :  { %v6161_v8 = vpop.eup %6160 }
0x18ce   :  { %v4319_v39 = vmul.f32 %v6161_v8, %v4271_v30 }
0x18d0   :  { %v4329_v0 = vmul.f32 %v7634_v15, %v4319_v39 }
0x18d2   :  { %v7641_v29 = vadd.f32 %v7637_v34, %v4329_v0 }
0x18d4   :  { %5841 = vmatprep.mubr.msk.f32.mxu0 %vm48_vm0, %v7641_v29 }
0x18d5   :  { %5842 = vmatmul.mubr.msk.f32.vlgmr.msra.gmra.mxu0 %vm48_vm0, %v4340_v48 }
0x18dd   :  { %v5829_v36 = vpop.f32.mrf.mxu1 }
0x18de   :  { %v4228_v51 = vadd.f32 %v5829_v36, %v7551_v16 }
0x18df   :  { %v4222_v18 = vpop.f32.mrf.mxu1 }
0x18e0   :  { %v4244_v20 = vadd.f32 %v4228_v51, %v7066_v9  ;;  %v4223_v41 = vadd.f32 %v7551_v16, %v4222_v18  ;;  %v2544_v9 = vld [vmem:[#allocation2 + $0x200] sm:$0xff] }
0x18e1   :  { %5856 = vmatprep.subr.mxu1 %v2544_v9 }
0x18e2   :  { %v4243_v62 = vadd.f32 %v4223_v41, %v7064_v1  ;;  %v4256_v52 = vsel %vm48_vm0, %v4244_v20, 0.0  ;;  %5857 = vmatpush3.msra.mxu1 %v2544_v9  ;;  %v2542_v1 = vld [vmem:[#allocation2 + $0x1f0] sm:$0xff] }
0x18e3   :  { %4257 = vadd.xlane.f32.xlu1 %v4256_v52  ;;  %5858 = vmatprep.subr.mxu1 %v2543_v22 }
0x18e4   :  { %v4253_v44 = vsel %vm48_vm0, %v4243_v62, 0.0  ;;  %5859 = vmatpush3.msra.mxu1 %v2543_v22 }
0x18e5   :  { %4254 = vadd.xlane.f32.xlu0 %v4253_v44  ;;  %5860 = vmatprep.subr.mxu1 %v2542_v1 }
0x18e6   :  { %5861 = vmatpush3.msra.mxu1 %v2542_v1 }
0x18e7   :  { %5862 = vmatprep.subr.mxu1 %v2541_v35 }
0x18e8   :  { %5863 = vmatpush3.msra.mxu1 %v2541_v35 }
0x18e9   :  { %5864 = vmatprep.subr.mxu1 %v2540_v14 }
0x18ea   :  { %5865 = vmatpush3.msra.mxu1 %v2540_v14 }
0x196c   :  { %v4258_v40 = vpop.xlane.xlu1 %4257 }
0x196d   :  { %v4268_v61 = vmul.f32 0.03125, %v4258_v40 }
0x196e   :  { %v4255_v42 = vpop.xlane.xlu0 %4254 }
0x196f   :  { %v4267_v59 = vmul.f32 0.03125, %v4255_v42  ;;  %v7663_v12 = vsub.f32 %v4244_v20, %v4268_v61 }
0x1971   :  { %v7653_v30 = vsub.f32 %v4243_v62, %v4267_v59  ;;  %v4280_v47 = vmul.f32 %v7663_v12, %v7663_v12 }
0x1973   :  { %v4279_v19 = vmul.f32 %v7653_v30, %v7653_v30 }
0x1975   :  { %v4289_v60 = vsel %vm48_vm0, %v4279_v19, 0.0 }
0x1976   :  { %4290 = vadd.xlane.f32.xlu1 %v4289_v60 }
0x1985   :  { %v5832_v11 = vpop.f32.mrf.mxu1 }
0x1986   :  { %v4238_v6 = vadd.f32 %v5832_v11, %v7551_v16 }
0x1987   :  { %v4232_v45 = vpop.f32.mrf.mxu1 }
0x1988   :  { %v4233_v23 = vadd.f32 %v7551_v16, %v4232_v45  ;;  %v7666_v58 = vadd.f32 %v4238_v6, %v7075_v26  ;;  %v7674_v16 = vld [vmem:[#allocation2 + $0x1d8] ss:$0 sm:$0xff] }
0x198a   :  { %v7661_v27 = vadd.f32 %v4233_v23, %v7073_v3  ;;  %v4262_v7 = vsel %vm48_vm0, %v7666_v58, 0.0  ;;  %v4292_v3 = vsel %vm48_vm0, %v4280_v47, 0.0 }
0x198c   :  { %v4259_v4 = vsel %vm48_vm0, %v7661_v27, 0.0 }
0x198d   :  { %4260 = vadd.xlane.f32.xlu0 %v4259_v4 }
0x1991   :  { %4263 = vadd.xlane.f32.xlu0 %v4262_v7 }
0x1995   :  { %v5843_v32 = vpop.f32.mrf.mxu0  ;;  %4293 = vadd.xlane.f32.xlu0 %v4292_v3 }
0x1996   :  { %v4439_v26 = vadd.f32 %v5843_v32, %v7674_v16 }
0x1997   :  { %v4433_v13 = vpop.f32.mrf.mxu0 }
0x1998   :  { %v4469_v24 = vmul.f32 0.70710677, %v4439_v26  ;;  %v4434_v63 = vadd.f32 %v7674_v16, %v4433_v13  ;;  %v4463_v23 = vmul.f32 0.5, %v4439_v26 }
0x199a   :  { %v4475_v43 = vand.u32 2147483647, %v4469_v24  ;;  %v4468_v21 = vmul.f32 0.70710677, %v4434_v63  ;;  %vm4595_vm1 = vcmp.lt.f32.partialorder %v4469_v24, 0.0  ;;  %v4462_v61 = vmul.f32 0.5, %v4434_v63 }
0x199c   :  { %v4481_v28 = vmul.f32 0.3275911, %v4475_v43  ;;  %v4474_v56 = vand.u32 2147483647, %v4468_v21  ;;  %v4559_v55 = vsub.f32 0.0, %v4475_v43  ;;  %vm4594_vm4 = vcmp.lt.f32.partialorder %v4468_v21, 0.0 }
0x199e   :  { %v4487_v46 = vadd.f32 1.0, %v4481_v28  ;;  %v4480_v25 = vmul.f32 0.3275911, %v4474_v56  ;;  %v4558_v38 = vsub.f32 0.0, %v4474_v56  ;;  %v4565_v2 = vmul.f32 %v4559_v55, %v4475_v43 }
0x19a0   :  { %6162 = vrcp.f32 %v4487_v46  ;;  %v4486_v31 = vadd.f32 1.0, %v4480_v25  ;;  %v4564_v17 = vmul.f32 %v4558_v38, %v4474_v56  ;;  %v4572_v33 = vmul.f32 1.442695, %v4565_v2 }
0x19a2   :  { %6164 = vrcp.f32 %v4486_v31  ;;  %v4570_v39 = vmul.f32 1.442695, %v4564_v17 }
0x19a3   :  { %6166 = vpow2.f32 %v4572_v33 }
0x19a4   :  { %6168 = vpow2.f32 %v4570_v39 }
0x19ad   :  { %v6163_v57 = vpop.eup %6162 }
0x19ae   :  { %v4505_v49 = vmul.f32 1.0614054, %v6163_v57 }
0x19af   :  { %v6165_v53 = vpop.eup %6164 }
0x19b0   :  { %v4511_v50 = vadd.f32 -1.4531521, %v4505_v49  ;;  %v4504_v8 = vmul.f32 1.0614054, %v6165_v53  ;;  %v6167_v37 = vpop.eup %6166 }
0x19b1   :  { %v6169_v35 = vpop.eup %6168 }
0x19b2   :  { %v4517_v54 = vmul.f32 %v6163_v57, %v4511_v50  ;;  %v4510_v0 = vadd.f32 -1.4531521, %v4504_v8  ;;  %v5064_v50 = vld [vmem:[#allocation2 + $0x220] ss:$0 sm:$0xff] }
0x19b4   :  { %v4523_v48 = vadd.f32 1.4214138, %v4517_v54  ;;  %v4516_v36 = vmul.f32 %v6165_v53, %v4510_v0 }
0x19b6   :  { %v4529_v51 = vmul.f32 %v6163_v57, %v4523_v48  ;;  %v4522_v18 = vadd.f32 1.4214138, %v4516_v36 }
0x19b8   :  { %v4535_v20 = vadd.f32 -0.28449672, %v4529_v51  ;;  %v4528_v41 = vmul.f32 %v6165_v53, %v4522_v18 }
0x19ba   :  { %v4541_v62 = vmul.f32 %v6163_v57, %v4535_v20  ;;  %v4534_v52 = vadd.f32 -0.28449672, %v4528_v41 }
0x19bc   :  { %v4547_v44 = vadd.f32 0.2548296, %v4541_v62  ;;  %v4540_v5 = vmul.f32 %v6165_v53, %v4534_v52 }
0x19be   :  { %v4553_v10 = vmul.f32 %v6163_v57, %v4547_v44  ;;  %v4546_v9 = vadd.f32 0.2548296, %v4540_v5 }
0x19c0   :  { %v4583_v22 = vmul.f32 %v6167_v37, %v4553_v10  ;;  %v4552_v1 = vmul.f32 %v6165_v53, %v4546_v9 }
0x19c2   :  { %v4589_v14 = vsub.f32 1.0, %v4583_v22  ;;  %v4582_v42 = vmul.f32 %v6169_v35, %v4552_v1 }
0x19c4   :  { %v4601_v59 = vsub.f32 0.0, %v4589_v14  ;;  %v4588_v19 = vsub.f32 1.0, %v4582_v42 }
0x19c6   :  { %v4607_v60 = vsel %vm4595_vm1, %v4601_v59, %v4589_v14  ;;  %v4600_v40 = vsub.f32 0.0, %v4588_v19 }
0x19c7   :  { %v4613_v11 = vadd.f32 1.0, %v4607_v60 }
0x19c8   :  { %v4606_v45 = vsel %vm4594_vm4, %v4600_v40, %v4588_v19 }
0x19c9   :  { %v4612_v6 = vadd.f32 1.0, %v4606_v45  ;;  %v4619_v7 = vmul.f32 %v4613_v11, %v4463_v23 }
0x19cb   :  { %v4618_v4 = vmul.f32 %v4612_v6, %v4462_v61 }
0x19cd   :  { %5866 = vmatprep.mubr.msk.f32.mxu1 %vm2305_vm13, %v4618_v4 }
0x19ce   :  { %5867 = vmatmul.mubr.msk.f32.vlgmr.msra.gmra.mxu1 %vm2305_vm13, %v4619_v7 }
0x19ff   :  { %v4291_v47 = vpop.xlane.xlu1 %4290 }
0x1a00   :  { %v4303_v3 = vmul.f32 0.03125, %v4291_v47 }
0x1a02   :  { %v4309_v32 = vadd.f32 1e-05, %v4303_v3 }
0x1a04   :  { %6170 = vrsqrt.f32 %v4309_v32 }
0x1a11   :  { %v6171_v13 = vpop.eup %6170 }
0x1a12   :  { %v4321_v24 = vmul.f32 %v6171_v13, %v7653_v30 }
0x1a14   :  { %v4331_v43 = vmul.f32 %v7634_v15, %v4321_v24 }
0x1a16   :  { %v4261_v21 = vpop.xlane.xlu0 %4260  ;;  %v4341_v63 = vadd.f32 %v7637_v34, %v4331_v43 }
0x1a17   :  { %v4269_v28 = vmul.f32 0.03125, %v4261_v21 }
0x1a18   :  { %5844 = vmatprep.mubr.msk.f32.mxu0 %vm48_vm0, %v4341_v63 }
0x1a19   :  { %v4275_v26 = vsub.f32 %v7661_v27, %v4269_v28 }
0x1a1a   :  { %v4264_v56 = vpop.xlane.xlu0 %4263 }
0x1a1b   :  { %v4270_v46 = vmul.f32 0.03125, %v4264_v56  ;;  %v4281_v25 = vmul.f32 %v4275_v26, %v4275_v26 }
0x1a1d   :  { %v4276_v31 = vsub.f32 %v7666_v58, %v4270_v46  ;;  %v4295_v55 = vsel %vm48_vm0, %v4281_v25, 0.0 }
0x1a1e   :  { %4296 = vadd.xlane.f32.xlu1 %v4295_v55  ;;  %v4294_v38 = vpop.xlane.xlu0 %4293 }
0x1a1f   :  { %v4304_v30 = vmul.f32 0.03125, %v4294_v38  ;;  %v4282_v2 = vmul.f32 %v4276_v31, %v4276_v31 }
0x1a21   :  { %v4310_v57 = vadd.f32 1e-05, %v4304_v30  ;;  %v4298_v17 = vsel %vm48_vm0, %v4282_v2, 0.0 }
0x1a22   :  { %4299 = vadd.xlane.f32.xlu0 %v4298_v17 }
0x1a23   :  { %6172 = vrsqrt.f32 %v4310_v57 }
0x1a30   :  { %v6173_v49 = vpop.eup %6172 }
0x1a31   :  { %v4322_v33 = vmul.f32 %v6173_v49, %v7663_v12 }
0x1a33   :  { %v4332_v27 = vmul.f32 %v7634_v15, %v4322_v33 }
0x1a35   :  { %v4342_v53 = vadd.f32 %v7637_v34, %v4332_v27 }
0x1a37   :  { %5845 = vmatmul.mubr.msk.f32.gmra.mxu0 %vm48_vm0, %v4342_v53 }
0x1a8e   :  { %v5868_v58 = vpop.f32.mrf.mxu1 }
0x1a90   :  { %v4712_v8 = vpop.f32.mrf.mxu1 }
0x1a91   :  { %v4713_v39 = vadd.f32 %v5064_v50, %v4712_v8 }
0x1a93   :  { %v7694_v54 = vadd.f32 %v4713_v39, %v7641_v29 }
0x1a95   :  { %v4737_v0 = vsel %vm48_vm0, %v7694_v54, 0.0 }
0x1a96   :  { %4738 = vadd.xlane.f32.xlu1 %v4737_v0 }
0x1aa7   :  { %v4297_v48 = vpop.xlane.xlu1 %4296 }
0x1aa8   :  { %v4305_v36 = vmul.f32 0.03125, %v4297_v48 }
0x1aaa   :  { %v4311_v12 = vadd.f32 1e-05, %v4305_v36 }
0x1aab   :  { %v4300_v51 = vpop.xlane.xlu0 %4299 }
0x1aac   :  { %6174 = vrsqrt.f32 %v4311_v12  ;;  %v4306_v18 = vmul.f32 0.03125, %v4300_v51 }
0x1aae   :  { %v4312_v20 = vadd.f32 1e-05, %v4306_v18 }
0x1ab0   :  { %6176 = vrsqrt.f32 %v4312_v20 }
0x1ab9   :  { %v6175_v41 = vpop.eup %6174 }
0x1aba   :  { %v4323_v62 = vmul.f32 %v6175_v41, %v4275_v26 }
0x1abc   :  { %v4333_v52 = vmul.f32 %v7634_v15, %v4323_v62 }
0x1abd   :  { %v6177_v44 = vpop.eup %6176 }
0x1abe   :  { %v4343_v29 = vadd.f32 %v7637_v34, %v4333_v52  ;;  %v4324_v5 = vmul.f32 %v6177_v44, %v4276_v31 }
0x1ac0   :  { %5847 = vmatprep.mubr.msk.f32.mxu0 %vm48_vm0, %v4343_v29  ;;  %v4334_v10 = vmul.f32 %v7634_v15, %v4324_v5  ;;  %v6257_v29 = vmov 0.0   ;;  %v4763_v5 = vld [vmem:[#allocation2 + $0x68] sm:$0xff] }
0x1ac1   :  { %5875 = vmatprep.subr.mxu0 %v6257_v29 }
0x1ac2   :  { %v4344_v37 = vadd.f32 %v7637_v34, %v4334_v10  ;;  %5876 = vmatpush3.msra.mxu0 %v4763_v5  ;;  %v4762_v10 = vld [vmem:[#allocation2 + $0x60] sm:$0xff] }
0x1ac3   :  { %5877 = vmatprep.subr.mxu0 %v6257_v29 }
0x1ac4   :  { %5848 = vmatmul.mubr.msk.f32.gmra.mxu0 %vm48_vm0, %v4344_v37  ;;  %v4761_v37 = vld [vmem:[#allocation2 + $0x58] sm:$0xff] }
0x1ac5   :  { %5878 = vmatpush3.msra.mxu0 %v4762_v10  ;;  %5883 = vmatprep.mubr.msk.f32.mxu0 %vm6258_vm7, %v6257_v29  ;;  %v5072_v10 = vld [vmem:[#allocation2 + $0x230] ss:$0 sm:$0xff] }
0x1ac6   :  { %5879 = vmatprep.subr.mxu0 %v6257_v29 }
0x1ac7   :  { %5880 = vmatpush3.msra.mxu0 %v4761_v37 }
0x1ac8   :  { %5881 = vmatprep.subr.mxu0 %v6257_v29  ;;  %v5071_v29 = vld [vmem:[#allocation2 + $0x228] ss:$0 sm:$0xff] }
0x1af7   :  { %v5846_v9 = vpop.f32.mrf.mxu0 }
0x1af8   :  { %v4449_v22 = vadd.f32 %v5846_v9, %v7674_v16  ;;  %v4760_v9 = vld [vmem:[#allocation2 + $0x50] sm:$0xff] }
0x1af9   :  { %v4443_v1 = vpop.f32.mrf.mxu0  ;;  %5882 = vmatpush3.msra.mxu0 %v4760_v9 }
0x1afa   :  { %v4471_v35 = vmul.f32 0.70710677, %v4449_v22  ;;  %v4444_v14 = vadd.f32 %v7674_v16, %v4443_v1  ;;  %v4465_v62 = vmul.f32 0.5, %v4449_v22 }
0x1afc   :  { %v4477_v42 = vand.u32 2147483647, %v4471_v35  ;;  %v4470_v59 = vmul.f32 0.70710677, %v4444_v14  ;;  %vm4597_vm5 = vcmp.lt.f32.partialorder %v4471_v35, 0.0  ;;  %v4464_v41 = vmul.f32 0.5, %v4444_v14 }
0x1afe   :  { %v4483_v19 = vmul.f32 0.3275911, %v4477_v42  ;;  %v4476_v60 = vand.u32 2147483647, %v4470_v59  ;;  %v4561_v15 = vsub.f32 0.0, %v4477_v42  ;;  %vm4596_vm6 = vcmp.lt.f32.partialorder %v4470_v59, 0.0 }
0x1b00   :  { %v4489_v40 = vadd.f32 1.0, %v4483_v19  ;;  %v4482_v11 = vmul.f32 0.3275911, %v4476_v60  ;;  %v4560_v34 = vsub.f32 0.0, %v4476_v60  ;;  %v4567_v61 = vmul.f32 %v4561_v15, %v4477_v42 }
0x1b02   :  { %6178 = vrcp.f32 %v4489_v40  ;;  %v4488_v45 = vadd.f32 1.0, %v4482_v11  ;;  %v4566_v23 = vmul.f32 %v4560_v34, %v4476_v60  ;;  %v4576_v7 = vmul.f32 1.442695, %v4567_v61 }
0x1b04   :  { %6180 = vrcp.f32 %v4488_v45  ;;  %v4574_v13 = vmul.f32 1.442695, %v4566_v23 }
0x1b05   :  { %6182 = vpow2.f32 %v4576_v7 }
0x1b06   :  { %6184 = vpow2.f32 %v4574_v13 }
0x1b0f   :  { %v6179_v6 = vpop.eup %6178 }
0x1b10   :  { %v4507_v4 = vmul.f32 1.0614054, %v6179_v6 }
0x1b11   :  { %v6181_v47 = vpop.eup %6180 }
0x1b12   :  { %v4513_v3 = vadd.f32 -1.4531521, %v4507_v4  ;;  %v4506_v32 = vmul.f32 1.0614054, %v6181_v47  ;;  %v6183_v57 = vpop.eup %6182 }
0x1b13   :  { %v6185_v58 = vpop.eup %6184 }
0x1b14   :  { %v4519_v24 = vmul.f32 %v6179_v6, %v4513_v3  ;;  %v4512_v43 = vadd.f32 -1.4531521, %v4506_v32 }
0x1b16   :  { %v4525_v21 = vadd.f32 1.4214138, %v4519_v24  ;;  %v4518_v63 = vmul.f32 %v6181_v47, %v4512_v43 }
0x1b18   :  { %v4531_v28 = vmul.f32 %v6179_v6, %v4525_v21  ;;  %v4524_v26 = vadd.f32 1.4214138, %v4518_v63 }
0x1b1a   :  { %v4537_v56 = vadd.f32 -0.28449672, %v4531_v28  ;;  %v4530_v46 = vmul.f32 %v6181_v47, %v4524_v26 }
0x1b1c   :  { %v4543_v25 = vmul.f32 %v6179_v6, %v4537_v56  ;;  %v4536_v31 = vadd.f32 -0.28449672, %v4530_v46 }
0x1b1e   :  { %v4549_v55 = vadd.f32 0.2548296, %v4543_v25  ;;  %v4542_v38 = vmul.f32 %v6181_v47, %v4536_v31 }
0x1b1f   :  { %v4739_v2 = vpop.xlane.xlu1 %4738 }
0x1b20   :  { %v4555_v30 = vmul.f32 %v6179_v6, %v4549_v55  ;;  %v4548_v17 = vadd.f32 0.2548296, %v4542_v38  ;;  %v4740_v49 = vmul.f32 0.03125, %v4739_v2 }
0x1b22   :  { %v4585_v33 = vmul.f32 %v6183_v57, %v4555_v30  ;;  %v4554_v27 = vmul.f32 %v6181_v47, %v4548_v17  ;;  %v7707_v53 = vsub.f32 %v7694_v54, %v4740_v49 }
0x1b24   :  { %v4591_v50 = vsub.f32 1.0, %v4585_v33  ;;  %v4584_v8 = vmul.f32 %v6185_v58, %v4554_v27  ;;  %v4742_v39 = vmul.f32 %v7707_v53, %v7707_v53 }
0x1b26   :  { %v4603_v0 = vsub.f32 0.0, %v4591_v50  ;;  %v4590_v48 = vsub.f32 1.0, %v4584_v8  ;;  %v4743_v36 = vsel %vm48_vm0, %v4742_v39, 0.0 }
0x1b27   :  { %4744 = vadd.xlane.f32.xlu0 %v4743_v36 }
0x1b28   :  { %v4609_v12 = vsel %vm4597_vm5, %v4603_v0, %v4591_v50  ;;  %v4602_v51 = vsub.f32 0.0, %v4590_v48 }
0x1b29   :  { %v4615_v18 = vadd.f32 1.0, %v4609_v12 }
0x1b2a   :  { %v4608_v20 = vsel %vm4596_vm6, %v4602_v51, %v4590_v48 }
0x1b2b   :  { %v4614_v54 = vadd.f32 1.0, %v4608_v20  ;;  %v4621_v44 = vmul.f32 %v4615_v18, %v4465_v62 }
0x1b2d   :  { %v4620_v52 = vmul.f32 %v4614_v54, %v4464_v41 }
0x1b2f   :  { %5869 = vmatprep.mubr.msk.f32.mxu1 %vm2305_vm13, %v4620_v52 }
0x1b30   :  { %5870 = vmatmul.mubr.msk.f32.gmra.mxu1 %vm2305_vm13, %v4621_v44 }
0x1b84   :  { %v5849_v22 = vpop.f32.mrf.mxu0 }
0x1b85   :  { %v4459_v1 = vadd.f32 %v5849_v22, %v7674_v16 }
0x1b86   :  { %v4453_v35 = vpop.f32.mrf.mxu0 }
0x1b87   :  { %v4473_v14 = vmul.f32 0.70710677, %v4459_v1  ;;  %v4454_v42 = vadd.f32 %v7674_v16, %v4453_v35  ;;  %v4467_v54 = vmul.f32 0.5, %v4459_v1  ;;  %v5073_v1 = vld [vmem:[#allocation2 + $0x70] ss:$0 sm:$0xff] }
0x1b89   :  { %v4479_v59 = vand.u32 2147483647, %v4473_v14  ;;  %v4472_v19 = vmul.f32 0.70710677, %v4454_v42  ;;  %vm4599_vm8 = vcmp.lt.f32.partialorder %v4473_v14, 0.0  ;;  %v4466_v20 = vmul.f32 0.5, %v4454_v42 }
0x1b8b   :  { %v4485_v60 = vmul.f32 0.3275911, %v4479_v59  ;;  %v4478_v40 = vand.u32 2147483647, %v4472_v19  ;;  %v4563_v34 = vsub.f32 0.0, %v4479_v59  ;;  %vm4598_vm9 = vcmp.lt.f32.partialorder %v4472_v19, 0.0 }
0x1b8d   :  { %v4491_v11 = vadd.f32 1.0, %v4485_v60  ;;  %v4484_v45 = vmul.f32 0.3275911, %v4478_v40  ;;  %v4562_v61 = vsub.f32 0.0, %v4478_v40  ;;  %v4569_v6 = vmul.f32 %v4563_v34, %v4479_v59 }
0x1b8f   :  { %6186 = vrcp.f32 %v4491_v11  ;;  %v4490_v15 = vadd.f32 1.0, %v4484_v45  ;;  %v4568_v4 = vmul.f32 %v4562_v61, %v4478_v40  ;;  %v4580_v47 = vmul.f32 1.442695, %v4569_v6 }
0x1b91   :  { %6188 = vrcp.f32 %v4490_v15  ;;  %v4578_v16 = vmul.f32 1.442695, %v4568_v4 }
0x1b92   :  { %6190 = vpow2.f32 %v4580_v47 }
0x1b93   :  { %6192 = vpow2.f32 %v4578_v16 }
0x1b9c   :  { %v6187_v23 = vpop.eup %6186 }
0x1b9d   :  { %v4509_v7 = vmul.f32 1.0614054, %v6187_v23 }
0x1b9e   :  { %v6189_v3 = vpop.eup %6188 }
0x1b9f   :  { %v4515_v32 = vadd.f32 -1.4531521, %v4509_v7  ;;  %v4508_v13 = vmul.f32 1.0614054, %v6189_v3  ;;  %v6191_v2 = vpop.eup %6190 }
0x1ba0   :  { %v6193_v33 = vpop.eup %6192 }
0x1ba1   :  { %v4521_v24 = vmul.f32 %v6187_v23, %v4515_v32  ;;  %v4514_v43 = vadd.f32 -1.4531521, %v4508_v13 }
0x1ba3   :  { %v4527_v21 = vadd.f32 1.4214138, %v4521_v24  ;;  %v4520_v63 = vmul.f32 %v6189_v3, %v4514_v43 }
0x1ba5   :  { %v4533_v28 = vmul.f32 %v6187_v23, %v4527_v21  ;;  %v4526_v26 = vadd.f32 1.4214138, %v4520_v63 }
0x1ba7   :  { %v4539_v56 = vadd.f32 -0.28449672, %v4533_v28  ;;  %v4532_v46 = vmul.f32 %v6189_v3, %v4526_v26 }
0x1ba9   :  { %v4545_v25 = vmul.f32 %v6187_v23, %v4539_v56  ;;  %v4538_v31 = vadd.f32 -0.28449672, %v4532_v46 }
0x1bab   :  { %v4551_v55 = vadd.f32 0.2548296, %v4545_v25  ;;  %v4544_v38 = vmul.f32 %v6189_v3, %v4538_v31 }
0x1bad   :  { %v4557_v30 = vmul.f32 %v6187_v23, %v4551_v55  ;;  %v4550_v57 = vadd.f32 0.2548296, %v4544_v38 }
0x1baf   :  { %v4587_v17 = vmul.f32 %v6191_v2, %v4557_v30  ;;  %v4556_v49 = vmul.f32 %v6189_v3, %v4550_v57 }
0x1bb0   :  { %v4745_v58 = vpop.xlane.xlu0 %4744 }
0x1bb1   :  { %v4593_v27 = vsub.f32 1.0, %v4587_v17  ;;  %v4586_v50 = vmul.f32 %v6193_v33, %v4556_v49  ;;  %v4746_v8 = vmul.f32 0.03125, %v4745_v58 }
0x1bb3   :  { %v4605_v39 = vsub.f32 0.0, %v4593_v27  ;;  %v4592_v0 = vsub.f32 1.0, %v4586_v50  ;;  %v4747_v48 = vadd.f32 1e-05, %v4746_v8 }
0x1bb5   :  { %v4611_v36 = vsel %vm4599_vm8, %v4605_v39, %v4593_v27  ;;  %v4604_v12 = vsub.f32 0.0, %v4592_v0  ;;  %6194 = vrsqrt.f32 %v4747_v48 }
0x1bb6   :  { %v4617_v51 = vadd.f32 1.0, %v4611_v36 }
0x1bb7   :  { %v4610_v18 = vsel %vm4598_vm9, %v4604_v12, %v4592_v0 }
0x1bb8   :  { %v4616_v41 = vadd.f32 1.0, %v4610_v18  ;;  %v4623_v52 = vmul.f32 %v4617_v51, %v4467_v54 }
0x1bba   :  { %v4622_v62 = vmul.f32 %v4616_v41, %v4466_v20 }
0x1bbc   :  { %5872 = vmatprep.mubr.msk.f32.mxu1 %vm2305_vm13, %v4622_v62 }
0x1bbd   :  { %5873 = vmatmul.mubr.msk.f32.gmra.mxu1 %vm2305_vm13, %v4623_v52 }
0x1bc2   :  { %v6195_v44 = vpop.eup %6194 }
0x1bc3   :  { %v4749_v5 = vmul.f32 %v6195_v44, %v7707_v53 }
0x1bc5   :  { %v4754_v37 = vmul.f32 %v5071_v29, %v4749_v5 }
0x1bc7   :  { %v4759_v9 = vadd.f32 %v5072_v10, %v4754_v37 }
0x1bc9   :  { %5884 = vmatmul.mubr.msk.f32.vlgmr.msra.gmra.mxu0 %vm48_vm0, %v4759_v9 }
0x1bf0   :  { %v5871_v22 = vpop.f32.mrf.mxu1 }
0x1bf2   :  { %v4721_v35 = vpop.f32.mrf.mxu1 }
0x1c7d   :  { %v5874_v14 = vpop.f32.mrf.mxu1 }
0x1c7f   :  { %v4729_v42 = vpop.f32.mrf.mxu1 }
0x1c89   :  { %v4838_v59 = vpop.f32.mrf.mxu0 }
0x1c8a   :  { %v4839_v19 = vadd.f32 %v5073_v1, %v4838_v59 }
0x1c8b   :  { %v5885_v60 = vpop.f32.mrf.mxu0 }
0x1c8c   :  { %4843 = vst.msk [vmem:[#allocation5] sm:$0x3] %vm4842_vm10, %v4839_v19 }
0x1c8d   :  { %6227 = shalt.err (!%p6224_p9)
}
0x1c8e   :  { %4853 = dma.vmem_to_hbm [thread:$0]  %s4851_s12, 32, %s7725_s2, [#allocation4]  }
0x1c8f   :  { %6238 = dma.done.wait [#allocation4], 32  }
0x1c90   :  { %6239 = vsyncadd [#allocation4], 4294967264 }
0x1c91   :  { %4857 = vsyncpa [#allocation3], 1 }
0x1c92   :  { %4858 = vsyncpa [#allocation4], 1 }

</bundles_post_ra>
